<compile_context>
chip_gen: v7x
topology: tpu7x:2x2x1
jax: 0.10.0
libtpu: 0.0.40
codegen_flags: <defaults>
</compile_context>

<pallas_src>
import numpy as np
import jax
import jax.numpy as jnp
from jax.experimental import pallas as pl
from jax.experimental.pallas import tpu as pltpu

# ----------------------- hyper-parameters from the nn.Module ------------------
IN_CHANNELS = 48          # data.x feature dim
HIDDEN      = 128         # hidden_size * 2 = 64 * 2 (= GAT hidden & out_channels)
OUT_GAT     = 128
NUM_LAYERS  = 6           # num_gcn_layers
EDGE_DIM    = 16          # synthetic edge_attr feature dim (dataset-defined originally)
FC_HIDDEN   = 64
FC_OUT      = 3
FEAT_PAD    = 128         # node features zero-padded 48 -> 128 so layers share stacked weights

NEG_SLOPE_ATT = 0.2       # GATv2Conv internal leaky_relu
NEG_SLOPE_ACT = 0.01      # nn.LeakyReLU default (GAT act + final F.leaky_relu)
BN_EPS        = 1e-5
NEG_INF       = -1e30


def _leaky(x, slope):
    return jnp.where(x > 0, x, slope * x)


def _select_score_dtype():
    """bf16 score path on v6e/v7x (packed-bf16 VALU); keep f32 on v5e."""
    try:
        info = pltpu.get_tpu_info()
        txt = " ".join(str(getattr(info, a, ""))
                       for a in ("chip_version", "version", "name")).lower()
        if "v5" in txt or "5e" in txt or "5p" in txt:
            return jnp.float32
    except Exception:
        pass
    return jnp.bfloat16


def _vmem_limit_bytes():
    """Generation-aware scoped-VMEM limit (headroom below physical capacity)."""
    try:
        cap = int(pltpu.get_tpu_info().vmem_capacity_bytes)
    except Exception:
        cap = 64 * 1024 * 1024            # conservative (v7x-sized) fallback
    return max(32 * 1024 * 1024, min(cap - 8 * 1024 * 1024, 112 * 1024 * 1024))


def _make_kernel(num_graphs, npg, n_nodes, score_dtype):
    def kernel(x0_ref, bias_ref, ed_ref,
               wlr_ref, blr_ref, we_ref, att_ref, cb_ref,
               gam_ref, bet_ref,
               fcw_ref, fcb_ref, fc2w_ref, fc2b_ref,
               out_ref, emb_ref,
               x_scr, xnew_scr):
        layer = pl.program_id(0)
        g = pl.program_id(1)
        row0 = pl.multiple_of(g * npg, npg)      # this graph's contiguous node rows

        # layer 0: load this graph's node features into the persistent carry.
        @pl.when(layer == 0)
        def _init():
            x_scr[pl.ds(row0, npg), :] = x0_ref[...]

        # per-layer parameters (streamed once per layer by the pipeline).
        w_lr = wlr_ref[0]            # [128, 256] bf16   fused lin_l | lin_r weight
        b_lr = blr_ref[0]            # [1, 256]   f32    fused bias
        we   = we_ref[0]             # [EDGE_DIM, 128] bf16
        att  = att_ref[0]            # [1, 128]   f32
        cb   = cb_ref[0]             # [1, 128]   f32    conv output bias

        # ---- fused lin_l / lin_r projection for this graph's nodes (256-lane MXU) ----
        xg = x_scr[pl.ds(row0, npg), :].astype(jnp.bfloat16)           # [NPG, 128]
        proj = jnp.dot(xg, w_lr, preferred_element_type=jnp.float32) + b_lr
        xl = proj[:, :HIDDEN]        # source side (aggregated values)   [NPG, 128]
        xr = proj[:, HIDDEN:]        # target side                       [NPG, 128]

        # ---- GATv2 attention restricted to in-graph sources (block-diagonal) ----
        ep = jnp.dot(ed_ref[...], we, preferred_element_type=jnp.float32)
        ep = ep.reshape(npg, npg, HIDDEN).astype(score_dtype)           # [i, j, h]

        xl_s = xl.astype(score_dtype)
        xr_s = xr.astype(score_dtype)
        s = _leaky(xr_s[:, None, :] + xl_s[None, :, :] + ep, NEG_SLOPE_ATT)
        logits = jnp.sum((s * att.astype(score_dtype)).astype(jnp.float32), axis=-1)

        logits = logits + bias_ref[...]          # additive 0 / -1e30 mask (no cmp+select)
        logits = logits - jnp.max(logits, axis=1, keepdims=True)
        p = jnp.exp(logits)                      # masked entries underflow to exactly 0
        denom = jnp.maximum(jnp.sum(p, axis=1, keepdims=True), 1e-20)
        alpha = (p * pl.reciprocal(denom, approx=True)).astype(jnp.bfloat16)

        # aggregate incoming messages + conv output bias
        xnew_scr[pl.ds(row0, npg), :] = (
            jnp.dot(alpha, xl.astype(jnp.bfloat16),
                    preferred_element_type=jnp.float32) + cb)

        last_graph = g == num_graphs - 1

        # ---- inter-layer BatchNorm (single-pass batch stats) + LeakyReLU ----
        @pl.when(jnp.logical_and(last_graph, layer < NUM_LAYERS - 1))
        def _bn_act():
            xn = xnew_scr[...]
            inv_n = 1.0 / n_nodes
            s1 = jnp.sum(xn, axis=0, keepdims=True)
            s2 = jnp.sum(xn * xn, axis=0, keepdims=True)
            mu = s1 * inv_n
            var = jnp.maximum(s2 * inv_n - mu * mu, 0.0)
            xh = (xn - mu) * jax.lax.rsqrt(var + BN_EPS)
            xh = xh * gam_ref[0] + bet_ref[0]
            x_scr[...] = _leaky(xh, NEG_SLOPE_ACT)

        # ---- last layer: batched per-graph mean/max pooling + the two FC heads ----
        @pl.when(jnp.logical_and(last_graph, layer == NUM_LAYERS - 1))
        def _readout():
            xn = xnew_scr[...].reshape(num_graphs, npg, HIDDEN)
            p1 = jnp.mean(xn, axis=1)                         # global_mean_pool [G, 128]
            p2 = jnp.max(xn, axis=1)                          # global_max_pool  [G, 128]
            fcw = fcw_ref[...]
            h = (jnp.dot(p1, fcw[:OUT_GAT, :], preferred_element_type=jnp.float32)
                 + jnp.dot(p2, fcw[OUT_GAT:, :], preferred_element_type=jnp.float32)
                 + fcb_ref[...])
            emb = _leaky(h, NEG_SLOPE_ACT)                    # x1
            emb_ref[...] = emb
            out_ref[...] = (jnp.dot(emb, fc2w_ref[...],
                                    preferred_element_type=jnp.float32)
                            + fc2b_ref[...])

    return kernel


def gat_forward(x_pad, mask_bias, ed_flat, params, num_graphs, nodes_per_graph):
    n = x_pad.shape[0]
    npg = nodes_per_graph
    assert n == num_graphs * npg
    assert npg % 8 == 0, "per-graph node count must be sublane (8) aligned"

    score_dtype = _select_score_dtype()
    kernel = _make_kernel(num_graphs, npg, n, score_dtype)

    in_specs = [
        pl.BlockSpec((npg, FEAT_PAD), lambda l, g: (g, 0)),               # x0 rows (per graph)
        pl.BlockSpec((npg, npg), lambda l, g: (g, 0)),                    # additive mask bias
        pl.BlockSpec((npg * npg, EDGE_DIM), lambda l, g: (g, 0)),         # dense edge attrs (streamed)
        pl.BlockSpec((1, FEAT_PAD, 2 * HIDDEN), lambda l, g: (l, 0, 0)),  # fused lin_l|lin_r W
        pl.BlockSpec((1, 1, 2 * HIDDEN), lambda l, g: (l, 0, 0)),         # fused bl|br
        pl.BlockSpec((1, EDGE_DIM, HIDDEN), lambda l, g: (l, 0, 0)),      # lin_edge W
        pl.BlockSpec((1, 1, HIDDEN), lambda l, g: (l, 0, 0)),             # att vector
        pl.BlockSpec((1, 1, HIDDEN), lambda l, g: (l, 0, 0)),             # conv output bias
        pl.BlockSpec((1, 1, HIDDEN), lambda l, g: (l, 0, 0)),             # BN gamma
        pl.BlockSpec((1, 1, HIDDEN), lambda l, g: (l, 0, 0)),             # BN beta
        pl.BlockSpec((2 * OUT_GAT, FC_HIDDEN), lambda l, g: (0, 0)),      # fc weight
        pl.BlockSpec((1, FC_HIDDEN), lambda l, g: (0, 0)),                # fc bias
        pl.BlockSpec((FC_HIDDEN, FC_OUT), lambda l, g: (0, 0)),           # fc2 weight
        pl.BlockSpec((1, FC_OUT), lambda l, g: (0, 0)),                   # fc2 bias
    ]
    out_specs = (
        pl.BlockSpec((num_graphs, FC_OUT), lambda l, g: (0, 0)),
        pl.BlockSpec((num_graphs, FC_HIDDEN), lambda l, g: (0, 0)),
    )
    out_shape = (
        jax.ShapeDtypeStruct((num_graphs, FC_OUT), jnp.float32),
        jax.ShapeDtypeStruct((num_graphs, FC_HIDDEN), jnp.float32),
    )
    scratch_shapes = [
        pltpu.VMEM((n, HIDDEN), jnp.float32),    # x carry across layers
        pltpu.VMEM((n, HIDDEN), jnp.float32),    # aggregated layer output
    ]

    lay_vec = lambda a: a[:, None, :]            # [L, H] -> [L, 1, H] per-layer streaming
    args = (
        x_pad.astype(jnp.float32),
        mask_bias.astype(jnp.float32),
        ed_flat.astype(jnp.bfloat16),
        params["wlr"].astype(jnp.bfloat16),
        lay_vec(params["blr"]),
        params["we"].astype(jnp.bfloat16),
        lay_vec(params["att"]),
        lay_vec(params["cb"]),
        lay_vec(params["gamma"]),
        lay_vec(params["beta"]),
        params["fc_w"], params["fc_b"], params["fc2_w"], params["fc2_b"],
    )

    out, emb = pl.pallas_call(
        kernel,
        grid=(NUM_LAYERS, num_graphs),
        in_specs=in_specs,
        out_specs=out_specs,
        out_shape=out_shape,
        scratch_shapes=scratch_shapes,
        compiler_params=pltpu.CompilerParams(
            dimension_semantics=("arbitrary", "arbitrary"),
            vmem_limit_bytes=_vmem_limit_bytes(),
        ),
    )(*args)
    return out, emb


def init_params(key):
    ks = jax.random.split(key, 8 * NUM_LAYERS + 4)
    it = iter(ks)

    def rnd(shape, scale=0.1):
        return scale * jax.random.normal(next(it), shape, dtype=jnp.float32)

    wlr, blr, we, att, cb = [], [], [], [], []
    for layer in range(NUM_LAYERS):
        in_dim = IN_CHANNELS if layer == 0 else HIDDEN
        w_l = jnp.zeros((FEAT_PAD, HIDDEN), jnp.float32).at[:in_dim].set(rnd((in_dim, HIDDEN)))
        w_r = jnp.zeros((FEAT_PAD, HIDDEN), jnp.float32).at[:in_dim].set(rnd((in_dim, HIDDEN)))
        wlr.append(jnp.concatenate([w_l, w_r], axis=1))                       # fused [128, 256]
        blr.append(jnp.concatenate([rnd((HIDDEN,)), rnd((HIDDEN,))], axis=0))  # fused [256]
        we.append(rnd((EDGE_DIM, HIDDEN)))
        att.append(rnd((HIDDEN,)))
        cb.append(jnp.zeros((HIDDEN,), jnp.float32))          # GATv2Conv output bias (zero-init)

    return {
        "wlr": jnp.stack(wlr), "blr": jnp.stack(blr), "we": jnp.stack(we),
        "att": jnp.stack(att), "cb": jnp.stack(cb),
        # BN params padded to NUM_LAYERS rows; the last row is never used (no norm after last conv)
        "gamma": jnp.ones((NUM_LAYERS, HIDDEN), jnp.float32),
        "beta":  jnp.zeros((NUM_LAYERS, HIDDEN), jnp.float32),
        "fc_w":  rnd((OUT_GAT * 2, FC_HIDDEN)),
        "fc_b":  rnd((1, FC_HIDDEN)),
        "fc2_w": rnd((FC_HIDDEN, FC_OUT)),
        "fc2_b": rnd((1, FC_OUT)),
    }


if __name__ == "__main__":
    NUM_GRAPHS = 2
    NODES_PER_GRAPH = 16
    N = NUM_GRAPHS * NODES_PER_GRAPH

    key = jax.random.PRNGKey(0)
    k_x, k_e, k_p = jax.random.split(key, 3)

    # node features (data.x), zero-padded 48 -> 128 feature lanes
    x = jax.random.normal(k_x, (N, IN_CHANNELS), dtype=jnp.float32)
    x_pad = jnp.zeros((N, FEAT_PAD), jnp.float32).at[:, :IN_CHANNELS].set(x)

    # synthetic edge_index: bidirectional ring inside each graph (PyG batching => no cross-graph edges)
    src_l, dst_l = [], []
    for gr in range(NUM_GRAPHS):
        base = gr * NODES_PER_GRAPH
        for kk in range(NODES_PER_GRAPH):
            a, b = base + kk, base + (kk + 1) % NODES_PER_GRAPH
            src_l += [a, b]
            dst_l += [b, a]
    src = np.array(src_l)
    dst = np.array(dst_l)
    E = src.shape[0]
    edge_attr = np.asarray(jax.random.normal(k_e, (E, EDGE_DIM), dtype=jnp.float32))

    # densify per graph (block-diagonal): additive softmax mask bias[target, src_local]
    # and edge_attr[graph, target_local, src_local, :]; add self-loops with
    # fill_value='mean' over incoming edge attrs (GATv2Conv default).
    mask_bias = np.full((N, NODES_PER_GRAPH), NEG_INF, np.float32)
    ed = np.zeros((NUM_GRAPHS, NODES_PER_GRAPH, NODES_PER_GRAPH, EDGE_DIM), np.float32)
    for e in range(E):
        s_g, d_g = int(src[e]), int(dst[e])
        gr = d_g // NODES_PER_GRAPH
        i_loc, j_loc = d_g % NODES_PER_GRAPH, s_g % NODES_PER_GRAPH
        mask_bias[d_g, j_loc] = 0.0
        ed[gr, i_loc, j_loc, :] = edge_attr[e]
    for i in range(N):
        gr, i_loc = i // NODES_PER_GRAPH, i % NODES_PER_GRAPH
        inc = edge_attr[dst == i]
        mask_bias[i, i_loc] = 0.0
        ed[gr, i_loc, i_loc, :] = inc.mean(axis=0) if inc.shape[0] else 0.0
    ed_flat = ed.reshape(NUM_GRAPHS * NODES_PER_GRAPH * NODES_PER_GRAPH, EDGE_DIM)

    params = init_params(k_p)

    out, emb = gat_forward(x_pad, jnp.asarray(mask_bias), jnp.asarray(ed_flat),
                           params, NUM_GRAPHS, NODES_PER_GRAPH)
    out, emb = jax.block_until_ready((out, emb))
    assert out.shape == (NUM_GRAPHS, FC_OUT)
    assert emb.shape == (NUM_GRAPHS, FC_HIDDEN)
    assert bool(jnp.all(jnp.isfinite(out))) and bool(jnp.all(jnp.isfinite(emb)))
    # TODO(synk): SAGPooling is constructed in __init__ but never used in forward(); omitted.
    print("KERNEL_OK")
</pallas_src>

<mosaic_0001>
module attributes {stable_mosaic.version = 11 : i64} {
  func.func @kernel(%arg0: i32, %arg1: i32, %arg2: memref<16x128xf32, #tpu.memory_space<vmem>>, %arg3: memref<16x16xf32, #tpu.memory_space<vmem>>, %arg4: memref<256x16xbf16, #tpu.memory_space<vmem>>, %arg5: memref<1x128x256xbf16, #tpu.memory_space<vmem>>, %arg6: memref<1x1x256xf32, #tpu.memory_space<vmem>>, %arg7: memref<1x16x128xbf16, #tpu.memory_space<vmem>>, %arg8: memref<1x1x128xf32, #tpu.memory_space<vmem>>, %arg9: memref<1x1x128xf32, #tpu.memory_space<vmem>>, %arg10: memref<1x1x128xf32, #tpu.memory_space<vmem>>, %arg11: memref<1x1x128xf32, #tpu.memory_space<vmem>>, %arg12: memref<256x64xf32, #tpu.memory_space<vmem>>, %arg13: memref<1x64xf32, #tpu.memory_space<vmem>>, %arg14: memref<64x3xf32, #tpu.memory_space<vmem>>, %arg15: memref<1x3xf32, #tpu.memory_space<vmem>>, %arg16: memref<2x3xf32, #tpu.memory_space<vmem>>, %arg17: memref<2x64xf32, #tpu.memory_space<vmem>>, %arg18: memref<32x128xf32, #tpu.memory_space<vmem>>, %arg19: memref<32x128xf32, #tpu.memory_space<vmem>>) attributes {dimension_semantics = [#tpu.dimension_semantics<arbitrary>, #tpu.dimension_semantics<arbitrary>], iteration_bounds = array<i64: 6, 2>, scalar_prefetch = 0 : i64, scratch_operands = 2 : i64, tpu.core_type = #tpu.core_type<tc>, window_params = [{transform_indices = @transform_0, window_bounds = array<i64: 16, 128>}, {transform_indices = @transform_1, window_bounds = array<i64: 16, 16>}, {transform_indices = @transform_2, window_bounds = array<i64: 256, 16>}, {transform_indices = @transform_3, window_bounds = array<i64: 1, 128, 256>}, {transform_indices = @transform_4, window_bounds = array<i64: 1, 1, 256>}, {transform_indices = @transform_5, window_bounds = array<i64: 1, 16, 128>}, {transform_indices = @transform_6, window_bounds = array<i64: 1, 1, 128>}, {transform_indices = @transform_7, window_bounds = array<i64: 1, 1, 128>}, {transform_indices = @transform_8, window_bounds = array<i64: 1, 1, 128>}, {transform_indices = @transform_9, window_bounds = array<i64: 1, 1, 128>}, {pipeline_mode = #tpu.pipeline_mode<synchronous>, transform_indices = @transform_10, window_bounds = array<i64: 256, 64>}, {pipeline_mode = #tpu.pipeline_mode<synchronous>, transform_indices = @transform_11, window_bounds = array<i64: 1, 64>}, {pipeline_mode = #tpu.pipeline_mode<synchronous>, transform_indices = @transform_12, window_bounds = array<i64: 64, 3>}, {pipeline_mode = #tpu.pipeline_mode<synchronous>, transform_indices = @transform_13, window_bounds = array<i64: 1, 3>}, {pipeline_mode = #tpu.pipeline_mode<synchronous>, transform_indices = @transform_14, window_bounds = array<i64: 2, 3>}, {pipeline_mode = #tpu.pipeline_mode<synchronous>, transform_indices = @transform_15, window_bounds = array<i64: 2, 64>}]} {
    %c16_i32 = arith.constant 16 : i32
    %0 = arith.muli %arg1, %c16_i32 : i32
    %1 = tpu.assume_multiple %0, 16 : i32
    %c0_i32 = arith.constant 0 : i32
    %2 = arith.cmpi eq, %arg0, %c0_i32 : i32
    %3 = arith.extui %2 : i1 to i32
    %c0_i32_0 = arith.constant 0 : i32
    %4 = arith.cmpi ne, %3, %c0_i32_0 : i32
    scf.if %4 {
      %c0_32 = arith.constant 0 : index
      %c0_33 = arith.constant 0 : index
      %76 = vector.load %arg2[%c0_32, %c0_33] : memref<16x128xf32, #tpu.memory_space<vmem>>, vector<16x128xf32>
      %77 = arith.index_cast %1 : i32 to index
      %c0_34 = arith.constant 0 : index
      %78 = vector.load %arg18[%77, %c0_34] : memref<32x128xf32, #tpu.memory_space<vmem>>, vector<16x128xf32>
      tpu.vector_store %arg18[%77, %c0_34], %76 {strides = array<i32>} : memref<32x128xf32, #tpu.memory_space<vmem>>, vector<16x128xf32>,
    } else {
    }
    %c0 = arith.constant 0 : index
    %c0_1 = arith.constant 0 : index
    %c0_2 = arith.constant 0 : index
    %5 = vector.load %arg5[%c0, %c0_1, %c0_2] : memref<1x128x256xbf16, #tpu.memory_space<vmem>>, vector<1x128x256xbf16>
    %6 = vector.shape_cast %5 : vector<1x128x256xbf16> to vector<128x256xbf16>
    %c0_3 = arith.constant 0 : index
    %c0_4 = arith.constant 0 : index
    %c0_5 = arith.constant 0 : index
    %7 = vector.load %arg6[%c0_3, %c0_4, %c0_5] : memref<1x1x256xf32, #tpu.memory_space<vmem>>, vector<1x1x256xf32>
    %8 = vector.shape_cast %7 : vector<1x1x256xf32> to vector<1x256xf32>
    %c0_6 = arith.constant 0 : index
    %c0_7 = arith.constant 0 : index
    %c0_8 = arith.constant 0 : index
    %9 = vector.load %arg7[%c0_6, %c0_7, %c0_8] : memref<1x16x128xbf16, #tpu.memory_space<vmem>>, vector<1x16x128xbf16>
    %10 = vector.shape_cast %9 : vector<1x16x128xbf16> to vector<16x128xbf16>
    %c0_9 = arith.constant 0 : index
    %c0_10 = arith.constant 0 : index
    %c0_11 = arith.constant 0 : index
    %11 = vector.load %arg8[%c0_9, %c0_10, %c0_11] : memref<1x1x128xf32, #tpu.memory_space<vmem>>, vector<1x1x128xf32>
    %12 = vector.shape_cast %11 : vector<1x1x128xf32> to vector<1x128xf32>
    %c0_12 = arith.constant 0 : index
    %c0_13 = arith.constant 0 : index
    %c0_14 = arith.constant 0 : index
    %13 = vector.load %arg9[%c0_12, %c0_13, %c0_14] : memref<1x1x128xf32, #tpu.memory_space<vmem>>, vector<1x1x128xf32>
    %14 = vector.shape_cast %13 : vector<1x1x128xf32> to vector<1x128xf32>
    %15 = arith.index_cast %1 : i32 to index
    %c0_15 = arith.constant 0 : index
    %16 = vector.load %arg18[%15, %c0_15] : memref<32x128xf32, #tpu.memory_space<vmem>>, vector<16x128xf32>
    %17 = arith.truncf %16 : vector<16x128xf32> to vector<16x128xbf16>
    %cst = arith.constant dense<0.000000e+00> : vector<16x256xf32>
    %18 = tpu.matmul %17, %6, %cst {dimension_numbers = #tpu.dot_dimension_numbers<[1], [0], [0], [1], [0, 0, 1, 1], [], []>} : vector<16x128xbf16>, vector<128x256xbf16>, vector<16x256xf32> -> vector<16x256xf32>
    %19 = vector.broadcast %8 : vector<1x256xf32> to vector<16x256xf32>
    %20 = arith.addf %18, %19 : vector<16x256xf32>
    %21 = vector.extract_strided_slice %20 {offsets = [0, 0], sizes = [16, 128], strides = [1, 1]} : vector<16x256xf32> to vector<16x128xf32>
    %22 = vector.extract_strided_slice %20 {offsets = [0, 128], sizes = [16, 128], strides = [1, 1]} : vector<16x256xf32> to vector<16x128xf32>
    %c0_16 = arith.constant 0 : index
    %c0_17 = arith.constant 0 : index
    %23 = vector.load %arg4[%c0_16, %c0_17] : memref<256x16xbf16, #tpu.memory_space<vmem>>, vector<256x16xbf16>
    %cst_18 = arith.constant dense<0.000000e+00> : vector<256x128xf32>
    %24 = tpu.matmul %23, %10, %cst_18 {dimension_numbers = #tpu.dot_dimension_numbers<[1], [0], [0], [1], [0, 0, 1, 1], [], []>} : vector<256x16xbf16>, vector<16x128xbf16>, vector<256x128xf32> -> vector<256x128xf32>
    %25 = vector.shape_cast %24 : vector<256x128xf32> to vector<16x16x128xf32>
    %26 = arith.truncf %25 : vector<16x16x128xf32> to vector<16x16x128xbf16>
    %27 = arith.truncf %21 : vector<16x128xf32> to vector<16x128xbf16>
    %28 = arith.truncf %22 : vector<16x128xf32> to vector<16x128xbf16>
    %29 = vector.shape_cast %28 : vector<16x128xbf16> to vector<16x1x128xbf16>
    %30 = vector.shape_cast %27 : vector<16x128xbf16> to vector<1x16x128xbf16>
    %31 = vector.broadcast %29 : vector<16x1x128xbf16> to vector<16x16x128xbf16>
    %32 = vector.broadcast %30 : vector<1x16x128xbf16> to vector<16x16x128xbf16>
    %33 = arith.addf %31, %32 : vector<16x16x128xbf16>
    %34 = arith.addf %33, %26 : vector<16x16x128xbf16>
    %cst_19 = arith.constant 0.000000e+00 : bf16
    %35 = vector.broadcast %cst_19 : bf16 to vector<16x16x128xbf16>
    %36 = arith.cmpf ogt, %34, %35 : vector<16x16x128xbf16>
    %cst_20 = arith.constant 2.001950e-01 : bf16
    %37 = vector.broadcast %cst_20 : bf16 to vector<16x16x128xbf16>
    %38 = arith.mulf %37, %34 : vector<16x16x128xbf16>
    %39 = arith.select %36, %34, %38 : vector<16x16x128xi1>, vector<16x16x128xbf16>
    %40 = arith.truncf %12 : vector<1x128xf32> to vector<1x128xbf16>
    %41 = vector.shape_cast %40 : vector<1x128xbf16> to vector<1x1x128xbf16>
    %42 = vector.broadcast %41 : vector<1x1x128xbf16> to vector<16x16x128xbf16>
    %43 = arith.mulf %39, %42 : vector<16x16x128xbf16>
    %44 = arith.extf %43 : vector<16x16x128xbf16> to vector<16x16x128xf32>
    %cst_21 = arith.constant dense<0.000000e+00> : vector<16x16xf32>
    %45 = vector.multi_reduction <add>, %44, %cst_21 [2] : vector<16x16x128xf32> to vector<16x16xf32>
    %c0_22 = arith.constant 0 : index
    %c0_23 = arith.constant 0 : index
    %46 = vector.load %arg3[%c0_22, %c0_23] : memref<16x16xf32, #tpu.memory_space<vmem>>, vector<16x16xf32>
    %47 = arith.addf %45, %46 : vector<16x16xf32>
    %cst_24 = arith.constant dense<0xFF800000> : vector<16xf32>
    %48 = vector.multi_reduction <maximumf>, %47, %cst_24 [1] : vector<16x16xf32> to vector<16xf32>
    %49 = vector.shape_cast %48 : vector<16xf32> to vector<16x1xf32>
    %50 = vector.broadcast %49 : vector<16x1xf32> to vector<16x16xf32>
    %51 = arith.subf %47, %50 : vector<16x16xf32>
    %52 = math.exp %51 : vector<16x16xf32>
    %cst_25 = arith.constant dense<0.000000e+00> : vector<16xf32>
    %53 = vector.multi_reduction <add>, %52, %cst_25 [1] : vector<16x16xf32> to vector<16xf32>
    %54 = vector.shape_cast %53 : vector<16xf32> to vector<16x1xf32>
    %cst_26 = arith.constant 9.99999968E-21 : f32
    %55 = vector.broadcast %cst_26 : f32 to vector<16x1xf32>
    %56 = arith.maximumf %54, %55 : vector<16x1xf32>
    %57 = tpu.reciprocal %56 {approx = true} : vector<16x1xf32> -> vector<16x1xf32>
    %58 = vector.broadcast %57 : vector<16x1xf32> to vector<16x16xf32>
    %59 = arith.mulf %52, %58 : vector<16x16xf32>
    %60 = arith.truncf %59 : vector<16x16xf32> to vector<16x16xbf16>
    %61 = arith.truncf %21 : vector<16x128xf32> to vector<16x128xbf16>
    %cst_27 = arith.constant dense<0.000000e+00> : vector<16x128xf32>
    %62 = tpu.matmul %60, %61, %cst_27 {dimension_numbers = #tpu.dot_dimension_numbers<[1], [0], [0], [1], [0, 0, 1, 1], [], []>} : vector<16x16xbf16>, vector<16x128xbf16>, vector<16x128xf32> -> vector<16x128xf32>
    %63 = vector.broadcast %14 : vector<1x128xf32> to vector<16x128xf32>
    %64 = arith.addf %62, %63 : vector<16x128xf32>
    %65 = arith.index_cast %1 : i32 to index
    %c0_28 = arith.constant 0 : index
    %66 = vector.load %arg19[%65, %c0_28] : memref<32x128xf32, #tpu.memory_space<vmem>>, vector<16x128xf32>
    tpu.vector_store %arg19[%65, %c0_28], %64 {strides = array<i32>} : memref<32x128xf32, #tpu.memory_space<vmem>>, vector<16x128xf32>,
    %c1_i32 = arith.constant 1 : i32
    %67 = arith.cmpi eq, %arg1, %c1_i32 : i32
    %c5_i32 = arith.constant 5 : i32
    %68 = arith.cmpi slt, %arg0, %c5_i32 : i32
    %69 = arith.andi %67, %68 : i1
    %70 = arith.extui %69 : i1 to i32
    %c0_i32_29 = arith.constant 0 : i32
    %71 = arith.cmpi ne, %70, %c0_i32_29 : i32
    scf.if %71 {
      %c0_32 = arith.constant 0 : index
      %c0_33 = arith.constant 0 : index
      %76 = vector.load %arg19[%c0_32, %c0_33] : memref<32x128xf32, #tpu.memory_space<vmem>>, vector<32x128xf32>
      %cst_34 = arith.constant dense<0.000000e+00> : vector<128xf32>
      %77 = vector.multi_reduction <add>, %76, %cst_34 [0] : vector<32x128xf32> to vector<128xf32>
      %78 = vector.shape_cast %77 : vector<128xf32> to vector<1x128xf32>
      %79 = arith.mulf %76, %76 : vector<32x128xf32>
      %cst_35 = arith.constant dense<0.000000e+00> : vector<128xf32>
      %80 = vector.multi_reduction <add>, %79, %cst_35 [0] : vector<32x128xf32> to vector<128xf32>
      %81 = vector.shape_cast %80 : vector<128xf32> to vector<1x128xf32>
      %cst_36 = arith.constant 3.125000e-02 : f32
      %82 = vector.broadcast %cst_36 : f32 to vector<1x128xf32>
      %83 = arith.mulf %78, %82 : vector<1x128xf32>
      %cst_37 = arith.constant 3.125000e-02 : f32
      %84 = vector.broadcast %cst_37 : f32 to vector<1x128xf32>
      %85 = arith.mulf %81, %84 : vector<1x128xf32>
      %86 = arith.mulf %83, %83 : vector<1x128xf32>
      %87 = arith.subf %85, %86 : vector<1x128xf32>
      %cst_38 = arith.constant 0.000000e+00 : f32
      %88 = vector.broadcast %cst_38 : f32 to vector<1x128xf32>
      %89 = arith.maximumf %87, %88 : vector<1x128xf32>
      %90 = vector.broadcast %83 : vector<1x128xf32> to vector<32x128xf32>
      %91 = arith.subf %76, %90 : vector<32x128xf32>
      %cst_39 = arith.constant 9.99999974E-6 : f32
      %92 = vector.broadcast %cst_39 : f32 to vector<1x128xf32>
      %93 = arith.addf %89, %92 : vector<1x128xf32>
      %94 = math.rsqrt %93 : vector<1x128xf32>
      %95 = vector.broadcast %94 : vector<1x128xf32> to vector<32x128xf32>
      %96 = arith.mulf %91, %95 : vector<32x128xf32>
      %c0_40 = arith.constant 0 : index
      %c0_41 = arith.constant 0 : index
      %c0_42 = arith.constant 0 : index
      %97 = vector.load %arg10[%c0_40, %c0_41, %c0_42] : memref<1x1x128xf32, #tpu.memory_space<vmem>>, vector<1x1x128xf32>
      %98 = vector.shape_cast %97 : vector<1x1x128xf32> to vector<1x128xf32>
      %99 = vector.broadcast %98 : vector<1x128xf32> to vector<32x128xf32>
      %100 = arith.mulf %96, %99 : vector<32x128xf32>
      %c0_43 = arith.constant 0 : index
      %c0_44 = arith.constant 0 : index
      %c0_45 = arith.constant 0 : index
      %101 = vector.load %arg11[%c0_43, %c0_44, %c0_45] : memref<1x1x128xf32, #tpu.memory_space<vmem>>, vector<1x1x128xf32>
      %102 = vector.shape_cast %101 : vector<1x1x128xf32> to vector<1x128xf32>
      %103 = vector.broadcast %102 : vector<1x128xf32> to vector<32x128xf32>
      %104 = arith.addf %100, %103 : vector<32x128xf32>
      %cst_46 = arith.constant 0.000000e+00 : f32
      %105 = vector.broadcast %cst_46 : f32 to vector<32x128xf32>
      %106 = arith.cmpf ogt, %104, %105 : vector<32x128xf32>
      %cst_47 = arith.constant 0.00999999977 : f32
      %107 = vector.broadcast %cst_47 : f32 to vector<32x128xf32>
      %108 = arith.mulf %107, %104 : vector<32x128xf32>
      %109 = arith.select %106, %104, %108 : vector<32x128xi1>, vector<32x128xf32>
      %c0_48 = arith.constant 0 : index
      %c0_49 = arith.constant 0 : index
      %110 = vector.load %arg18[%c0_48, %c0_49] : memref<32x128xf32, #tpu.memory_space<vmem>>, vector<32x128xf32>
      tpu.vector_store %arg18[%c0_48, %c0_49], %109 {strides = array<i32>} : memref<32x128xf32, #tpu.memory_space<vmem>>, vector<32x128xf32>,
    } else {
    }
    %c5_i32_30 = arith.constant 5 : i32
    %72 = arith.cmpi eq, %arg0, %c5_i32_30 : i32
    %73 = arith.andi %67, %72 : i1
    %74 = arith.extui %73 : i1 to i32
    %c0_i32_31 = arith.constant 0 : i32
    %75 = arith.cmpi ne, %74, %c0_i32_31 : i32
    scf.if %75 {
      %c0_32 = arith.constant 0 : index
      %c0_33 = arith.constant 0 : index
      %76 = vector.load %arg19[%c0_32, %c0_33] : memref<32x128xf32, #tpu.memory_space<vmem>>, vector<32x128xf32>
      %77 = vector.shape_cast %76 : vector<32x128xf32> to vector<2x16x128xf32>
      %cst_34 = arith.constant dense<0.000000e+00> : vector<2x128xf32>
      %78 = vector.multi_reduction <add>, %77, %cst_34 [1] : vector<2x16x128xf32> to vector<2x128xf32>
      %cst_35 = arith.constant 1.600000e+01 : f32
      %79 = vector.broadcast %cst_35 : f32 to vector<2x128xf32>
      %80 = arith.divf %78, %79 : vector<2x128xf32>
      %cst_36 = arith.constant dense<0xFF800000> : vector<2x128xf32>
      %81 = vector.multi_reduction <maximumf>, %77, %cst_36 [1] : vector<2x16x128xf32> to vector<2x128xf32>
      %c0_37 = arith.constant 0 : index
      %c0_38 = arith.constant 0 : index
      %82 = vector.load %arg12[%c0_37, %c0_38] : memref<256x64xf32, #tpu.memory_space<vmem>>, vector<256x64xf32>
      %83 = vector.extract_strided_slice %82 {offsets = [0, 0], sizes = [128, 64], strides = [1, 1]} : vector<256x64xf32> to vector<128x64xf32>
      %cst_39 = arith.constant dense<0.000000e+00> : vector<2x64xf32>
      %84 = tpu.matmul %80, %83, %cst_39 {dimension_numbers = #tpu.dot_dimension_numbers<[1], [0], [0], [1], [0, 0, 1, 1], [], []>} : vector<2x128xf32>, vector<128x64xf32>, vector<2x64xf32> -> vector<2x64xf32>
      %85 = vector.extract_strided_slice %82 {offsets = [128, 0], sizes = [128, 64], strides = [1, 1]} : vector<256x64xf32> to vector<128x64xf32>
      %cst_40 = arith.constant dense<0.000000e+00> : vector<2x64xf32>
      %86 = tpu.matmul %81, %85, %cst_40 {dimension_numbers = #tpu.dot_dimension_numbers<[1], [0], [0], [1], [0, 0, 1, 1], [], []>} : vector<2x128xf32>, vector<128x64xf32>, vector<2x64xf32> -> vector<2x64xf32>
      %87 = arith.addf %84, %86 : vector<2x64xf32>
      %c0_41 = arith.constant 0 : index
      %c0_42 = arith.constant 0 : index
      %88 = vector.load %arg13[%c0_41, %c0_42] : memref<1x64xf32, #tpu.memory_space<vmem>>, vector<1x64xf32>
      %89 = vector.broadcast %88 : vector<1x64xf32> to vector<2x64xf32>
      %90 = arith.addf %87, %89 : vector<2x64xf32>
      %cst_43 = arith.constant 0.000000e+00 : f32
      %91 = vector.broadcast %cst_43 : f32 to vector<2x64xf32>
      %92 = arith.cmpf ogt, %90, %91 : vector<2x64xf32>
      %cst_44 = arith.constant 0.00999999977 : f32
      %93 = vector.broadcast %cst_44 : f32 to vector<2x64xf32>
      %94 = arith.mulf %93, %90 : vector<2x64xf32>
      %95 = arith.select %92, %90, %94 : vector<2x64xi1>, vector<2x64xf32>
      %c0_45 = arith.constant 0 : index
      %c0_46 = arith.constant 0 : index
      %96 = vector.load %arg17[%c0_45, %c0_46] : memref<2x64xf32, #tpu.memory_space<vmem>>, vector<2x64xf32>
      tpu.vector_store %arg17[%c0_45, %c0_46], %95 {strides = array<i32>} : memref<2x64xf32, #tpu.memory_space<vmem>>, vector<2x64xf32>,
      %c0_47 = arith.constant 0 : index
      %c0_48 = arith.constant 0 : index
      %97 = vector.load %arg14[%c0_47, %c0_48] : memref<64x3xf32, #tpu.memory_space<vmem>>, vector<64x3xf32>
      %cst_49 = arith.constant dense<0.000000e+00> : vector<2x3xf32>
      %98 = tpu.matmul %95, %97, %cst_49 {dimension_numbers = #tpu.dot_dimension_numbers<[1], [0], [0], [1], [0, 0, 1, 1], [], []>} : vector<2x64xf32>, vector<64x3xf32>, vector<2x3xf32> -> vector<2x3xf32>
      %c0_50 = arith.constant 0 : index
      %c0_51 = arith.constant 0 : index
      %99 = vector.load %arg15[%c0_50, %c0_51] : memref<1x3xf32, #tpu.memory_space<vmem>>, vector<1x3xf32>
      %100 = vector.broadcast %99 : vector<1x3xf32> to vector<2x3xf32>
      %101 = arith.addf %98, %100 : vector<2x3xf32>
      %c0_52 = arith.constant 0 : index
      %c0_53 = arith.constant 0 : index
      %102 = vector.load %arg16[%c0_52, %c0_53] : memref<2x3xf32, #tpu.memory_space<vmem>>, vector<2x3xf32>
      tpu.vector_store %arg16[%c0_52, %c0_53], %101 {strides = array<i32>} : memref<2x3xf32, #tpu.memory_space<vmem>>, vector<2x3xf32>,
    } else {
    }
    return
  }
  func.func @transform_0(%arg0: i32, %arg1: i32) -> (i32, i32) {
    %c0_i32 = arith.constant 0 : i32
    %c0_i32_0 = arith.constant 0 : i32
    return %arg1, %c0_i32 : i32, i32
  }
  func.func @transform_1(%arg0: i32, %arg1: i32) -> (i32, i32) {
    %c0_i32 = arith.constant 0 : i32
    %c0_i32_0 = arith.constant 0 : i32
    return %arg1, %c0_i32 : i32, i32
  }
  func.func @transform_2(%arg0: i32, %arg1: i32) -> (i32, i32) {
    %c0_i32 = arith.constant 0 : i32
    %c0_i32_0 = arith.constant 0 : i32
    return %arg1, %c0_i32 : i32, i32
  }
  func.func @transform_3(%arg0: i32, %arg1: i32) -> (i32, i32, i32) {
    %c0_i32 = arith.constant 0 : i32
    %c0_i32_0 = arith.constant 0 : i32
    %c0_i32_1 = arith.constant 0 : i32
    return %arg0, %c0_i32, %c0_i32_0 : i32, i32, i32
  }
  func.func @transform_4(%arg0: i32, %arg1: i32) -> (i32, i32, i32) {
    %c0_i32 = arith.constant 0 : i32
    %c0_i32_0 = arith.constant 0 : i32
    %c0_i32_1 = arith.constant 0 : i32
    return %arg0, %c0_i32, %c0_i32_0 : i32, i32, i32
  }
  func.func @transform_5(%arg0: i32, %arg1: i32) -> (i32, i32, i32) {
    %c0_i32 = arith.constant 0 : i32
    %c0_i32_0 = arith.constant 0 : i32
    %c0_i32_1 = arith.constant 0 : i32
    return %arg0, %c0_i32, %c0_i32_0 : i32, i32, i32
  }
  func.func @transform_6(%arg0: i32, %arg1: i32) -> (i32, i32, i32) {
    %c0_i32 = arith.constant 0 : i32
    %c0_i32_0 = arith.constant 0 : i32
    %c0_i32_1 = arith.constant 0 : i32
    return %arg0, %c0_i32, %c0_i32_0 : i32, i32, i32
  }
  func.func @transform_7(%arg0: i32, %arg1: i32) -> (i32, i32, i32) {
    %c0_i32 = arith.constant 0 : i32
    %c0_i32_0 = arith.constant 0 : i32
    %c0_i32_1 = arith.constant 0 : i32
    return %arg0, %c0_i32, %c0_i32_0 : i32, i32, i32
  }
  func.func @transform_8(%arg0: i32, %arg1: i32) -> (i32, i32, i32) {
    %c0_i32 = arith.constant 0 : i32
    %c0_i32_0 = arith.constant 0 : i32
    %c0_i32_1 = arith.constant 0 : i32
    return %arg0, %c0_i32, %c0_i32_0 : i32, i32, i32
  }
  func.func @transform_9(%arg0: i32, %arg1: i32) -> (i32, i32, i32) {
    %c0_i32 = arith.constant 0 : i32
    %c0_i32_0 = arith.constant 0 : i32
    %c0_i32_1 = arith.constant 0 : i32
    return %arg0, %c0_i32, %c0_i32_0 : i32, i32, i32
  }
  func.func @transform_10(%arg0: i32, %arg1: i32) -> (i32, i32) {
    %c0_i32 = arith.constant 0 : i32
    %c0_i32_0 = arith.constant 0 : i32
    %c0_i32_1 = arith.constant 0 : i32
    return %c0_i32, %c0_i32_0 : i32, i32
  }
  func.func @transform_11(%arg0: i32, %arg1: i32) -> (i32, i32) {
    %c0_i32 = arith.constant 0 : i32
    %c0_i32_0 = arith.constant 0 : i32
    %c0_i32_1 = arith.constant 0 : i32
    return %c0_i32, %c0_i32_0 : i32, i32
  }
  func.func @transform_12(%arg0: i32, %arg1: i32) -> (i32, i32) {
    %c0_i32 = arith.constant 0 : i32
    %c0_i32_0 = arith.constant 0 : i32
    %c0_i32_1 = arith.constant 0 : i32
    return %c0_i32, %c0_i32_0 : i32, i32
  }
  func.func @transform_13(%arg0: i32, %arg1: i32) -> (i32, i32) {
    %c0_i32 = arith.constant 0 : i32
    %c0_i32_0 = arith.constant 0 : i32
    %c0_i32_1 = arith.constant 0 : i32
    return %c0_i32, %c0_i32_0 : i32, i32
  }
  func.func @transform_14(%arg0: i32, %arg1: i32) -> (i32, i32) {
    %c0_i32 = arith.constant 0 : i32
    %c0_i32_0 = arith.constant 0 : i32
    %c0_i32_1 = arith.constant 0 : i32
    return %c0_i32, %c0_i32_0 : i32, i32
  }
  func.func @transform_15(%arg0: i32, %arg1: i32) -> (i32, i32) {
    %c0_i32 = arith.constant 0 : i32
    %c0_i32_0 = arith.constant 0 : i32
    %c0_i32_1 = arith.constant 0 : i32
    return %c0_i32, %c0_i32_0 : i32, i32
  }
}

</mosaic_0001>

<bundles_post_ra>
// kernel: tpu_custom_call.1
= control target key start
LH: loop header
LB: loop body
LE: loop exit
PB: predicated region body
PF: predicated region fallthrough
CT: control target
= control target key end

     0   :  { %s6254_s0 = inlined_call_operand.hbm [shape: f32[32,128], index: 0, kind: input, shape index: {}]   ;;  %s6255_s1 = inlined_call_operand.vmem [shape: f32[32,16], index: 1, kind: input, shape index: {}]   ;;  %s6256_s2 = inlined_call_operand.vmem [shape: bf16[512,16], index: 2, kind: input, shape index: {}]   ;;  %s6257_s3 = inlined_call_operand.vmem [shape: bf16[6,128,256], index: 3, kind: input, shape index: {}]   ;;  %s6258_s4 = inlined_call_operand.vmem [shape: f32[6,1,256], index: 4, kind: input, shape index: {}]   ;;  %s6259_s5 = inlined_call_operand.hbm [shape: bf16[6,16,128], index: 5, kind: input, shape index: {}]   ;;  %s6260_s6 = inlined_call_operand.vmem [shape: f32[6,1,128], index: 6, kind: input, shape index: {}]   ;;  %s6261_s7 = inlined_call_operand.vmem [shape: f32[6,1,128], index: 7, kind: input, shape index: {}]   ;;  %s6262_s8 = inlined_call_operand.vmem [shape: f32[6,1,128], index: 8, kind: input, shape index: {}]   ;;  %s6263_s9 = inlined_call_operand.vmem [shape: f32[6,1,128], index: 9, kind: input, shape index: {}]   ;;  %s6264_s10 = inlined_call_operand.vmem [shape: f32[256,64], index: 10, kind: input, shape index: {}]   ;;  %s6265_s11 = inlined_call_operand.vmem [shape: f32[1,64], index: 11, kind: input, shape index: {}]   ;;  %s6266_s12 = inlined_call_operand.vmem [shape: f32[64,3], index: 12, kind: input, shape index: {}]   ;;  %s6267_s13 = inlined_call_operand.vmem [shape: f32[1,3], index: 13, kind: input, shape index: {}]   ;;  %s6268_s14 = inlined_call_operand.hbm [shape: f32[2,3], index: 14, kind: output, shape index: {0}]   ;;  %s6269_s15 = inlined_call_operand.hbm [shape: f32[2,64], index: 15, kind: output, shape index: {1}]  }
   0x1   :  { %6320 = sst [smem:[#allocation40_spill]] %s6254_s0 }
   0x2   :  { %6321 = sst [smem:[#allocation41_spill]] %s6255_s1 }
   0x3   :  { %6322 = sst [smem:[#allocation42_spill]] %s6256_s2 }
   0x4   :  { %6323 = sst [smem:[#allocation43_spill]] %s6257_s3 }
   0x5   :  { %6324 = sst [smem:[#allocation44_spill]] %s6259_s5 }
   0x6   :  { %6325 = sst [smem:[#allocation45_spill]] %s6260_s6 }
   0x7   :  { %6326 = sst [smem:[#allocation46_spill]] %s6261_s7 }
   0x8   :  { %6327 = sst [smem:[#allocation47_spill]] %s6262_s8 }
   0x9   :  { %6328 = sst [smem:[#allocation48_spill]] %s6263_s9 }
   0xa   :  { %6329 = sst [smem:[#allocation49_spill]] %s6264_s10 }
   0xb   :  { %6330 = sst [smem:[#allocation50_spill]] %s6265_s11 }
   0xc   :  { %6331 = sst [smem:[#allocation51_spill]] %s6266_s12 }
   0xd   :  { %6332 = sst [smem:[#allocation52_spill]] %s6267_s13 }
   0xe   :  { %6333 = sst [smem:[#allocation53_spill]] %s6268_s14 }
   0xf   :  { %6334 = sst [smem:[#allocation54_spill]] %s6269_s15 }
  0x10   :  { %21 = vsyncpa [#allocation5], 0 }
  0x11   :  { %23 = vsyncpa [#allocation5 + $0x1], 0 }
  0x12   :  { %24 = vsyncpa [#allocation8], 0 }
  0x13   :  { %26 = vsyncpa [#allocation8 + $0x1], 0 }
  0x14   :  { %27 = vsyncpa [#allocation6], 0 }
  0x15   :  { %28 = vsyncpa [#allocation11], 0  ;;  %s4686_s18 = smov 0   ;;  %s4688_s19 = smov 0  }
  0x16   :  { %s4690_s20 = smov 0   ;;  %s4692_s21 = smov 0  }
  0x17   :  { %s4694_s22 = smov 0   ;;  %s4696_s23 = smov 0  }
  0x18   :  { %s4698_s24 = smov 0   ;;  %s4700_s25 = smov 0  }
  0x19   :  { %s4702_s26 = smov 0   ;;  %s4704_s27 = smov 0  }
  0x1a   :  { %s4706_s28 = smov 0  }
  0x1b LB: > { %6335 = sst [smem:[#allocation16_spill]] %s4553_s19  ;;  %s43_s30 = sadd.s32 1, %s4581_s26  ;;  %s4589_s28 = sphi %s4706_s28, %s34_s28   ;;  %s4585_s27 = sphi %s4704_s27, %s6463_s27   ;;  %s4581_s26 = sphi %s4702_s26, %s6462_s26   ;;  %s4577_s25 = sphi %s4700_s25, %s6461_s25   ;;  %s4573_s24 = sphi %s4698_s24, %s6460_s24   ;;  %s4569_s23 = sphi %s4696_s23, %s6459_s23   ;;  %s4565_s22 = sphi %s4694_s22, %s6458_s22   ;;  %s4561_s21 = sphi %s4692_s21, %s6457_s21   ;;  %s4557_s20 = sphi %s4690_s20, %s6456_s20   ;;  %s4553_s19 = sphi %s4688_s19, %s6455_s19   ;;  %s4549_s18 = sphi %s4686_s18, %s6454_s18  }
  0x1c   : > { %6336 = sst [smem:[#allocation17_spill]] %s4557_s20  ;;  %p4741_p0 = scmp.ge.s32.totalorder %s43_s30, 2 }
  0x1d   : > { %6337 = sst [smem:[#allocation18_spill]] %s4565_s22  ;;  %s53_s17 = sadd.s32 1, %s4569_s23 }
  0x1e   : > { %6338 = sst [smem:[#allocation19_spill]] %s4569_s23  ;;  %p60_p1 = scmp.ne.s32.totalorder %s4569_s23, %s4565_s22 }
  0x1f   : > { %6339 = sst [smem:[#allocation20_spill]] %s4581_s26  ;;  %p6276_p2 = scmp.eq.s32.totalorder %s4589_s28, 0 }
  0x20   : > { %6340 = sst [smem:[#allocation21_spill]] %s4585_s27  ;;  %s6465_s30 = smov (%p4741_p0, %s43_s30), 0 }
  0x21   : > { %6342 = sst [smem:[#allocation22_spill]] %s6465_s30  ;;  %p4755_p3 = por %p6276_p2, %p60_p1 }
  0x22   : > { %p66_p4 = scmp.ne.s32.totalorder %s4565_s22, %s4561_s21  ;;  %s50_s29 = ssub.s32 %s4581_s26, %s6465_s30 }
  0x23   : > { %s6344_s14 = sadd.s32 4294967295, %s4589_s28   ;;  %p51_p6 = scmp.eq.s32.totalorder %s50_s29, 0 }
  0x24   : > { %p4764_p5 = scmp.eq.s32.totalorder %s6344_s14, 0  ;;  %p6275_p8 = scmp.lt.s32.totalorder %s4589_s28, 12 }
  0x25   : > { %s4776_s12 = scalar_select %p51_p6, %s4569_s23, %s53_s17  }
  0x26   : > { %s6345_s13 = scalar_select %p4764_p5, 1, 0 }
  0x27   : > { %p4770_p7 = por %p4764_p5, %p66_p4  ;;  %6347 = sst [smem:[#allocation23_spill]] %s4776_s12 }
  0x28   : > { %s462_s10 = sand.u32 1, %s4569_s23   ;;  %s3881_s9 = sshll.u32 %s4581_s26, 8 }
  0x29   : > { %s6346_s11 = scalar_select %p4770_p7, 1, 0 }
  0x2a   : > { %s3792_s8 = sshll.u32 %s462_s10, 4  ;;  %s6348_s0 = sld [smem:[#allocation40_spill]] }
  0x2b   : > { %s466_s29 = scalar_lea.vmem [#allocation4], %s3792_s8  ;;  %p4789_p9 = pnand %p6275_p8, %p4755_p3 }
  0x2c   : > { %s473_s7 = sshll.u32 %s466_s29, 4  ;;  %s4795_s17 = scalar_lea.sflag [#allocation5], %s462_s10  ;;  %s4793_s7 = int_to_ptr.vmem [resolvable:$true] %s473_s7 }
  0x2d   : > { %p4377_p11 = pneg %p4789_p9 }
  0x30   : > { %s4783_s14 = scalar_lea.hbm %s6348_s0, %s3881_s9  ;;  %s4380_s30 = scalar_lea.hbm %s6348_s0, 512 }
  0x31   : > { %s4375_s9 = scalar_lea.hbm %s4783_s14, 256  ;;  %p4381_p1 = scmp.lt.u32.totalorder %s4783_s14, %s6348_s0 }
  0x32   : > { %p4376_p10 = scmp.ne.s32.totalorder %s4783_s14, %s4375_s9  ;;  %p4382_p3 = scmp.lt.u32.totalorder %s4380_s30, %s4375_s9 }
  0x33   : > { %p4384_p6 = scmp.lt.u32.totalorder %s4375_s9, %s4783_s14 }
  0x34   : > { %p4378_p12 = pnand %p4377_p11, %p4376_p10  ;;  %p4383_p4 = por %p4382_p3, %p4381_p1 }
  0x36   : > { %p4379_p13 = pneg %p4378_p12  ;;  %p4385_p8 = por %p4384_p6, %p4383_p4 }
  0x38   : > { %p4386_p2 = pnand %p4385_p8, %p4379_p13 }
  0x3a   : > { %4389 = shalt.err (!%p4386_p2)
}
  0x3b   : > { %s4390_s10 = scalar_lea.vmem %s4793_s7, 256  ;;  %s4591_s8 = smov [#allocation4]  }
  0x3c   : > { %p4391_p10 = scmp.ne.s32.totalorder %s4793_s7, %s4390_s10  ;;  %s4395_s15 = sshll.u32 %s4591_s8, 4  ;;  %s4396_s15 = int_to_ptr.vmem [resolvable:$false] %s4395_s15 }
  0x3d   : > { %s4397_s21 = scalar_lea.vmem %s4396_s15, 512  ;;  %p4398_p5 = scmp.lt.s32.totalorder %s4793_s7, %s4396_s15 }
  0x3e   : > { %p4393_p12 = pnand %p4391_p10, %p4377_p11  ;;  %p4399_p1 = scmp.lt.s32.totalorder %s4397_s21, %s4390_s10 }
  0x40   : > { %p4394_p7 = pneg %p4393_p12  ;;  %p4400_p3 = por %p4399_p1, %p4398_p5 }
  0x42   : > { %p4401_p4 = pnand %p4400_p3, %p4394_p7 }
  0x44   : > { %4404 = shalt.err (!%p4401_p4)
}
  0x45   : > { %s4592_s9 = smov 128   ;;  %s4593_s30 = smov 8  }
  0x46   : > { %4152 = dma.hbm_to_vmem [thread:$0]  (!%p4789_p9), %s4783_s14, 256, %s4793_s7, %s4795_s17, %s4592_s9, %s4592_s9, %s4593_s30  }
  0x47   : > { %p3798_p2 = scmp.ge.s32.totalorder %s4589_s28, 1  ;;  %p559_p5 = scmp.lt.s32.totalorder %s4589_s28, 13 }
  0x48   : > { %s46_s10 = sadd.s32 1, %s4585_s27  ;;  %s183_s8 = sadd.s32 1, %s4557_s20 }
  0x49   : > { %p4825_p7 = pnand %p3798_p2, %p559_p5  ;;  %s6467_s10 = smov (!%p4741_p0, %s46_s10), %s4585_s27 }
  0x4a   : > { %p190_p8 = scmp.ne.s32.totalorder %s4557_s20, %s4553_s19  ;;  %p48_p11 = scmp.ge.s32.totalorder %s6467_s10, 6 }
  0x4b   : > { %p196_p13 = scmp.ne.s32.totalorder %s4553_s19, %s4549_s18  ;;  %p6351_p6 = scmp.eq.s32.totalorder %s4589_s28, 0 }
  0x4c   : > { %s516_s7 = sand.u32 1, %s4557_s20   ;;  %s6469_s10 = smov (%p48_p11, %s6467_s10), 0 }
  0x4d   : > { %p4840_p10 = por %p190_p8, %p6351_p6  ;;  %6353 = sst [smem:[#allocation24_spill]] %s6469_s10 }
  0x4e   : > { %p6354_p9 = scmp.ne.s32.totalorder %s6345_s13, 0  ;;  %s180_s14 = ssub.s32 %s4585_s27, %s6469_s10 }
  0x4f   : > { %s3795_s17 = sshll.u32 %s516_s7, 3  ;;  %p181_p0 = scmp.eq.s32.totalorder %s180_s14, 0 }
  0x50   : > { %p4849_p12 = por %p196_p13, %p6354_p9  ;;  %s3882_s15 = sshll.u32 %s4585_s27, 7 }
  0x51   : > { %s520_s18 = scalar_lea.vmem [#allocation7], %s3795_s17  ;;  %s6357_s5 = sld [smem:[#allocation44_spill]] }
  0x52   : > { %s6355_s16 = scalar_select %p4849_p12, 1, 0 }
  0x53   : > { %s527_s21 = sshll.u32 %s520_s18, 4  ;;  %p6358_p1 = scmp.lt.s32.totalorder %s4589_s28, 12  ;;  %s4864_s21 = int_to_ptr.vmem [resolvable:$true] %s527_s21 }
  0x54   : > { %s4857_s9 = scalar_select %p181_p0, %s4557_s20, %s183_s8  }
  0x55   : > { %p4870_p3 = pnand %p6358_p1, %p4840_p10  ;;  %s4874_s8 = scalar_lea.sflag [#allocation8], %s516_s7 }
  0x56   : > { %6356 = sst [smem:[#allocation25_spill]] %s4857_s9 }
  0x57   : > { %s4862_s26 = scalar_lea.hbm %s6357_s5, %s3882_s15  ;;  %p4407_p2 = pneg %p4870_p3 }
  0x58   : > { %s4405_s14 = scalar_lea.hbm %s4862_s26, 128  ;;  %s4410_s6 = scalar_lea.hbm %s6357_s5, 768 }
  0x59   : > { %p4406_p4 = scmp.ne.s32.totalorder %s4862_s26, %s4405_s14  ;;  %p4411_p11 = scmp.lt.u32.totalorder %s4862_s26, %s6357_s5 }
  0x5a   : > { %p4412_p13 = scmp.lt.u32.totalorder %s4410_s6, %s4405_s14  ;;  %p4414_p10 = scmp.lt.u32.totalorder %s4405_s14, %s4862_s26 }
  0x5b   : > { %p4408_p5 = pnand %p4407_p2, %p4406_p4 }
  0x5c   : > { %p4413_p6 = por %p4412_p13, %p4411_p11 }
  0x5d   : > { %p4409_p8 = pneg %p4408_p5 }
  0x5e   : > { %p4415_p9 = por %p4414_p10, %p4413_p6 }
  0x60   : > { %p4416_p0 = pnand %p4415_p9, %p4409_p8 }
  0x62   : > { %4419 = shalt.err (!%p4416_p0)
}
  0x63   : > { %s4420_s7 = scalar_lea.vmem %s4864_s21, 128  ;;  %s4594_s30 = smov [#allocation7]  }
  0x64   : > { %p4421_p1 = scmp.ne.s32.totalorder %s4864_s21, %s4420_s7  ;;  %s4425_s0 = sshll.u32 %s4594_s30, 4  ;;  %s4426_s0 = int_to_ptr.vmem [resolvable:$false] %s4425_s0 }
  0x65   : > { %s4427_s17 = scalar_lea.vmem %s4426_s0, 256  ;;  %p4428_p12 = scmp.lt.s32.totalorder %s4864_s21, %s4426_s0 }
  0x66   : > { %p4423_p4 = pnand %p4421_p1, %p4407_p2  ;;  %p4429_p11 = scmp.lt.s32.totalorder %s4427_s17, %s4420_s7 }
  0x68   : > { %p4424_p5 = pneg %p4423_p4  ;;  %p4430_p13 = por %p4429_p11, %p4428_p12 }
  0x6a   : > { %p4431_p6 = pnand %p4430_p13, %p4424_p5 }
  0x6c   : > { %4434 = shalt.err (!%p4431_p6)
}
  0x6d   : > { %s4595_s14 = smov 64   ;;  %s4596_s6 = smov 4  }
  0x6e   : > { %4155 = dma.hbm_to_vmem [thread:$0]  (!%p4870_p3), %s4862_s26, 128, %s4864_s21, %s4874_s8, %s4595_s14, %s4595_s14, %s4596_s6  }
  0x6f   : > { %563 = sbr.rel (%p4825_p7) target bundleno = 2293 (0x8f5), region = 76 }
  0x76   : > { %s565_s15 = sand.u32 1, %s4565_s22   ;;  %p6360_p12 = scmp.ne.s32.totalorder %s6346_s11, 0 }
  0x77   : > { %s4905_s18 = sshll.u32 %s565_s15, 4  ;;  %s566_s7 = scalar_lea.sflag [#allocation5], %s565_s15 }
  0x78   : > { %4532 = dma.done.wait (%p6360_p12), %s566_s7, 256  }
  0x79   : > { %4534 = vsyncadd (%p6360_p12), %s566_s7, 4294967040  ;;  %s574_s13 = sand.u32 1, %s4553_s19   ;;  %p6361_p7 = scmp.ne.s32.totalorder %s6355_s16, 0 }
  0x7a   : > { %s4913_s26 = sshll.u32 %s574_s13, 3  ;;  %s575_s29 = scalar_lea.sflag [#allocation8], %s574_s13 }
  0x7b   : > { %4536 = dma.done.wait (%p6361_p7), %s575_s29, 128  }
  0x7c   : > { %4538 = vsyncadd (%p6361_p7), %s575_s29, 4294967168  ;;  %s3801_s11 = sshll.u32 %s4573_s24, 1  ;;  %s3803_s8 = sshll.u32 %s4573_s24, 5 }
  0x7d   : > { %p658_p3 = scmp.lt.s32.totalorder %s3801_s11, 3  ;;  %p664_p2 = scmp.lt.s32.totalorder %s3803_s8, 63 }
  0x7e   : > { %p669_p8 = scmp.lt.s32.totalorder %s4577_s25, 5  ;;  %s4924_s0 = sshll.u32 %s4573_s24, 4 }
  0x7f   : > { %s6471_s11 = smov (!%p658_p3, %s3801_s11), 3  ;;  %s6473_s8 = smov (!%p664_p2, %s3803_s8), 63 }
  0x80   : > { %s3802_s17 = sshll.u32 %s6471_s11, 3  ;;  %s6362_s1 = sld [smem:[#allocation41_spill]] }
  0x81   : > { %s3804_s15 = sshll.u32 %s6473_s8, 2  ;;  %s6363_s2 = sld [smem:[#allocation42_spill]] }
  0x82   : > { %s4939_s21 = scalar_select %p669_p8, %s4577_s25, 5 }
  0x83   : > { %s6364_s3 = sld [smem:[#allocation43_spill]]  ;;  %s6366_s12 = sld [smem:[#allocation46_spill]] }
  0x84   : > { %s3883_s11 = sshll.u32 %s4939_s21, 7  ;;  %s3807_s30 = sshll.u32 %s4939_s21, 1 }
  0x85   : > { %s6367_s20 = sld [smem:[#allocation47_spill]]  ;;  %p3809_p10 = scmp.ne.s32.totalorder %s4577_s25, 0 }
  0x86   : > { %s4929_s16 = scalar_lea.vmem %s6362_s1, %s3802_s17  ;;  %s6368_s17 = sld [smem:[#allocation48_spill]] }
  0x87   : > { %s4934_s29 = scalar_lea.vmem %s6363_s2, %s3804_s15  ;;  %s4951_s15 = scalar_lea.vmem %s6258_s4, %s3807_s30 }
  0x88   : > { %s6365_s2 = sld [smem:[#allocation45_spill]]  ;;  %696 = sbr.rel (%p3809_p10) target bundleno = 144 (0x90), region = 88 }
  0x89   : > { %s4946_s8 = scalar_lea.vmem %s6364_s3, %s3883_s11  ;;  %s683_s23 = scalar_lea.vmem %s6366_s12, %s4939_s21 }
  0x8a   : > { %s6369_s30 = scalar_lea.vmem (!%p3809_p10), [#allocation4], %s4905_s18 }
  0x8b   : > { %s686_s19 = scalar_lea.vmem %s6367_s20, %s4939_s21  ;;  %v697_v0 = vld [vmem:[%s6369_s30] sm:$0xff] (!%p3809_p10)  ;;  %s6370_s1 = smov (!%p3809_p10), %s6369_s30 }
  0x8c   : > { %s689_s3 = scalar_lea.vmem %s6368_s17, %s4939_s21  ;;  %v698_v1 = vld [vmem:[%s6370_s1 + $0x8] sm:$0xff] (!%p3809_p10) }
  0x8e   : > { %s680_s5 = scalar_lea.vmem %s6365_s2, %s4939_s21  ;;  %s699_s2 = scalar_lea.vmem (!%p3809_p10), [#allocation2], %s4924_s0 }
  0x8f   : > { %700 = vst [vmem:[%s699_s2] sm:$0xff] %v697_v0  ;;  %701 = vst [vmem:[%s699_s2 + $0x8] sm:$0xff] %v698_v1 }
  0x90 PF: > { %v4264_v2 = vld [vmem:[%s4946_s8 + $0x4] ss:$8 sps:$4 sm:$0xff]   ;;  %s6371_s12 = scalar_lea.vmem [#allocation7], %s4913_s26  ;;  %vm979_vm0 = vcmask 130048   ;;  %v4597_v4 = vmov 0   ;;  %v4268_v6 = vld [vmem:[%s4934_s29 + $0x10] sm:$0xff]   ;;  %v6288_v19 = vlaneseq }
  0x91   : > { %v4978_v3 = vld [vmem:[%s6371_s12] sm:$0xff]   ;;  %850 = vmatprep.mubr.bf16.mxu0 %v4597_v4  ;;  %4262 = vset.pattern.permute.xlu0 %v4597_v4  ;;  %v4269_v7 = vld [vmem:[%s4946_s8 + $0x14] ss:$8 sps:$4 sm:$0xff]   ;;  %v4272_v9 = vld [vmem:[%s4946_s8 + $0x10] ss:$8 sps:$4 sm:$0xff]   ;;  %s723_s20 = scalar_lea.vmem [#allocation2], %s4924_s0 }
  0x92   : > { %818 = vmatprep.subr.bf16.mxu0 %v4264_v2  ;;  %v4267_v5 = vld [vmem:[%s4946_s8] ss:$8 sps:$4 sm:$0xff]   ;;  %4263 = vset.pattern.permute.xlu1 %v4597_v4  ;;  %v4271_v8 = vld [vmem:[%s4934_s29 + $0x18] sm:$0xff]   ;;  %v4273_v10 = vld [vmem:[%s4946_s8 + $0x24] ss:$8 sps:$4 sm:$0xff]   ;;  %v5006_v24 = vshrl.u32 %v6288_v19, 7 }
  0x93   : > { %4135 = vmatprep.subr.bf16.mxu1 %v4978_v3  ;;  %819 = vmatpush1.bf16.msra.mxu0 %v4267_v5  ;;  %v4276_v11 = vld [vmem:[%s4934_s29 + $0x20] sm:$0xff]   ;;  %v4277_v13 = vld [vmem:[%s4946_s8 + $0x34] ss:$8 sps:$4 sm:$0xff]   ;;  %v4279_v14 = vld [vmem:[%s4934_s29 + $0x28] sm:$0xff]   ;;  %p3176_p9 = scmp.eq.s32.totalorder %s4573_s24, 1  ;;  %s3173_s26 = scalar_lea.vmem [#allocation3], %s4924_s0 }
  0x94   : > { %4136 = vmatpush3.bf16.msra.mxu1 %v4978_v3  ;;  %3952 = vmatprep.mubr.msk.bf16.mxu1 %vm979_vm0, %v4268_v6  ;;  %v4275_v12 = vld [vmem:[%s4946_s8 + $0x20] ss:$8 sps:$4 sm:$0xff]   ;;  %v4280_v15 = vld [vmem:[%s4946_s8 + $0x30] ss:$8 sps:$4 sm:$0xff]   ;;  %v4281_v17 = vld [vmem:[%s4946_s8 + $0x44] ss:$8 sps:$4 sm:$0xff]  }
  0x95   : > { %820 = vmatprep.subr.bf16.mxu0 %v4269_v7  ;;  %v4284_v16 = vld [vmem:[%s4934_s29 + $0x30] sm:$0xff]   ;;  %v4283_v18 = vld [vmem:[%s4946_s8 + $0x40] ss:$8 sps:$4 sm:$0xff]   ;;  %v4287_v21 = vld [vmem:[%s4934_s29 + $0x38] sm:$0xff]   ;;  %v5015_v29 = vsub.s32 0, %v5006_v24  ;;  %v5020_v32 = vsub.s32 1, %v5006_v24  ;;  %p3178_p0 = pnand %p3176_p9, %p669_p8 }
  0x96   : > { %v4285_v20 = vld [vmem:[%s4946_s8 + $0x54] ss:$8 sps:$4 sm:$0xff]   ;;  %v4288_v22 = vld [vmem:[%s4946_s8 + $0x50] ss:$8 sps:$4 sm:$0xff]   ;;  %v4292_v23 = vld [vmem:[%s4934_s29 + $0x40] sm:$0xff]   ;;  %v5048_v46 = vsub.s32 2, %v5006_v24 }
  0x97   : > { %3953 = vmatmul.mubr.msk.bf16.vlgmr.msra.gmra.mrb[0].mxu1 %vm979_vm0, %v4271_v8  ;;  %821 = vmatpush1.bf16.msra.mxu0 %v4272_v9  ;;  %v4289_v25 = vld [vmem:[%s4946_s8 + $0x64] ss:$8 sps:$4 sm:$0xff]   ;;  %v4291_v26 = vld [vmem:[%s4946_s8 + $0x60] ss:$8 sps:$4 sm:$0xff]   ;;  %v4293_v27 = vld [vmem:[%s4946_s8 + $0x74] ss:$8 sps:$4 sm:$0xff]  }
  0x98   : > { %822 = vmatprep.subr.bf16.mxu0 %v4273_v10  ;;  %3956 = vmatprep.mubr.msk.bf16.mxu1 %vm979_vm0, %v4276_v11  ;;  %v4295_v28 = vld [vmem:[%s4934_s29 + $0x48] sm:$0xff]   ;;  %v4296_v30 = vld [vmem:[%s4946_s8 + $0x70] ss:$8 sps:$4 sm:$0xff]   ;;  %v724_v31 = vld [vmem:[%s723_s20] sm:$0xff]  ;;  %v5060_v51 = vsub.s32 3, %v5006_v24  ;;  %v5070_v55 = vsub.s32 4, %v5006_v24 }
  0x99   : > { %v725_v33 = vld [vmem:[%s723_s20 + $0x8] sm:$0xff]  ;;  %v4297_v34 = vld [vmem:[%s4934_s29 + $0x50] sm:$0xff]   ;;  %v5024_v35 = vld [vmem:[%s4929_s16] sm:$0xff]  ;;  %v5077_v58 = vsub.s32 5, %v5006_v24  ;;  %v5084_v61 = vsub.s32 6, %v5006_v24  ;;  %v5091_v0 = vsub.s32 7, %v5006_v24 }
  0x9a   : > { %v1672_v36 = vrot.slane %v5024_v35, %v5015_v29  ;;  %v726_v37 = vpack.c.bf16 %v725_v33, %v724_v31  ;;  %v1683_v38 = vrot.slane %v5024_v35, %v5020_v32  ;;  %v4300_v39 = vld [vmem:[%s4934_s29] sm:$0xff]   ;;  %v5034_v40 = vld [vmem:[%s4929_s16 + $0x8] sm:$0xff]  ;;  %v4298_v41 = vld [vmem:[%s4934_s29 + $0x58] sm:$0xff]   ;;  %v1694_v48 = vrot.slane %v5024_v35, %v5048_v46 }
  0x9b   : > { %823 = vmatpush1.bf16.msra.mxu0 %v4275_v12  ;;  %v1760_v42 = vrot.slane %v5034_v40, %v5015_v29  ;;  %v4299_v43 = vld [vmem:[%s4934_s29 + $0x60] sm:$0xff]   ;;  %v4302_v44 = vld [vmem:[%s4934_s29 + $0x8] sm:$0xff]   ;;  %v1771_v45 = vrot.slane %v5034_v40, %v5020_v32  ;;  %v4303_v49 = vld [vmem:[%s4934_s29 + $0x70] sm:$0xff]   ;;  %v1782_v50 = vrot.slane %v5034_v40, %v5048_v46  ;;  %v1705_v53 = vrot.slane %v5024_v35, %v5060_v51 }
  0x9c   : > { %824 = vmatprep.subr.bf16.mxu0 %v4277_v13  ;;  %1678 = vbcast.lane.b32.xlu1 %v1672_v36, 264  ;;  %v4301_v47 = vld [vmem:[%s4934_s29 + $0x68] sm:$0xff]   ;;  %v4304_v52 = vld [vmem:[%s4934_s29 + $0x78] sm:$0xff]   ;;  %v1793_v54 = vrot.slane %v5034_v40, %v5060_v51  ;;  %v1716_v56 = vrot.slane %v5024_v35, %v5070_v55  ;;  %v1804_v57 = vrot.slane %v5034_v40, %v5070_v55 }
  0x9d   : > { %1674 = vbcast.lane.b32.xlu0 %v1672_v36, 256  ;;  %6372 = vst [vmem:[#allocation26_spill] sm:$0xff] %v5077_v58  ;;  %v1727_v59 = vrot.slane %v5024_v35, %v5077_v58  ;;  %v1815_v60 = vrot.slane %v5034_v40, %v5077_v58  ;;  %6373 = vst [vmem:[#allocation27_spill] sm:$0xff] %v5084_v61  ;;  %v1738_v62 = vrot.slane %v5024_v35, %v5084_v61 }
  0x9e   : > { %v1826_v63 = vrot.slane %v5034_v40, %v5084_v61  ;;  %6374 = vst [vmem:[#allocation28_spill] sm:$0xff] %v5091_v0  ;;  %v1749_v1 = vrot.slane %v5024_v35, %v5091_v0  ;;  %v1837_v2 = vrot.slane %v5034_v40, %v5091_v0 }
  0x9f   : > { %3957 = vmatmul.mubr.msk.bf16.gmra.mrb[4].mxu1 %vm979_vm0, %v4279_v14  ;;  %825 = vmatpush1.bf16.msra.mxu0 %v4280_v15 }
  0xa0   : > { %3960 = vmatprep.mubr.msk.bf16.mxu1 %vm979_vm0, %v4284_v16  ;;  %826 = vmatprep.subr.bf16.mxu0 %v4281_v17 }
  0xa1   : > { %1685 = vbcast.lane.b32.xlu1 %v1683_v38, 256  ;;  %1762 = vbcast.lane.b32.xlu0 %v1760_v42, 256 }
  0xa3   : > { %827 = vmatpush1.bf16.msra.mxu0 %v4283_v18 }
  0xa4   : > { %828 = vmatprep.subr.bf16.mxu0 %v4285_v20 }
  0xa5   : > { %1689 = vbcast.lane.b32.xlu1 %v1683_v38, 264  ;;  %1773 = vbcast.lane.b32.xlu0 %v1771_v45, 256 }
  0xa7   : > { %3961 = vmatmul.mubr.msk.bf16.gmra.mrb[8].mxu1 %vm979_vm0, %v4287_v21  ;;  %829 = vmatpush1.bf16.msra.mxu0 %v4288_v22 }
  0xa8   : > { %3964 = vmatprep.mubr.msk.bf16.mxu1 %vm979_vm0, %v4292_v23  ;;  %830 = vmatprep.subr.bf16.mxu0 %v4289_v25  ;;  %v718_v23 = vld [vmem:[%s4951_s15] sm:$0x3]  ;;  %v4599_v25 = vmov 1966171168  }
  0xa9   : > { %1766 = vbcast.lane.b32.xlu1 %v1760_v42, 264  ;;  %1696 = vbcast.lane.b32.xlu0 %v1694_v48, 256  ;;  %v731_v31 = vrot.slane %v718_v23, %v5015_v29  ;;  %v735_v36 = vrot.slane %v718_v23, %v5020_v32 }
  0xab   : > { %831 = vmatpush1.bf16.msra.mxu0 %v4291_v26  ;;  %v1210_v26 = vunpack.c.l.s4 %v4599_v25 }
  0xac   : > { %832 = vmatprep.subr.bf16.mxu0 %v4293_v27 }
  0xad   : > { %1777 = vbcast.lane.b32.xlu1 %v1771_v45, 264  ;;  %1784 = vbcast.lane.b32.xlu0 %v1782_v50, 256 }
  0xaf   : > { %3965 = vmatmul.mubr.msk.bf16.gmra.mrb[12].mxu1 %vm979_vm0, %v4295_v28  ;;  %833 = vmatpush1.bf16.msra.mxu0 %v4296_v30 }
  0xb0   : > { %3968 = vmatprep.mubr.msk.bf16.mxu1 %vm979_vm0, %v4297_v34  ;;  %3946 = vmatprep.subr.bf16.mxu0 %v4978_v3 }
  0xb1   : > { %1700 = vbcast.lane.b32.xlu1 %v1694_v48, 264  ;;  %1707 = vbcast.lane.b32.xlu0 %v1705_v53, 256 }
  0xb2   : > { %851 = vmatmul.mubr.bf16.vlgmr.msra.gmra.mrb[0].mxu0 %v726_v37  ;;  %v1211_v37 = vunpack.c.0.s8 %v1210_v26 }
  0xb3   : > { %3947 = vmatpush3.bf16.msra.mxu0 %v4978_v3  ;;  %3948 = vmatprep.mubr.msk.bf16.mxu0 %vm979_vm0, %v4300_v39  ;;  %v6287_v3 = vmov 0.0  }
  0xb4   : > { %3980 = vmatprep.subr.bf16.mxu0 %v6287_v3 }
  0xb5   : > { %1788 = vbcast.lane.b32.xlu1 %v1782_v50, 264  ;;  %1795 = vbcast.lane.b32.xlu0 %v1793_v54, 256 }
  0xb7   : > { %3969 = vmatmul.mubr.msk.bf16.gmra.mrb[16].mxu1 %vm979_vm0, %v4298_v41 }
  0xb8   : > { %3972 = vmatprep.mubr.msk.bf16.mxu1 %vm979_vm0, %v4299_v43 }
  0xb9   : > { %1711 = vbcast.lane.b32.xlu1 %v1705_v53, 264  ;;  %1718 = vbcast.lane.b32.xlu0 %v1716_v56, 256 }
  0xba   : > { %3949 = vmatmul.mubr.msk.bf16.vlgmr.msra.gmra.mrb[4].mxu0 %vm979_vm0, %v4302_v44 }
  0xbd   : > { %1799 = vbcast.lane.b32.xlu1 %v1793_v54, 264  ;;  %1806 = vbcast.lane.b32.xlu0 %v1804_v57, 256 }
  0xbf   : > { %3973 = vmatmul.mubr.msk.bf16.gmra.mrb[20].mxu1 %vm979_vm0, %v4301_v47  ;;  %v1214_v47 = vsub.s32 %v1211_v37, %v5006_v24 }
  0xc0   : > { %3976 = vmatprep.mubr.msk.bf16.mxu1 %vm979_vm0, %v4303_v49 }
  0xc1   : > { %1722 = vbcast.lane.b32.xlu1 %v1716_v56, 264  ;;  %1729 = vbcast.lane.b32.xlu0 %v1727_v59, 256 }
  0xc5   : > { %1810 = vbcast.lane.b32.xlu1 %v1804_v57, 264  ;;  %1817 = vbcast.lane.b32.xlu0 %v1815_v60, 256 }
  0xc7   : > { %3977 = vmatmul.mubr.msk.bf16.gmra.mrb[24].mxu1 %vm979_vm0, %v4304_v52 }
  0xc9   : > { %1733 = vbcast.lane.b32.xlu1 %v1727_v59, 264  ;;  %1740 = vbcast.lane.b32.xlu0 %v1738_v62, 256 }
  0xcd   : > { %1821 = vbcast.lane.b32.xlu1 %v1815_v60, 264  ;;  %1828 = vbcast.lane.b32.xlu0 %v1826_v63, 256 }
  0xd1   : > { %1744 = vbcast.lane.b32.xlu1 %v1738_v62, 264  ;;  %1751 = vbcast.lane.b32.xlu0 %v1749_v1, 256 }
  0xd5   : > { %1832 = vbcast.lane.b32.xlu1 %v1826_v63, 264  ;;  %1839 = vbcast.lane.b32.xlu0 %v1837_v2, 256 }
  0xd9   : > { %1755 = vbcast.lane.b32.xlu1 %v1749_v1, 264 }
  0xdd   : > { %1843 = vbcast.lane.b32.xlu1 %v1837_v2, 264 }
 0x16a   : > { %v5098_v4 = vpop.f32.mrb[0].mxu1 }
 0x16b   : > { %v5100_v5 = vpop.f32.mrb[1].mxu1 }
 0x16c   : > { %v5102_v6 = vpop.f32.mrb[2].mxu1 }
 0x16d   : > { %v5106_v8 = vpop.f32.mrb[3].mxu1 }
 0x172   : > { %v5110_v10 = vpop.f32.mrb[4].mxu1 }
 0x173   : > { %v5112_v11 = vpop.f32.mrb[5].mxu1 }
 0x174   : > { %v5114_v12 = vpop.f32.mrb[6].mxu1 }
 0x175   : > { %v5118_v14 = vpop.f32.mrb[7].mxu1 }
 0x17a   : > { %v5122_v16 = vpop.f32.mrb[8].mxu1 }
 0x17b   : > { %v5124_v17 = vpop.f32.mrb[9].mxu1 }
 0x17c   : > { %v5126_v18 = vpop.f32.mrb[10].mxu1 }
 0x17d   : > { %v5130_v21 = vpop.f32.mrb[11].mxu1 }
 0x182   : > { %v5135_v27 = vpop.f32.mrb[12].mxu1 }
 0x183   : > { %v5137_v28 = vpop.f32.mrb[13].mxu1 }
 0x184   : > { %v5139_v30 = vpop.f32.mrb[14].mxu1 }
 0x185   : > { %v5144_v34 = vpop.f32.mrb[15].mxu1  ;;  %v852_v35 = vpop.f32.mrb[0].mxu0 }
 0x186   : > { %v854_v39 = vpop.f32.mrb[1].mxu0  ;;  %v853_v41 = vadd.f32 %v852_v35, %v731_v31  ;;  %v721_v35 = vld [vmem:[%s680_s5] sm:$0x1] }
 0x187   : > { %v856_v40 = vpop.f32.mrb[2].mxu0  ;;  %v855_v44 = vadd.f32 %v854_v39, %v735_v36 }
 0x188   : > { %v857_v42 = vadd.f32 %v856_v40, %v731_v31  ;;  %v858_v43 = vpop.f32.mrb[3].mxu0 }
 0x189   : > { %v859_v45 = vadd.f32 %v858_v43, %v735_v36 }
 0x18a   : > { %v5150_v48 = vpop.f32.mrb[16].mxu1  ;;  %v5152_v49 = vpack.c.bf16 %v857_v42, %v853_v41 }
 0x18b   : > { %v5154_v50 = vpop.f32.mrb[17].mxu1  ;;  %v1206_v52 = vpack.c.bf16 %v859_v45, %v855_v44  ;;  %v3859_v53 = vpack.c.bf16 %v859_v45, %v859_v45 }
 0x18c   : > { %v5156_v54 = vpop.f32.mrb[18].mxu1  ;;  %3981 = vmatpush3.bf16.msra.mxu0 %v5152_v49 }
 0x18d   : > { %v5161_v57 = vpop.f32.mrb[19].mxu1  ;;  %v1215_v59 = vrot.slane %v1206_v52, %v1214_v47  ;;  %v1222_v60 = vrot.slane %v3859_v53, %v1214_v47  ;;  %v5163_v62 = vpop.f32.mrb[4].mxu0  ;;  %v1545_v52 = vpack.c.bf16 %v721_v35, %v721_v35 }
 0x18e   : > { %v5167_v1 = vpop.f32.mrb[5].mxu0 }
 0x18f   : > { %v1223_v2 = vcombine.high %v1215_v59, %v1215_v59  ;;  %v1224_v23 = vcombine.high %v1222_v60, %v1222_v60  ;;  %v5169_v25 = vrot.slane %v1215_v59, %v1214_v47  ;;  %v1238_v26 = vrot.slane %v1222_v60, %v1214_v47  ;;  %v5171_v31 = vpop.f32.mrb[6].mxu0 }
 0x190   : > { %v5180_v37 = vpop.f32.mrb[7].mxu0  ;;  %v1547_v56 = vpack.i.b16 %v1545_v52, %v1545_v52 }
 0x191   : > { %v5182_v39 = vrot.slane %v1223_v2, %v1214_v47  ;;  %v5186_v40 = vcombine.high %v5169_v25, %v5169_v25  ;;  %v1266_v42 = vunpack.i.h.s16 %v1238_v26  ;;  %v3864_v43 = vpack.i.b16 %v1238_v26, %v1238_v26 }
 0x192   : > { %v5188_v41 = vpop.f32.mrb[20].mxu1  ;;  %v1252_v53 = vrot.slane %v1224_v23, %v1214_v47  ;;  %v1258_v60 = vunpack.i.h.s16 %v5169_v25 }
 0x193   : > { %v5192_v45 = vpop.f32.mrb[21].mxu1  ;;  %v1255_v59 = vcombine.high %v5182_v39, %v5182_v39  ;;  %v3862_v3 = vpack.i.b16 %v5186_v40, %v5186_v40  ;;  %v1282_v19 = vpack.i.b16 %v1266_v42, %v1266_v42  ;;  %v1324_v13 = vrot.slane %v3864_v43, %v5015_v29 }
 0x194   : > { %v5197_v2 = vpop.f32.mrb[22].mxu1  ;;  %v1268_v20 = vunpack.i.h.s16 %v1252_v53  ;;  %v1274_v22 = vpack.i.b16 %v1258_v60, %v1258_v60  ;;  %v3865_v43 = vpack.i.b16 %v1252_v53, %v1252_v53 }
 0x195   : > { %v5202_v7 = vpop.f32.mrb[23].mxu1  ;;  %v1264_v9 = vunpack.i.h.s16 %v1255_v59  ;;  %v3863_v44 = vpack.i.b16 %v1255_v59, %v1255_v59  ;;  %v1308_v35 = vrot.slane %v3862_v3, %v5015_v29  ;;  %v1328_v47 = vrot.slane %v1282_v19, %v5015_v29 }
 0x196   : > { %v1410_v23 = vpack.i.b16 %v1324_v13, %v1324_v13  ;;  %v1284_v59 = vpack.i.b16 %v1268_v20, %v1268_v20  ;;  %v1296_v3 = vrot.slane %v1274_v22, %v5015_v29 }
 0x197   : > { %v1280_v63 = vpack.i.b16 %v1264_v9, %v1264_v9  ;;  %v1316_v36 = vrot.slane %v3863_v44, %v5015_v29  ;;  %v1382_v33 = vpack.i.b16 %v1308_v35, %v1308_v35  ;;  %v1417_v15 = vpack.i.b16 %v1328_v47, %v1328_v47 }
 0x198   : > { %v1415_v42 = vrot.slane %v1410_v23, %v5015_v29  ;;  %v1332_v44 = vrot.slane %v3865_v43, %v5015_v29  ;;  %v1361_v20 = vpack.i.b16 %v1296_v3, %v1296_v3  ;;  %v1254_v3 = vcombine.high %v1238_v26, %v1238_v26 }
 0x199   : > { %v1320_v38 = vrot.slane %v1280_v63, %v5015_v29  ;;  %v1396_v0 = vpack.i.b16 %v1316_v36, %v1316_v36  ;;  %v1387_v19 = vrot.slane %v1382_v33, %v5015_v29  ;;  %v1422_v9 = vrot.slane %v1417_v15, %v5015_v29 }
 0x19a   : > { %v5210_v61 = vpop.f32.mrb[24].mxu1  ;;  %v1473_v13 = vadd.bf16 %v1415_v42, %v5152_v49  ;;  %v1336_v63 = vrot.slane %v1284_v59, %v5015_v29  ;;  %v6376_v15 = vpack.c.bf16 %v5144_v34, %v5137_v28  ;;  %v1424_v23 = vpack.i.b16 %v1332_v44, %v1332_v44 }
 0x19b   : > { %v5216_v52 = vpop.f32.mrb[25].mxu1  ;;  %v1403_v60 = vpack.i.b16 %v1320_v38, %v1320_v38  ;;  %v1401_v35 = vrot.slane %v1396_v0, %v5015_v29  ;;  %v1469_v22 = vadd.bf16 %v1387_v19, %v5152_v49  ;;  %v1474_v33 = vadd.bf16 %v1422_v9, %v5152_v49 }
 0x19c   : > { %v5220_v36 = vpop.f32.mrb[26].mxu1  ;;  %v1489_v47 = vadd.bf16 %v1473_v13, %v6376_v15  ;;  %v1431_v43 = vpack.i.b16 %v1336_v63, %v1336_v63  ;;  %v1366_v59 = vrot.slane %v1361_v20, %v5015_v29  ;;  %v6377_v19 = vpack.c.bf16 %v5118_v14, %v5112_v11 }
 0x19d   : > { %v5227_v42 = vpop.f32.mrb[27].mxu1  ;;  %v1408_v38 = vrot.slane %v1403_v60, %v5015_v29  ;;  %v1471_v0 = vadd.bf16 %v1401_v35, %v5152_v49  ;;  %v6378_v28 = vpack.c.bf16 %v5139_v30, %v5135_v27  ;;  %v1429_v9 = vrot.slane %v1424_v23, %v5015_v29 }
 0x19e   : > { %v5235_v58 = vadd.bf16 %v1469_v22, %v6377_v19  ;;  %v6379_v44 = vpack.c.bf16 %v5130_v21, %v5124_v17  ;;  %v1436_v26 = vrot.slane %v1431_v43, %v5015_v29  ;;  %v1466_v11 = vadd.bf16 %v1366_v59, %v5152_v49 }
 0x19f   : > { %v5240_v34 = vadd.bf16 %v1474_v33, %v6378_v28  ;;  %v1472_v13 = vadd.bf16 %v1408_v38, %v5152_v49  ;;  %v1475_v14 = vadd.bf16 %v1429_v9, %v5152_v49  ;;  %v3860_v27 = vpack.i.b16 %v5169_v25, %v5169_v25 }
 0x1a0   : > { %v5247_v60 = vadd.bf16 %v1471_v0, %v6379_v44  ;;  %v5255_v30 = vrot.slane %v1547_v56, %v5015_v29  ;;  %v1256_v35 = vcombine.high %v1252_v53, %v1252_v53  ;;  %v6380_v63 = vpack.c.bf16 %v5126_v18, %v5122_v16 }
 0x1a1   : > { %v1476_v17 = vadd.bf16 %v1436_v26, %v5152_v49  ;;  %v6381_v21 = vpack.c.bf16 %v5171_v31, %v5163_v62  ;;  %v6382_v33 = vpack.c.bf16 %v5161_v57, %v5154_v50  ;;  %v1292_v56 = vrot.slane %v3860_v27, %v5015_v29 }
 0x1a2   : > { %v5260_v20 = vadd.bf16 %v1472_v13, %v6380_v63  ;;  %v1202_v25 = vpack.c.bf16 %v5197_v2, %v5188_v41  ;;  %v1270_v53 = vunpack.i.h.s16 %v1254_v3  ;;  %v1260_v16 = vunpack.i.h.s16 %v5182_v39 }
 0x1a3   : > { %v1482_v22 = vadd.bf16 %v1466_v11, %v6381_v21  ;;  %v5269_v15 = vadd.bf16 %v1475_v14, %v6382_v33  ;;  %v3861_v18 = vpack.i.b16 %v5182_v39, %v5182_v39  ;;  %v6383_v62 = vpack.c.bf16 %v5156_v54, %v5150_v48 }
 0x1a4   : > { %v1201_v50 = vpack.c.bf16 %v5202_v7, %v5192_v45  ;;  %v1521_v57 = vmul.bf16 1045249613, %v1489_v47  ;;  %v1354_v23 = vpack.i.b16 %v1292_v56, %v1292_v56  ;;  %v1286_v38 = vpack.i.b16 %v1270_v53, %v1270_v53 }
 0x1a5   : > { %v5280_v31 = vadd.bf16 %v1476_v17, %v6383_v62  ;;  %v3866_v0 = vpack.i.b16 %v1254_v3, %v1254_v3  ;;  %v1514_v43 = vmul.bf16 1045249613, %v1482_v22  ;;  %v1204_v41 = vpack.c.bf16 %v5220_v36, %v5210_v61 }
 0x1a6   : > { %v1272_v2 = vunpack.i.h.s16 %v1256_v35  ;;  %v1203_v39 = vpack.c.bf16 %v5227_v42, %v5216_v52  ;;  %v1359_v59 = vrot.slane %v1354_v23, %v5015_v29  ;;  %v1344_v48 = vrot.slane %v1286_v38, %v5015_v29 }
 0x1a7   : > { %v1340_v54 = vrot.slane %v3866_v0, %v5015_v29  ;;  %v3867_v19 = vpack.i.b16 %v1256_v35, %v1256_v35  ;;  %v1262_v7 = vunpack.i.h.s16 %v5186_v40  ;;  %vm1505_vm1 = vcmp.gt.bf16.partialorder %v1489_v47, 0 }
 0x1a8   : > { %v1288_v45 = vpack.i.b16 %v1272_v2, %v1272_v2  ;;  %vm1498_vm2 = vcmp.gt.bf16.partialorder %v1482_v22, 0  ;;  %v1465_v3 = vadd.bf16 %v1359_v59, %v5152_v49  ;;  %v1445_v28 = vpack.i.b16 %v1344_v48, %v1344_v48 }
 0x1a9   : > { %v1438_v61 = vpack.i.b16 %v1340_v54, %v1340_v54  ;;  %v1348_v36 = vrot.slane %v3867_v19, %v5015_v29  ;;  %v1300_v52 = vrot.slane %v3861_v18, %v5015_v29  ;;  %v1537_v9 = vsel %vm1505_vm1, %v1489_v47, %v1521_v57 }
 0x1aa   : > { %v1352_v42 = vrot.slane %v1288_v45, %v5015_v29  ;;  %v1530_v13 = vsel %vm1498_vm2, %v1482_v22, %v1514_v43  ;;  %v6384_v44 = vpack.c.bf16 %v5180_v37, %v5167_v1  ;;  %v1450_v40 = vrot.slane %v1445_v28, %v5015_v29 }
 0x1ab   : > { %v1443_v11 = vrot.slane %v1438_v61, %v5015_v29  ;;  %v1452_v14 = vpack.i.b16 %v1348_v36, %v1348_v36  ;;  %v1522_v27 = vmul.bf16 1045249613, %v5240_v34  ;;  %v1561_v63 = vmul.bf16 %v5255_v30, %v1537_v9 }
 0x1ac   : > { %v1481_v26 = vadd.bf16 %v1465_v3, %v6384_v44  ;;  %v1459_v35 = vpack.i.b16 %v1352_v42, %v1352_v42  ;;  %vm1506_vm3 = vcmp.gt.bf16.partialorder %v5240_v34, 0  ;;  %v1478_v47 = vadd.bf16 %v1450_v40, %v5152_v49 }
 0x1ad   : > { %v1477_v21 = vadd.bf16 %v1443_v11, %v5152_v49  ;;  %v1457_v1 = vrot.slane %v1452_v14, %v5015_v29  ;;  %v1586_v22 = vunpack.c.h.bf16 %v1561_v63  ;;  %v1554_v33 = vmul.bf16 %v5255_v30, %v1530_v13 }
 0x1ae   : > { %v1513_v17 = vmul.bf16 1045249613, %v1481_v26  ;;  %v1464_v37 = vrot.slane %v1459_v35, %v5015_v29  ;;  %vm1497_vm4 = vcmp.gt.bf16.partialorder %v1481_v26, 0  ;;  %v5309_v56 = vadd.bf16 %v1478_v47, %v1202_v25 }
 0x1af   : > { %v1493_v53 = vadd.bf16 %v1477_v21, %v1201_v50  ;;  %v1479_v18 = vadd.bf16 %v1457_v1, %v5152_v49  ;;  %1635 = vadd.xlane.f32.xlu1 %v1586_v22  ;;  %v1276_v38 = vpack.i.b16 %v1260_v16, %v1260_v16  ;;  %v1278_v0 = vpack.i.b16 %v1262_v7, %v1262_v7 }
 0x1b0   : > { %v1529_v62 = vsel %vm1497_vm4, %v1481_v26, %v1513_v17  ;;  %v1480_v57 = vadd.bf16 %v1464_v37, %v5152_v49  ;;  %v1571_v48 = vunpack.c.l.bf16 %v1554_v33  ;;  %v1538_v25 = vsel %vm1506_vm3, %v5240_v34, %v1522_v27 }
 0x1b1   : > { %v1553_v23 = vmul.bf16 %v5255_v30, %v1529_v62  ;;  %v5314_v43 = vadd.bf16 %v1479_v18, %v1203_v39  ;;  %v1368_v50 = vpack.i.b16 %v1300_v52, %v1300_v52  ;;  %v1562_v54 = vmul.bf16 %v5255_v30, %v1538_v25 }
 0x1b2   : > { %v5316_v2 = vadd.bf16 %v1480_v57, %v1204_v41  ;;  %v1572_v16 = vunpack.c.h.bf16 %v1554_v33  ;;  %v1304_v39 = vrot.slane %v1276_v38, %v5015_v29  ;;  %v1312_v41 = vrot.slane %v1278_v0, %v5015_v29 }
 0x1b3   : > { %v1569_v59 = vunpack.c.l.bf16 %v1553_v23  ;;  %1605 = vadd.xlane.f32.xlu1 %v1571_v48  ;;  %v1373_v19 = vrot.slane %v1368_v50, %v5015_v29  ;;  %v1570_v45 = vunpack.c.h.bf16 %v1553_v23  ;;  %v1523_v34 = vmul.bf16 1045249613, %v5269_v15 }
 0x1b4   : > { %v1375_v3 = vpack.i.b16 %v1304_v39, %v1304_v39  ;;  %v6385_v28 = vpack.c.bf16 %v5106_v8, %v5100_v5  ;;  %v1389_v36 = vpack.i.b16 %v1312_v41, %v1312_v41  ;;  %v1585_v52 = vunpack.c.l.bf16 %v1561_v63 }
 0x1b5   : > { %1601 = vadd.xlane.f32.xlu0 %v1569_v59  ;;  %v1467_v7 = vadd.bf16 %v1373_v19, %v5152_v49  ;;  %v1588_v42 = vunpack.c.h.bf16 %v1562_v54  ;;  %vm1507_vm5 = vcmp.gt.bf16.partialorder %v5269_v15, 0  ;;  %v1517_v40 = vmul.bf16 1045249613, %v5235_v58 }
 0x1b6   : > { %v1380_v9 = vrot.slane %v1375_v3, %v5015_v29  ;;  %v1394_v44 = vrot.slane %v1389_v36, %v5015_v29  ;;  %v1539_v5 = vsel %vm1507_vm5, %v5269_v15, %v1523_v34  ;;  %v1587_v14 = vunpack.c.l.bf16 %v1562_v54 }
 0x1b7   : > { %1607 = vadd.xlane.f32.xlu1 %v1572_v16  ;;  %v1483_v61 = vadd.bf16 %v1467_v7, %v6385_v28  ;;  %vm1501_vm7 = vcmp.gt.bf16.partialorder %v5235_v58, 0  ;;  %v6386_v35 = vpack.c.bf16 %v5102_v6, %v5098_v4  ;;  %v6387_v17 = vpack.c.bf16 %v5114_v12, %v5110_v10  ;;  %v5362_v28 = vpop.permute.xlu1 %1678 }
 0x1b8   : > { %v1468_v26 = vadd.bf16 %v1380_v9, %v5152_v49  ;;  %v1470_v8 = vadd.bf16 %v1394_v44, %v5152_v49  ;;  %v1563_v1 = vmul.bf16 %v5255_v30, %v1539_v5  ;;  %v1525_v15 = vmul.bf16 1045249613, %v1493_v53 }
 0x1b9   : > { %1603 = vadd.xlane.f32.xlu0 %v1570_v45  ;;  %vm1499_vm6 = vcmp.gt.bf16.partialorder %v1483_v61, 0  ;;  %v1515_v13 = vmul.bf16 1045249613, %v1483_v61  ;;  %v1533_v49 = vsel %vm1501_vm7, %v5235_v58, %v1517_v40  ;;  %vm1509_vm8 = vcmp.gt.bf16.partialorder %v1493_v53, 0 }
 0x1ba   : > { %v1484_v63 = vadd.bf16 %v1468_v26, %v6386_v35  ;;  %v1486_v47 = vadd.bf16 %v1470_v8, %v6387_v17  ;;  %v1590_v22 = vunpack.c.h.bf16 %v1563_v1  ;;  %v1557_v33 = vmul.bf16 %v5255_v30, %v1533_v49 }
 0x1bb   : > { %1639 = vadd.xlane.f32.xlu1 %v1588_v42  ;;  %v1531_v11 = vsel %vm1499_vm6, %v1483_v61, %v1515_v13  ;;  %v1541_v4 = vsel %vm1509_vm8, %v1493_v53, %v1525_v15  ;;  %v1589_v18 = vunpack.c.l.bf16 %v1563_v1  ;;  %v1524_v62 = vmul.bf16 1045249613, %v5280_v31  ;;  %v5370_v44 = vpop.permute.xlu1 %1685 }
 0x1bc   : > { %v1555_v27 = vmul.bf16 %v5255_v30, %v1531_v11  ;;  %v1516_v6 = vmul.bf16 1045249613, %v1484_v63  ;;  %vm1500_vm9 = vcmp.gt.bf16.partialorder %v1484_v63, 0  ;;  %v1578_v10 = vunpack.c.h.bf16 %v1557_v33 }
 0x1bd   : > { %1633 = vadd.xlane.f32.xlu0 %v1585_v52  ;;  %v1565_v12 = vmul.bf16 %v5255_v30, %v1541_v4  ;;  %v1577_v58 = vunpack.c.l.bf16 %v1557_v33  ;;  %vm1508_vm10 = vcmp.gt.bf16.partialorder %v5280_v31, 0  ;;  %v1518_v0 = vmul.bf16 1045249613, %v1486_v47 }
 0x1be   : > { %v1574_v21 = vunpack.c.h.bf16 %v1555_v27  ;;  %v1573_v37 = vunpack.c.l.bf16 %v1555_v27  ;;  %v1532_v57 = vsel %vm1500_vm9, %v1484_v63, %v1516_v6  ;;  %v1540_v53 = vsel %vm1508_vm10, %v5280_v31, %v1524_v62 }
 0x1bf   : > { %v1594_v23 = vunpack.c.h.bf16 %v1565_v12  ;;  %v1556_v38 = vmul.bf16 %v5255_v30, %v1532_v57  ;;  %v1593_v59 = vunpack.c.l.bf16 %v1565_v12  ;;  %vm1502_vm11 = vcmp.gt.bf16.partialorder %v1486_v47, 0 }
 0x1c0   : > { %1611 = vadd.xlane.f32.xlu1 %v1574_v21  ;;  %v1564_v25 = vmul.bf16 %v5255_v30, %v1540_v53  ;;  %v1526_v50 = vmul.bf16 1045249613, %v5309_v56  ;;  %v1534_v54 = vsel %vm1502_vm11, %v1486_v47, %v1518_v0  ;;  %vm1510_vm12 = vcmp.gt.bf16.partialorder %v5309_v56, 0  ;;  %v1675_v47 = vpop.permute.xlu0 %1674 }
 0x1c1   : > { %1637 = vadd.xlane.f32.xlu0 %v1587_v14  ;;  %v1576_v48 = vunpack.c.h.bf16 %v1556_v38  ;;  %v1575_v19 = vunpack.c.l.bf16 %v1556_v38  ;;  %v1558_v16 = vmul.bf16 %v5255_v30, %v1534_v54  ;;  %v1519_v31 = vmul.bf16 1045249613, %v5247_v60  ;;  %v1690_v14 = vpop.permute.xlu1 %1689 }
 0x1c2   : > { %v1592_v45 = vunpack.c.h.bf16 %v1564_v25  ;;  %v1542_v39 = vsel %vm1510_vm12, %v5309_v56, %v1526_v50  ;;  %v1591_v41 = vunpack.c.l.bf16 %v1564_v25  ;;  %vm1503_vm13 = vcmp.gt.bf16.partialorder %v5247_v60, 0 }
 0x1c3   : > { %v1580_v7 = vunpack.c.h.bf16 %v1558_v16  ;;  %v1566_v3 = vmul.bf16 %v5255_v30, %v1542_v39  ;;  %v1527_v34 = vmul.bf16 1045249613, %v5314_v43  ;;  %v1535_v61 = vsel %vm1503_vm13, %v5247_v60, %v1519_v31 }
 0x1c4   : > { %1643 = vadd.xlane.f32.xlu1 %v1590_v22  ;;  %v1579_v36 = vunpack.c.l.bf16 %v1558_v16  ;;  %vm1511_vm14 = vcmp.gt.bf16.partialorder %v5314_v43, 0  ;;  %v1559_v52 = vmul.bf16 %v5255_v30, %v1535_v61  ;;  %v1520_v42 = vmul.bf16 1045249613, %v5260_v20  ;;  %v1763_v49 = vpop.permute.xlu0 %1762 }
 0x1c5   : > { %1609 = vadd.xlane.f32.xlu0 %v1573_v37  ;;  %v1596_v56 = vunpack.c.h.bf16 %v1566_v3  ;;  %v1543_v9 = vsel %vm1511_vm14, %v5314_v43, %v1527_v34  ;;  %v1595_v13 = vunpack.c.l.bf16 %v1566_v3  ;;  %vm1504_vm15 = vcmp.gt.bf16.partialorder %v5260_v20, 0  ;;  %v1767_v21 = vpop.permute.xlu1 %1766 }
 0x1c6   : > { %v1582_v60 = vunpack.c.h.bf16 %v1559_v52  ;;  %v1567_v26 = vmul.bf16 %v5255_v30, %v1543_v9  ;;  %v1528_v40 = vmul.bf16 1045249613, %v5316_v2  ;;  %v1536_v11 = vsel %vm1504_vm15, %v5260_v20, %v1520_v42 }
 0x1c7   : > { %v1581_v5 = vunpack.c.l.bf16 %v1559_v52  ;;  %vm1512_vm1 = vcmp.gt.bf16.partialorder %v5316_v2, 0  ;;  %v1560_v8 = vmul.bf16 %v5255_v30, %v1536_v11  ;;  %vm2048_vm2 = vcmask 130112  }
 0x1c8   : > { %1619 = vadd.xlane.f32.xlu1 %v1578_v10  ;;  %v1598_v43 = vunpack.c.h.bf16 %v1567_v26  ;;  %v1544_v27 = vsel %vm1512_vm1, %v5316_v2, %v1528_v40  ;;  %v1597_v35 = vunpack.c.l.bf16 %v1567_v26  ;;  %v1774_v22 = vpop.permute.xlu0 %1773  ;;  %vm2185_vm3 = vcmask 1041409  }
 0x1c9   : > { %1641 = vadd.xlane.f32.xlu0 %v1589_v18  ;;  %v1584_v63 = vunpack.c.h.bf16 %v1560_v8  ;;  %v1568_v17 = vmul.bf16 %v5255_v30, %v1544_v27  ;;  %v1583_v20 = vunpack.c.l.bf16 %v1560_v8  ;;  %v1778_v37 = vpop.permute.xlu1 %1777  ;;  %vm2187_vm4 = vcmask 1042434  }
 0x1ca   : > { %vm2189_vm5 = vcmask 1043459   ;;  %vm2191_vm6 = vcmask 1044484   ;;  %vm2193_vm7 = vcmask 1045509   ;;  %vm2195_vm8 = vcmask 1046534  }
 0x1cb   : > { %v1600_v1 = vunpack.c.h.bf16 %v1568_v17  ;;  %v1599_v15 = vunpack.c.l.bf16 %v1568_v17  ;;  %vm2197_vm9 = vcmask 1047559   ;;  %vm4600_vm10 = vmmov 0  }
 0x1cc   : > { %1651 = vadd.xlane.f32.xlu1 %v1594_v23  ;;  %v1697_v2 = vpop.permute.xlu0 %1696 }
 0x1cd   : > { %1617 = vadd.xlane.f32.xlu0 %v1577_v58  ;;  %v1701_v33 = vpop.permute.xlu1 %1700 }
 0x1d0   : > { %1615 = vadd.xlane.f32.xlu1 %v1576_v48  ;;  %v1785_v6 = vpop.permute.xlu0 %1784 }
 0x1d1   : > { %1649 = vadd.xlane.f32.xlu0 %v1593_v59  ;;  %v1789_v4 = vpop.permute.xlu1 %1788 }
 0x1d4   : > { %1647 = vadd.xlane.f32.xlu1 %v1592_v45  ;;  %v5381_v10 = vpop.permute.xlu0 %1707 }
 0x1d5   : > { %1613 = vadd.xlane.f32.xlu0 %v1575_v19  ;;  %v5379_v18 = vpop.permute.xlu1 %1711 }
 0x1d8   : > { %1623 = vadd.xlane.f32.xlu1 %v1580_v7  ;;  %v5385_v12 = vpop.permute.xlu0 %1795 }
 0x1d9   : > { %1645 = vadd.xlane.f32.xlu0 %v1591_v41  ;;  %v5383_v30 = vpop.permute.xlu1 %1799 }
 0x1dc   : > { %1655 = vadd.xlane.f32.xlu1 %v1596_v56  ;;  %v1719_v57 = vpop.permute.xlu0 %1718 }
 0x1dd   : > { %1621 = vadd.xlane.f32.xlu0 %v1579_v36  ;;  %v1723_v62 = vpop.permute.xlu1 %1722 }
 0x1e0   : > { %1627 = vadd.xlane.f32.xlu1 %v1582_v60  ;;  %v1807_v23 = vpop.permute.xlu0 %1806 }
 0x1e1   : > { %1653 = vadd.xlane.f32.xlu0 %v1595_v13  ;;  %v1811_v58 = vpop.permute.xlu1 %1810 }
 0x1e4   : > { %1659 = vadd.xlane.f32.xlu1 %v1598_v43  ;;  %v5389_v53 = vpop.permute.xlu0 %1729 }
 0x1e5   : > { %1625 = vadd.xlane.f32.xlu0 %v1581_v5  ;;  %v5387_v38 = vpop.permute.xlu1 %1733 }
 0x1e8   : > { %1631 = vadd.xlane.f32.xlu1 %v1584_v63  ;;  %v5393_v59 = vpop.permute.xlu0 %1817 }
 0x1e9   : > { %1657 = vadd.xlane.f32.xlu0 %v1597_v35  ;;  %v5391_v0 = vpop.permute.xlu1 %1821 }
 0x1ec   : > { %1663 = vadd.xlane.f32.xlu1 %v1600_v1  ;;  %v5397_v25 = vpop.permute.xlu0 %1740 }
 0x1ed   : > { %1629 = vadd.xlane.f32.xlu0 %v1583_v20  ;;  %v5395_v48 = vpop.permute.xlu1 %1744 }
 0x1f0   : > { %v5401_v54 = vpop.permute.xlu0 %1828 }
 0x1f1   : > { %1661 = vadd.xlane.f32.xlu0 %v1599_v15  ;;  %v5399_v50 = vpop.permute.xlu1 %1832 }
 0x1f4   : > { %v5405_v45 = vpop.permute.xlu0 %1751 }
 0x1f5   : > { %v5403_v19 = vpop.permute.xlu1 %1755 }
 0x1f8   : > { %v5409_v31 = vpop.permute.xlu0 %1839 }
 0x1f9   : > { %v5407_v16 = vpop.permute.xlu1 %1843 }
 0x23c   : > { %v1636_v39 = vpop.xlane.xlu1 %1635 }
 0x23d   : > { %v5414_v36 = vadd.f32 %v1767_v21, %v1636_v39 }
 0x240   : > { %v1606_v7 = vpop.xlane.xlu1 %1605 }
 0x242   : > { %v1602_v41 = vpop.xlane.xlu0 %1601 }
 0x243   : > { %v5411_v3 = vadd.f32 %v1675_v47, %v1602_v41 }
 0x244   : > { %v1608_v61 = vpop.xlane.xlu1 %1607 }
 0x245   : > { %1942 = vperm.xlu0 %4262, %v5411_v3   ;;  %v5421_v52 = vadd.f32 %v1690_v14, %v1608_v61 }
 0x246   : > { %v1604_v34 = vpop.xlane.xlu0 %1603 }
 0x247   : > { %v5417_v56 = vadd.f32 %v5362_v28, %v1604_v34  ;;  %v5430_v28 = vadd.f32 %v5370_v44, %v1606_v7 }
 0x248   : > { %v1640_v9 = vpop.xlane.xlu1 %1639 }
 0x249   : > { %1993 = vperm.xlu0 %4262, %v5414_v36   ;;  %1945 = vperm.xlu1 %4263, %v5417_v56   ;;  %v5427_v60 = vadd.f32 %v1778_v37, %v1640_v9 }
 0x24a   : > { %v1634_v42 = vpop.xlane.xlu0 %1633 }
 0x24b   : > { %v5423_v13 = vadd.f32 %v1763_v49, %v1634_v42 }
 0x24d   : > { %1951 = vperm.xlu0 %4262, %v5421_v52   ;;  %1990 = vperm.xlu1 %4263, %v5423_v13   ;;  %v1612_v40 = vpop.xlane.xlu1 %1611 }
 0x24e   : > { %v1638_v26 = vpop.xlane.xlu0 %1637  ;;  %v5434_v11 = vadd.f32 %v1701_v33, %v1612_v40 }
 0x24f   : > { %v5436_v43 = vadd.f32 %v1774_v22, %v1638_v26 }
 0x251   : > { %1999 = vperm.xlu0 %4262, %v5427_v60   ;;  %1948 = vperm.xlu1 %4263, %v5430_v28   ;;  %v1644_v8 = vpop.xlane.xlu1 %1643 }
 0x252   : > { %v1610_v5 = vpop.xlane.xlu0 %1609  ;;  %v5440_v14 = vadd.f32 %v1789_v4, %v1644_v8 }
 0x253   : > { %v5442_v44 = vadd.f32 %v1697_v2, %v1610_v5 }
 0x255   : > { %1957 = vperm.xlu0 %4262, %v5434_v11   ;;  %1996 = vperm.xlu1 %4263, %v5436_v43   ;;  %v1620_v35 = vpop.xlane.xlu1 %1619 }
 0x256   : > { %v1642_v27 = vpop.xlane.xlu0 %1641  ;;  %v5446_v63 = vadd.f32 %v1723_v62, %v1620_v35 }
 0x257   : > { %v5448_v47 = vadd.f32 %v1785_v6, %v1642_v27 }
 0x259   : > { %2005 = vperm.xlu0 %4262, %v5440_v14   ;;  %1954 = vperm.xlu1 %4263, %v5442_v44   ;;  %v1652_v20 = vpop.xlane.xlu1 %1651 }
 0x25a   : > { %v1618_v17 = vpop.xlane.xlu0 %1617  ;;  %v5452_v21 = vadd.f32 %v1811_v58, %v1652_v20 }
 0x25b   : > { %v5454_v15 = vadd.f32 %v1719_v57, %v1618_v17 }
 0x25d   : > { %1969 = vperm.xlu0 %4262, %v5446_v63   ;;  %2002 = vperm.xlu1 %4263, %v5448_v47   ;;  %v1616_v49 = vpop.xlane.xlu1 %1615 }
 0x25e   : > { %v1650_v1 = vpop.xlane.xlu0 %1649  ;;  %v5459_v37 = vadd.f32 %v5379_v18, %v1616_v49 }
 0x25f   : > { %v5461_v33 = vadd.f32 %v1807_v23, %v1650_v1 }
 0x261   : > { %2017 = vperm.xlu0 %4262, %v5452_v21   ;;  %1966 = vperm.xlu1 %4263, %v5454_v15   ;;  %v1648_v2 = vpop.xlane.xlu1 %1647 }
 0x262   : > { %v1614_v22 = vpop.xlane.xlu0 %1613  ;;  %v5466_v4 = vadd.f32 %v5383_v30, %v1648_v2 }
 0x263   : > { %v5469_v62 = vadd.f32 %v5381_v10, %v1614_v22 }
 0x265   : > { %1963 = vperm.xlu0 %4262, %v5459_v37   ;;  %2014 = vperm.xlu1 %4263, %v5461_v33   ;;  %v1624_v57 = vpop.xlane.xlu1 %1623 }
 0x266   : > { %v1646_v6 = vpop.xlane.xlu0 %1645  ;;  %v5474_v18 = vadd.f32 %v5387_v38, %v1624_v57 }
 0x267   : > { %v5477_v23 = vadd.f32 %v5385_v12, %v1646_v6 }
 0x268   : > { %6388 = vst [vmem:[#allocation29_spill] sm:$0xff] %v5474_v18 }
 0x269   : > { %2011 = vperm.xlu0 %4262, %v5466_v4   ;;  %1960 = vperm.xlu1 %4263, %v5469_v62   ;;  %v1656_v39 = vpop.xlane.xlu1 %1655 }
 0x26a   : > { %v1622_v58 = vpop.xlane.xlu0 %1621  ;;  %v5482_v10 = vadd.f32 %v5391_v0, %v1656_v39 }
 0x26b   : > { %v5485_v41 = vadd.f32 %v5389_v53, %v1622_v58 }
 0x26c   : > { %6389 = vst [vmem:[#allocation30_spill] sm:$0xff] %v5482_v10 }
 0x26d   : > { %1975 = vperm.xlu0 %4262, %v5474_v18   ;;  %2008 = vperm.xlu1 %4263, %v5477_v23   ;;  %v1628_v7 = vpop.xlane.xlu1 %1627 }
 0x26e   : > { %v1654_v30 = vpop.xlane.xlu0 %1653  ;;  %v5490_v12 = vadd.f32 %v5395_v48, %v1628_v7 }
 0x26f   : > { %v5493_v34 = vadd.f32 %v5393_v59, %v1654_v30 }
 0x270   : > { %6390 = vst [vmem:[#allocation31_spill] sm:$0xff] %v5490_v12 }
 0x271   : > { %2023 = vperm.xlu0 %4262, %v5482_v10   ;;  %1972 = vperm.xlu1 %4263, %v5485_v41   ;;  %6391 = vst [vmem:[#allocation32_spill] sm:$0xff] %v5493_v34  ;;  %v1660_v61 = vpop.xlane.xlu1 %1659 }
 0x272   : > { %v1626_v38 = vpop.xlane.xlu0 %1625  ;;  %v5498_v53 = vadd.f32 %v5399_v50, %v1660_v61 }
 0x273   : > { %v5501_v42 = vadd.f32 %v5397_v25, %v1626_v38  ;;  %v6399_v38 = vlaneseq }
 0x274   : > { %6392 = vst [vmem:[#allocation33_spill] sm:$0xff] %v5498_v53 }
 0x275   : > { %1981 = vperm.xlu0 %4262, %v5490_v12   ;;  %2020 = vperm.xlu1 %4263, %v5493_v34   ;;  %6393 = vst [vmem:[#allocation34_spill] sm:$0xff] %v5501_v42  ;;  %v1632_v9 = vpop.xlane.xlu1 %1631  ;;  %v2038_v61 = vand.u32 127, %v6399_v38 }
 0x276   : > { %v1658_v0 = vpop.xlane.xlu0 %1657  ;;  %v5506_v59 = vadd.f32 %v5403_v19, %v1632_v9 }
 0x277   : > { %v5509_v26 = vadd.f32 %v5401_v54, %v1658_v0 }
 0x278   : > { %6394 = vst [vmem:[#allocation35_spill] sm:$0xff] %v5506_v59 }
 0x279   : > { %2029 = vperm.xlu0 %4262, %v5498_v53   ;;  %1978 = vperm.xlu1 %4263, %v5501_v42   ;;  %6395 = vst [vmem:[#allocation36_spill] sm:$0xff] %v5509_v26  ;;  %v1664_v40 = vpop.xlane.xlu1 %1663 }
 0x27a   : > { %v1630_v48 = vpop.xlane.xlu0 %1629  ;;  %v5514_v25 = vadd.f32 %v5407_v16, %v1664_v40 }
 0x27b   : > { %v5517_v50 = vadd.f32 %v5405_v45, %v1630_v48  ;;  %v2043_v48 = vadd.s32 4294967288, %v2038_v61 }
 0x27c   : > { %6396 = vst [vmem:[#allocation37_spill] sm:$0xff] %v5514_v25 }
 0x27d   : > { %1987 = vperm.xlu0 %4262, %v5506_v59   ;;  %2026 = vperm.xlu1 %4263, %v5509_v26   ;;  %6397 = vst [vmem:[#allocation38_spill] sm:$0xff] %v5517_v50 }
 0x27e   : > { %v1662_v5 = vpop.xlane.xlu0 %1661 }
 0x27f   : > { %v5522_v19 = vadd.f32 %v5409_v31, %v1662_v5 }
 0x281   : > { %2035 = vperm.xlu0 %4262, %v5514_v25   ;;  %1984 = vperm.xlu1 %4263, %v5517_v50   ;;  %6398 = vst [vmem:[#allocation39_spill] sm:$0xff] %v5522_v19  ;;  %v5541_v25 = vsub.s32 %v2043_v48, %v5006_v24 }
 0x285   : > { %2032 = vperm.xlu1 %4263, %v5522_v19   ;;  %v5544_v19 = vsub.s32 %v2038_v61, %v5006_v24 }
 0x2c4   : > { %v1943_v54 = vpop.permute.xlu0 %1942 }
 0x2c5   : > { %v2042_v61 = vrot.slane %v1943_v54, %v5544_v19 }
 0x2c8   : > { %v1946_v8 = vpop.permute.xlu1 %1945  ;;  %v5525_v27 = vpop.permute.xlu0 %1993 }
 0x2c9   : > { %v2047_v38 = vrot.slane %v1946_v8, %v5541_v25  ;;  %v2120_v54 = vrot.slane %v5525_v27, %v5541_v25 }
 0x2cc   : > { %v5527_v35 = vpop.permute.xlu1 %1990  ;;  %v1952_v16 = vpop.permute.xlu0 %1951 }
 0x2cd   : > { %v2057_v48 = vrot.slane %v1952_v16, %v5541_v25  ;;  %v2116_v8 = vrot.slane %v5527_v35, %v5544_v19 }
 0x2d0   : > { %v1949_v17 = vpop.permute.xlu1 %1948  ;;  %v2000_v45 = vpop.permute.xlu0 %1999 }
 0x2d1   : > { %v2053_v53 = vrot.slane %v1949_v17, %v5544_v19  ;;  %v2129_v16 = vrot.slane %v2000_v45, %v5541_v25 }
 0x2d4   : > { %v1997_v20 = vpop.permute.xlu1 %1996  ;;  %v1958_v1 = vpop.permute.xlu0 %1957 }
 0x2d5   : > { %v2125_v12 = vrot.slane %v1997_v20, %v5544_v19  ;;  %v2066_v42 = vrot.slane %v1958_v1, %v5541_v25 }
 0x2d7   : > { %v2130_v18 = vsel %vm2048_vm2, %v2129_v16, %v2125_v12 }
 0x2d8   : > { %v1955_v49 = vpop.permute.xlu1 %1954  ;;  %v2006_v22 = vpop.permute.xlu0 %2005 }
 0x2d9   : > { %v2062_v26 = vrot.slane %v1955_v49, %v5544_v19  ;;  %v2058_v49 = vsel %vm2048_vm2, %v2057_v48, %v2053_v53 }
 0x2db   : > { %v2067_v1 = vsel %vm2048_vm2, %v2066_v42, %v2062_v26 }
 0x2dc   : > { %v2003_v2 = vpop.permute.xlu1 %2002  ;;  %v5529_v6 = vpop.permute.xlu0 %1969 }
 0x2dd   : > { %v2134_v17 = vrot.slane %v2003_v2, %v5544_v19  ;;  %v2138_v2 = vrot.slane %v2006_v22, %v5541_v25  ;;  %v2121_v22 = vsel %vm2048_vm2, %v2120_v54, %v2116_v8 }
 0x2df   : > { %v2139_v48 = vsel %vm2048_vm2, %v2138_v2, %v2134_v17 }
 0x2e0   : > { %v5531_v31 = vpop.permute.xlu1 %1966  ;;  %v5533_v57 = vpop.permute.xlu0 %2017 }
 0x2e4   : > { %v5535_v58 = vpop.permute.xlu1 %2014  ;;  %v1964_v39 = vpop.permute.xlu0 %1963 }
 0x2e5   : > { %v2075_v20 = vrot.slane %v1964_v39, %v5541_v25 }
 0x2e8   : > { %v1961_v30 = vpop.permute.xlu1 %1960  ;;  %v2012_v7 = vpop.permute.xlu0 %2011 }
 0x2e9   : > { %v2071_v24 = vrot.slane %v1961_v30, %v5544_v19  ;;  %v2049_v30 = vsel %vm2048_vm2, %v2047_v38, %v2042_v61  ;;  %v2080_v38 = vrot.slane %v5531_v31, %v5544_v19  ;;  %v2084_v61 = vrot.slane %v5529_v6, %v5541_v25 }
 0x2ea   : > { %v2186_v39 = vsel %vm2185_vm3, %v2058_v49, %v2049_v30 }
 0x2eb   : > { %v2076_v35 = vsel %vm2048_vm2, %v2075_v20, %v2071_v24  ;;  %v2188_v12 = vsel %vm2187_vm4, %v2067_v1, %v2186_v39  ;;  %v2147_v24 = vrot.slane %v2012_v7, %v5541_v25 }
 0x2ec   : > { %v2009_v0 = vpop.permute.xlu1 %2008  ;;  %v1976_v9 = vpop.permute.xlu0 %1975  ;;  %v2190_v17 = vsel %vm2189_vm5, %v2076_v35, %v2188_v12 }
 0x2ed   : > { %v2143_v53 = vrot.slane %v2009_v0, %v5544_v19  ;;  %v2093_v0 = vrot.slane %v1976_v9, %v5541_v25  ;;  %v2085_v9 = vsel %vm2048_vm2, %v2084_v61, %v2080_v38 }
 0x2ee   : > { %v2192_v1 = vsel %vm2191_vm6, %v2085_v9, %v2190_v17 }
 0x2ef   : > { %v2148_v49 = vsel %vm2048_vm2, %v2147_v24, %v2143_v53 }
 0x2f0   : > { %v1973_v40 = vpop.permute.xlu1 %1972  ;;  %v5538_v5 = vpop.permute.xlu0 %2023 }
 0x2f1   : > { %v2089_v45 = vrot.slane %v1973_v40, %v5544_v19  ;;  %v2199_v40 = vsel %vm2185_vm3, %v2130_v18, %v2121_v22  ;;  %v2152_v18 = vrot.slane %v5535_v58, %v5544_v19 }
 0x2f3   : > { %v2094_v8 = vsel %vm2048_vm2, %v2093_v0, %v2089_v45 }
 0x2f4   : > { %v5546_v59 = vpop.permute.xlu1 %2020  ;;  %v1982_v50 = vpop.permute.xlu0 %1981  ;;  %v2194_v53 = vsel %vm2193_vm7, %v2094_v8, %v2192_v1 }
 0x2f5   : > { %v2102_v31 = vrot.slane %v1982_v50, %v5541_v25  ;;  %v2161_v7 = vrot.slane %v5546_v59, %v5544_v19  ;;  %v2165_v50 = vrot.slane %v5538_v5, %v5541_v25  ;;  %v2156_v59 = vrot.slane %v5533_v57, %v5541_v25 }
 0x2f7   : > { %v2166_v45 = vsel %vm2048_vm2, %v2165_v50, %v2161_v7 }
 0x2f8   : > { %v1979_v10 = vpop.permute.xlu1 %1978  ;;  %v2030_v34 = vpop.permute.xlu0 %2029 }
 0x2f9   : > { %v2098_v27 = vrot.slane %v1979_v10, %v5544_v19  ;;  %v2200_v10 = vsel %vm2187_vm4, %v2139_v48, %v2199_v40  ;;  %v2174_v58 = vrot.slane %v2030_v34, %v5541_v25  ;;  %v2157_v48 = vsel %vm2048_vm2, %v2156_v59, %v2152_v18 }
 0x2fa   : > { %v2201_v2 = vsel %vm2189_vm5, %v2148_v49, %v2200_v10 }
 0x2fb   : > { %v2103_v6 = vsel %vm2048_vm2, %v2102_v31, %v2098_v27  ;;  %v2202_v22 = vsel %vm2191_vm6, %v2157_v48, %v2201_v2 }
 0x2fc   : > { %v2027_v42 = vpop.permute.xlu1 %2026  ;;  %v1988_v26 = vpop.permute.xlu0 %1987  ;;  %v2196_v39 = vsel %vm2195_vm8, %v2103_v6, %v2194_v53  ;;  %v2203_v12 = vsel %vm2193_vm7, %v2166_v45, %v2202_v22 }
 0x2fd   : > { %v2170_v16 = vrot.slane %v2027_v42, %v5544_v19  ;;  %v2111_v30 = vrot.slane %v1988_v26, %v5541_v25 }
 0x2ff   : > { %v2175_v38 = vsel %vm2048_vm2, %v2174_v58, %v2170_v16 }
 0x300   : > { %v1985_v20 = vpop.permute.xlu1 %1984  ;;  %v2036_v35 = vpop.permute.xlu0 %2035  ;;  %v2204_v0 = vsel %vm2195_vm8, %v2175_v38, %v2203_v12 }
 0x301   : > { %v2107_v54 = vrot.slane %v1985_v20, %v5544_v19  ;;  %v2183_v42 = vrot.slane %v2036_v35, %v5541_v25 }
 0x303   : > { %v2112_v5 = vsel %vm2048_vm2, %v2111_v30, %v2107_v54 }
 0x304   : > { %v2033_v27 = vpop.permute.xlu1 %2032  ;;  %v2198_v57 = vsel %vm2197_vm9, %v2112_v5, %v2196_v39 }
 0x305   : > { %v2179_v34 = vrot.slane %v2033_v27, %v5544_v19  ;;  %v2208_v26 = vsel %vm979_vm0, %v2198_v57, -inf }
 0x306   : > { %2209 = vmax.xlane.f32.xlu1 %v2208_v26 }
 0x307   : > { %v2184_v24 = vsel %vm2048_vm2, %v2183_v42, %v2179_v34 }
 0x308   : > { %v2205_v40 = vsel %vm2197_vm9, %v2184_v24, %v2204_v0 }
 0x309   : > { %v2211_v61 = vsel %vm979_vm0, %v2205_v40, -inf }
 0x30a   : > { %2212 = vmax.xlane.f32.xlu0 %v2211_v61 }
 0x393   : > { %v5620_v17 = vpop.xlane.xlu1 %2209 }
 0x394   : > { %v2219_v31 = vrot.slane %v5620_v17, %v5015_v29  ;;  %v2223_v10 = vrot.slane %v5620_v17, %v5020_v32  ;;  %v2227_v1 = vrot.slane %v5620_v17, %v5048_v46  ;;  %v2231_v39 = vrot.slane %v5620_v17, %v5060_v51 }
 0x396   : > { %v2296_v49 = vsub.f32 %v5411_v3, %v2219_v31  ;;  %v2297_v8 = vsub.f32 %v5417_v56, %v2219_v31  ;;  %v2299_v7 = vsub.f32 %v5421_v52, %v2223_v10  ;;  %v2298_v9 = vsub.f32 %v5430_v28, %v2223_v10 }
 0x397   : > { %v5630_v50 = vpop.xlane.xlu0 %2212  ;;  %v2300_v53 = vsub.f32 %v5442_v44, %v2227_v1  ;;  %v2302_v57 = vsub.f32 %v5469_v62, %v2231_v39  ;;  %v2303_v34 = vsub.f32 %v5459_v37, %v2231_v39 }
 0x398   : > { %v2328_v18 = vmul.f32 1.442695, %v2296_v49  ;;  %v2330_v6 = vmul.f32 1.442695, %v2297_v8  ;;  %v2334_v16 = vmul.f32 1.442695, %v2299_v7  ;;  %v2251_v30 = vrot.slane %v5630_v50, %v5015_v29 }
 0x399   : > { %v2332_v20 = vmul.f32 1.442695, %v2298_v9  ;;  %v2255_v3 = vrot.slane %v5630_v50, %v5020_v32  ;;  %v2259_v45 = vrot.slane %v5630_v50, %v5048_v46  ;;  %v2336_v48 = vmul.f32 1.442695, %v2300_v53  ;;  %v6400_v7 = vld [vmem:[#allocation26_spill] sm:$0xff] }
 0x39a   : > { %4305 = vpow2.f32 %v2328_v18  ;;  %v2312_v56 = vsub.f32 %v5423_v13, %v2251_v30  ;;  %v2313_v52 = vsub.f32 %v5414_v36, %v2251_v30  ;;  %v2263_v42 = vrot.slane %v5630_v50, %v5060_v51 }
 0x39b   : > { %4307 = vpow2.f32 %v2330_v6  ;;  %v2314_v59 = vsub.f32 %v5436_v43, %v2255_v3  ;;  %v2315_v58 = vsub.f32 %v5427_v60, %v2255_v3  ;;  %v2301_v43 = vsub.f32 %v5434_v11, %v2227_v1 }
 0x39c   : > { %4309 = vpow2.f32 %v2334_v16  ;;  %v2360_v2 = vmul.f32 1.442695, %v2312_v56  ;;  %v2362_v35 = vmul.f32 1.442695, %v2313_v52  ;;  %v2316_v38 = vsub.f32 %v5448_v47, %v2259_v45  ;;  %v6401_v56 = vld [vmem:[#allocation29_spill] sm:$0xff] }
 0x39d   : > { %4311 = vpow2.f32 %v2332_v20  ;;  %v2364_v5 = vmul.f32 1.442695, %v2314_v59  ;;  %v2366_v60 = vmul.f32 1.442695, %v2315_v58  ;;  %v2338_v27 = vmul.f32 1.442695, %v2301_v43 }
 0x39e   : > { %4313 = vpow2.f32 %v2360_v2  ;;  %v2317_v44 = vsub.f32 %v5440_v14, %v2259_v45  ;;  %v2368_v11 = vmul.f32 1.442695, %v2316_v38  ;;  %v2235_v14 = vrot.slane %v5620_v17, %v5070_v55  ;;  %v6402_v2 = vld [vmem:[#allocation27_spill] sm:$0xff] }
 0x39f   : > { %4315 = vpow2.f32 %v2362_v35  ;;  %v2340_v47 = vmul.f32 1.442695, %v2302_v57  ;;  %v2318_v62 = vsub.f32 %v5477_v23, %v2263_v42  ;;  %v2342_v24 = vmul.f32 1.442695, %v2303_v34  ;;  %v6403_v35 = vld [vmem:[#allocation32_spill] sm:$0xff]  ;;  %v6406_v57 = vld [vmem:[#allocation31_spill] sm:$0xff] }
 0x3a0   : > { %4317 = vpow2.f32 %v2364_v5  ;;  %v2370_v26 = vmul.f32 1.442695, %v2317_v44  ;;  %v2319_v37 = vsub.f32 %v5466_v4, %v2263_v42  ;;  %v2304_v61 = vsub.f32 %v5454_v15, %v2235_v14  ;;  %v6404_v5 = vld [vmem:[#allocation30_spill] sm:$0xff] }
 0x3a1   : > { %4319 = vpow2.f32 %v2366_v60  ;;  %v2267_v31 = vrot.slane %v5630_v50, %v5070_v55  ;;  %v2372_v23 = vmul.f32 1.442695, %v2318_v62  ;;  %v2305_v10 = vsub.f32 %v5446_v63, %v2235_v14  ;;  %v6407_v14 = vld [vmem:[#allocation28_spill] sm:$0xff] }
 0x3a2   : > { %4321 = vpow2.f32 %v2336_v48  ;;  %v2374_v4 = vmul.f32 1.442695, %v2319_v37  ;;  %v2239_v15 = vrot.slane %v5620_v17, %v6400_v7  ;;  %v2344_v9 = vmul.f32 1.442695, %v2304_v61  ;;  %v6405_v48 = vld [vmem:[#allocation34_spill] sm:$0xff] }
 0x3a3   : > { %4323 = vpow2.f32 %v2338_v27  ;;  %v2320_v18 = vsub.f32 %v5461_v33, %v2267_v31  ;;  %v2346_v6 = vmul.f32 1.442695, %v2305_v10  ;;  %v2321_v63 = vsub.f32 %v5452_v21, %v2267_v31  ;;  %v6409_v31 = vld [vmem:[#allocation33_spill] sm:$0xff] }
 0x3a4   : > { %v5638_v28 = vpop.eup %4305  ;;  %4325 = vpow2.f32 %v2368_v11  ;;  %v2306_v30 = vsub.f32 %v5485_v41, %v2239_v15  ;;  %v2271_v3 = vrot.slane %v5630_v50, %v6400_v7  ;;  %v2307_v52 = vsub.f32 %v6401_v56, %v2239_v15  ;;  %v6410_v15 = vld [vmem:[#allocation38_spill] sm:$0xff] }
 0x3a5   : > { %v5640_v54 = vpop.eup %4307  ;;  %2425 = vperm.xlu0 %4262, %v5638_v28   ;;  %4327 = vpow2.f32 %v2370_v26  ;;  %v2376_v33 = vmul.f32 1.442695, %v2320_v18  ;;  %v2378_v21 = vmul.f32 1.442695, %v2321_v63  ;;  %v2243_v41 = vrot.slane %v5620_v17, %v6402_v2 }
 0x3a6   : > { %2428 = vperm.xlu1 %4263, %v5640_v54   ;;  %v5648_v13 = vpop.eup %4309  ;;  %4329 = vpow2.f32 %v2340_v47  ;;  %v2348_v58 = vmul.f32 1.442695, %v2306_v30  ;;  %v2322_v53 = vsub.f32 %v6403_v35, %v2271_v3  ;;  %v2350_v45 = vmul.f32 1.442695, %v2307_v52  ;;  %v6414_v52 = vld [vmem:[#allocation39_spill] sm:$0xff] }
 0x3a7   : > { %v5650_v36 = vpop.eup %4311  ;;  %4331 = vpow2.f32 %v2342_v24  ;;  %v2323_v43 = vsub.f32 %v6404_v5, %v2271_v3  ;;  %v2308_v38 = vsub.f32 %v6405_v48, %v2243_v41  ;;  %v2275_v27 = vrot.slane %v5630_v50, %v6402_v2  ;;  %v6408_v24 = vld [vmem:[#allocation36_spill] sm:$0xff] }
 0x3a8   : > { %v5666_v22 = vpop.eup %4313  ;;  %4333 = vpow2.f32 %v2372_v23  ;;  %v2380_v44 = vmul.f32 1.442695, %v2322_v53  ;;  %v2309_v42 = vsub.f32 %v6406_v57, %v2243_v41  ;;  %v2247_v47 = vrot.slane %v5620_v17, %v6407_v14  ;;  %v6415_v41 = vld [vmem:[#allocation37_spill] sm:$0xff] }
 0x3a9   : > { %2434 = vperm.xlu0 %4262, %v5648_v13   ;;  %v5668_v12 = vpop.eup %4315  ;;  %4335 = vpow2.f32 %v2374_v4  ;;  %v2382_v11 = vmul.f32 1.442695, %v2323_v43  ;;  %v2352_v62 = vmul.f32 1.442695, %v2308_v38  ;;  %v2324_v37 = vsub.f32 %v6408_v24, %v2275_v27 }
 0x3aa   : > { %2431 = vperm.xlu1 %4263, %v5650_v36   ;;  %v5676_v0 = vpop.eup %4317  ;;  %4337 = vpow2.f32 %v2344_v9  ;;  %v2354_v61 = vmul.f32 1.442695, %v2309_v42  ;;  %v2325_v23 = vsub.f32 %v6409_v31, %v2275_v27  ;;  %v2310_v9 = vsub.f32 %v6410_v15, %v2247_v47 }
 0x3ab   : > { %v5678_v40 = vpop.eup %4319  ;;  %4339 = vpow2.f32 %v2346_v6  ;;  %v2279_v17 = vrot.slane %v5630_v50, %v6407_v14  ;;  %v2384_v18 = vmul.f32 1.442695, %v2324_v37  ;;  %v6411_v6 = vld [vmem:[#allocation35_spill] sm:$0xff] }
 0x3ac   : > { %v5686_v49 = vpop.eup %4321  ;;  %4341 = vpow2.f32 %v2376_v33  ;;  %v2311_v63 = vsub.f32 %v6411_v6, %v2247_v47  ;;  %v2386_v30 = vmul.f32 1.442695, %v2325_v23  ;;  %v2356_v56 = vmul.f32 1.442695, %v2310_v9 }
 0x3ad   : > { %2476 = vperm.xlu0 %4262, %v5668_v12   ;;  %v5688_v8 = vpop.eup %4323  ;;  %4343 = vpow2.f32 %v2378_v21  ;;  %v2326_v21 = vsub.f32 %v6414_v52, %v2279_v17 }
 0x3ae   : > { %2473 = vperm.xlu1 %4263, %v5666_v22   ;;  %v5696_v16 = vpop.eup %4325  ;;  %4345 = vpow2.f32 %v2348_v58  ;;  %v2358_v50 = vmul.f32 1.442695, %v2311_v63  ;;  %v2327_v58 = vsub.f32 %v6415_v41, %v2279_v17 }
 0x3af   : > { %v5698_v20 = vpop.eup %4327  ;;  %4347 = vpow2.f32 %v2350_v45  ;;  %v2388_v45 = vmul.f32 1.442695, %v2326_v21 }
 0x3b0   : > { %v5706_v1 = vpop.eup %4329  ;;  %4349 = vpow2.f32 %v2380_v44  ;;  %v2390_v5 = vmul.f32 1.442695, %v2327_v58 }
 0x3b1   : > { %2482 = vperm.xlu0 %4262, %v5678_v40   ;;  %v5708_v59 = vpop.eup %4331  ;;  %4351 = vpow2.f32 %v2382_v11 }
 0x3b2   : > { %2479 = vperm.xlu1 %4263, %v5676_v0   ;;  %v5716_v60 = vpop.eup %4333  ;;  %4353 = vpow2.f32 %v2352_v62 }
 0x3b3   : > { %v5718_v39 = vpop.eup %4335  ;;  %4355 = vpow2.f32 %v2354_v61 }
 0x3b4   : > { %v5726_v34 = vpop.eup %4337  ;;  %4357 = vpow2.f32 %v2384_v18 }
 0x3b5   : > { %2440 = vperm.xlu0 %4262, %v5688_v8   ;;  %v5728_v26 = vpop.eup %4339  ;;  %4359 = vpow2.f32 %v2386_v30 }
 0x3b6   : > { %2437 = vperm.xlu1 %4263, %v5686_v49   ;;  %v5736_v10 = vpop.eup %4341  ;;  %4361 = vpow2.f32 %v2356_v56 }
 0x3b7   : > { %v5738_v4 = vpop.eup %4343  ;;  %4363 = vpow2.f32 %v2358_v50 }
 0x3b8   : > { %v5746_v3 = vpop.eup %4345  ;;  %4365 = vpow2.f32 %v2388_v45 }
 0x3b9   : > { %2488 = vperm.xlu0 %4262, %v5698_v20   ;;  %6412 = vst [vmem:[#allocation26_spill] sm:$0xff] %v5746_v3  ;;  %v5748_v33 = vpop.eup %4347  ;;  %4367 = vpow2.f32 %v2390_v5 }
 0x3ba   : > { %2485 = vperm.xlu1 %4263, %v5696_v16   ;;  %6413 = vst [vmem:[#allocation29_spill] sm:$0xff] %v5748_v33  ;;  %v5754_v35 = vpop.eup %4349 }
 0x3bb   : > { %6416 = vst [vmem:[#allocation32_spill] sm:$0xff] %v5754_v35  ;;  %v5756_v53 = vpop.eup %4351 }
 0x3bc   : > { %6417 = vst [vmem:[#allocation30_spill] sm:$0xff] %v5756_v53  ;;  %v5760_v43 = vpop.eup %4353 }
 0x3bd   : > { %2446 = vperm.xlu0 %4262, %v5708_v59   ;;  %6418 = vst [vmem:[#allocation34_spill] sm:$0xff] %v5760_v43  ;;  %v5762_v48 = vpop.eup %4355 }
 0x3be   : > { %2443 = vperm.xlu1 %4263, %v5706_v1   ;;  %6419 = vst [vmem:[#allocation31_spill] sm:$0xff] %v5762_v48  ;;  %v5766_v38 = vpop.eup %4357 }
 0x3bf   : > { %6420 = vst [vmem:[#allocation36_spill] sm:$0xff] %v5766_v38  ;;  %v5768_v27 = vpop.eup %4359 }
 0x3c0   : > { %6421 = vst [vmem:[#allocation33_spill] sm:$0xff] %v5768_v27  ;;  %v5772_v44 = vpop.eup %4361 }
 0x3c1   : > { %2494 = vperm.xlu0 %4262, %v5718_v39   ;;  %6422 = vst [vmem:[#allocation38_spill] sm:$0xff] %v5772_v44  ;;  %v5774_v57 = vpop.eup %4363 }
 0x3c2   : > { %2491 = vperm.xlu1 %4263, %v5716_v60   ;;  %6423 = vst [vmem:[#allocation35_spill] sm:$0xff] %v5774_v57  ;;  %v5778_v42 = vpop.eup %4365 }
 0x3c3   : > { %6424 = vst [vmem:[#allocation39_spill] sm:$0xff] %v5778_v42  ;;  %v5780_v11 = vpop.eup %4367 }
 0x3c4   : > { %6425 = vst [vmem:[#allocation37_spill] sm:$0xff] %v5780_v11 }
 0x3c5   : > { %2452 = vperm.xlu0 %4262, %v5728_v26  }
 0x3c6   : > { %2449 = vperm.xlu1 %4263, %v5726_v34  }
 0x3c9   : > { %2500 = vperm.xlu0 %4262, %v5738_v4  }
 0x3ca   : > { %2497 = vperm.xlu1 %4263, %v5736_v10  }
 0x3cd   : > { %2458 = vperm.xlu0 %4262, %v5748_v33  }
 0x3ce   : > { %2455 = vperm.xlu1 %4263, %v5746_v3  }
 0x3d1   : > { %2506 = vperm.xlu0 %4262, %v5756_v53  }
 0x3d2   : > { %2503 = vperm.xlu1 %4263, %v5754_v35  }
 0x3d5   : > { %2464 = vperm.xlu0 %4262, %v5762_v48  }
 0x3d6   : > { %2461 = vperm.xlu1 %4263, %v5760_v43  }
 0x3d9   : > { %2512 = vperm.xlu0 %4262, %v5768_v27  }
 0x3da   : > { %2509 = vperm.xlu1 %4263, %v5766_v38  }
 0x3dd   : > { %2470 = vperm.xlu0 %4262, %v5774_v57  }
 0x3de   : > { %2467 = vperm.xlu1 %4263, %v5772_v44  }
 0x3e1   : > { %2518 = vperm.xlu0 %4262, %v5780_v11  }
 0x3e2   : > { %2515 = vperm.xlu1 %4263, %v5778_v42  }
 0x424   : > { %v2426_v62 = vpop.permute.xlu0 %2425 }
 0x425   : > { %v2429_v47 = vpop.permute.xlu1 %2428  ;;  %v2523_v38 = vrot.slane %v2426_v62, %v5544_v19 }
 0x426   : > { %v2527_v27 = vrot.slane %v2429_v47, %v5541_v25 }
 0x428   : > { %v2435_v37 = vpop.permute.xlu0 %2434 }
 0x429   : > { %v2432_v24 = vpop.permute.xlu1 %2431  ;;  %v2536_v57 = vrot.slane %v2435_v37, %v5541_v25 }
 0x42a   : > { %v2532_v42 = vrot.slane %v2432_v24, %v5544_v19  ;;  %v2528_v24 = vsel %vm2048_vm2, %v2527_v27, %v2523_v38 }
 0x42c   : > { %v5786_v31 = vpop.permute.xlu0 %2476  ;;  %v2537_v53 = vsel %vm2048_vm2, %v2536_v57, %v2532_v42 }
 0x42d   : > { %v5784_v61 = vpop.permute.xlu1 %2473  ;;  %v2664_v42 = vsel %vm2185_vm3, %v2537_v53, %v2528_v24 }
 0x430   : > { %v2483_v15 = vpop.permute.xlu0 %2482 }
 0x431   : > { %v2480_v23 = vpop.permute.xlu1 %2479  ;;  %v2608_v47 = vrot.slane %v2483_v15, %v5541_v25 }
 0x432   : > { %v2604_v37 = vrot.slane %v2480_v23, %v5544_v19 }
 0x434   : > { %v2441_v17 = vpop.permute.xlu0 %2440  ;;  %v2609_v53 = vsel %vm2048_vm2, %v2608_v47, %v2604_v37 }
 0x435   : > { %v2438_v9 = vpop.permute.xlu1 %2437  ;;  %v2545_v48 = vrot.slane %v2441_v17, %v5541_v25 }
 0x436   : > { %v2541_v14 = vrot.slane %v2438_v9, %v5544_v19 }
 0x438   : > { %v2489_v6 = vpop.permute.xlu0 %2488  ;;  %v2546_v62 = vsel %vm2048_vm2, %v2545_v48, %v2541_v14  ;;  %v2599_v14 = vrot.slane %v5786_v31, %v5541_v25 }
 0x439   : > { %v2486_v18 = vpop.permute.xlu1 %2485  ;;  %v2617_v17 = vrot.slane %v2489_v6, %v5541_v25 }
 0x43a   : > { %v2613_v9 = vrot.slane %v2486_v18, %v5544_v19 }
 0x43c   : > { %v2447_v30 = vpop.permute.xlu0 %2446 }
 0x43d   : > { %v2444_v63 = vpop.permute.xlu1 %2443  ;;  %v2554_v2 = vrot.slane %v2447_v30, %v5541_v25  ;;  %v2665_v30 = vsel %vm2187_vm4, %v2546_v62, %v2664_v42 }
 0x43e   : > { %v2550_v35 = vrot.slane %v2444_v63, %v5544_v19  ;;  %v2595_v63 = vrot.slane %v5784_v61, %v5544_v19 }
 0x440   : > { %v2495_v52 = vpop.permute.xlu0 %2494  ;;  %v2555_v48 = vsel %vm2048_vm2, %v2554_v2, %v2550_v35 }
 0x441   : > { %v2492_v56 = vpop.permute.xlu1 %2491  ;;  %v2666_v35 = vsel %vm2189_vm5, %v2555_v48, %v2665_v30 }
 0x442   : > { %v2622_v61 = vrot.slane %v2492_v56, %v5544_v19 }
 0x444   : > { %v2453_v50 = vpop.permute.xlu0 %2452 }
 0x445   : > { %v2450_v21 = vpop.permute.xlu1 %2449  ;;  %v2563_v57 = vrot.slane %v2453_v50, %v5541_v25  ;;  %v2618_v50 = vsel %vm2048_vm2, %v2617_v17, %v2613_v9 }
 0x446   : > { %v2559_v3 = vrot.slane %v2450_v21, %v5544_v19  ;;  %v2626_v21 = vrot.slane %v2495_v52, %v5541_v25 }
 0x448   : > { %v2501_v58 = vpop.permute.xlu0 %2500  ;;  %v2627_v47 = vsel %vm2048_vm2, %v2626_v21, %v2622_v61 }
 0x449   : > { %v2498_v41 = vpop.permute.xlu1 %2497  ;;  %v2635_v2 = vrot.slane %v2501_v58, %v5541_v25  ;;  %v2600_v58 = vsel %vm2048_vm2, %v2599_v14, %v2595_v63 }
 0x44a   : > { %v2631_v31 = vrot.slane %v2498_v41, %v5544_v19 }
 0x44c   : > { %v2459_v5 = vpop.permute.xlu0 %2458  ;;  %v2636_v9 = vsel %vm2048_vm2, %v2635_v2, %v2631_v31 }
 0x44d   : > { %v2456_v45 = vpop.permute.xlu1 %2455  ;;  %v2572_v27 = vrot.slane %v2459_v5, %v5541_v25 }
 0x44e   : > { %v2568_v38 = vrot.slane %v2456_v45, %v5544_v19  ;;  %v2564_v45 = vsel %vm2048_vm2, %v2563_v57, %v2559_v3 }
 0x44f   : > { %v2667_v62 = vsel %vm2191_vm6, %v2564_v45, %v2666_v35 }
 0x450   : > { %v2507_v44 = vpop.permute.xlu0 %2506 }
 0x451   : > { %v2504_v11 = vpop.permute.xlu1 %2503  ;;  %v2644_v5 = vrot.slane %v2507_v44, %v5541_v25  ;;  %v2671_v44 = vsel %vm2185_vm3, %v2609_v53, %v2600_v58 }
 0x452   : > { %v2672_v57 = vsel %vm2187_vm4, %v2618_v50, %v2671_v44 }
 0x454   : > { %v2465_v33 = vpop.permute.xlu0 %2464 }
 0x455   : > { %v2462_v43 = vpop.permute.xlu1 %2461  ;;  %v2581_v18 = vrot.slane %v2465_v33, %v5541_v25  ;;  %v2573_v33 = vsel %vm2048_vm2, %v2572_v27, %v2568_v38 }
 0x456   : > { %v2577_v15 = vrot.slane %v2462_v43, %v5544_v19  ;;  %v2640_v43 = vrot.slane %v2504_v11, %v5544_v19  ;;  %v2668_v17 = vsel %vm2193_vm7, %v2573_v33, %v2667_v62 }
 0x458   : > { %v2513_v6 = vpop.permute.xlu0 %2512  ;;  %v2582_v56 = vsel %vm2048_vm2, %v2581_v18, %v2577_v15  ;;  %v2645_v42 = vsel %vm2048_vm2, %v2644_v5, %v2640_v43 }
 0x459   : > { %v2510_v23 = vpop.permute.xlu1 %2509  ;;  %v2653_v37 = vrot.slane %v2513_v6, %v5541_v25  ;;  %v2669_v63 = vsel %vm2195_vm8, %v2582_v56, %v2668_v17 }
 0x45a   : > { %v2649_v52 = vrot.slane %v2510_v23, %v5544_v19  ;;  %v2673_v23 = vsel %vm2189_vm5, %v2627_v47, %v2672_v57 }
 0x45b   : > { %v2674_v6 = vsel %vm2191_vm6, %v2636_v9, %v2673_v23 }
 0x45c   : > { %v2471_v41 = vpop.permute.xlu0 %2470  ;;  %v2654_v14 = vsel %vm2048_vm2, %v2653_v37, %v2649_v52  ;;  %v2675_v61 = vsel %vm2193_vm7, %v2645_v42, %v2674_v6 }
 0x45d   : > { %v2468_v24 = vpop.permute.xlu1 %2467  ;;  %v2590_v11 = vrot.slane %v2471_v41, %v5541_v25  ;;  %v2676_v50 = vsel %vm2195_vm8, %v2654_v14, %v2675_v61 }
 0x45e   : > { %v2586_v3 = vrot.slane %v2468_v24, %v5544_v19 }
 0x460   : > { %v2591_v27 = vsel %vm2048_vm2, %v2590_v11, %v2586_v3  ;;  %v2519_v15 = vpop.permute.xlu0 %2518 }
 0x461   : > { %v2516_v38 = vpop.permute.xlu1 %2515  ;;  %v2670_v18 = vsel %vm2197_vm9, %v2591_v27, %v2669_v63  ;;  %v2662_v53 = vrot.slane %v2519_v15, %v5541_v25 }
 0x462   : > { %v2658_v48 = vrot.slane %v2516_v38, %v5544_v19  ;;  %v2680_v30 = vsel %vm979_vm0, %v2670_v18, 0.0 }
 0x463   : > { %2681 = vadd.xlane.f32.xlu1 %v2680_v30 }
 0x464   : > { %v2663_v21 = vsel %vm2048_vm2, %v2662_v53, %v2658_v48 }
 0x465   : > { %v2677_v45 = vsel %vm2197_vm9, %v2663_v21, %v2676_v50 }
 0x466   : > { %v2683_v31 = vsel %vm979_vm0, %v2677_v45, 0.0 }
 0x467   : > { %2684 = vadd.xlane.f32.xlu0 %v2683_v31 }
 0x4f0   : > { %v2682_v2 = vpop.xlane.xlu1 %2681 }
 0x4f1   : > { %v2686_v35 = vmax.f32 %v2682_v2, 1e-20 }
 0x4f3   : > { %4369 = vrcp.f32 %v2686_v35 }
 0x4f4   : > { %v2685_v33 = vpop.xlane.xlu0 %2684 }
 0x4f5   : > { %v2687_v43 = vmax.f32 %v2685_v33, 1e-20 }
 0x4f7   : > { %4371 = vrcp.f32 %v2687_v43 }
 0x4fd   : > { %v5854_v5 = vpop.eup %4369 }
 0x4fe   : > { %v2695_v24 = vrot.slane %v5854_v5, %v5015_v29  ;;  %v2699_v56 = vrot.slane %v5854_v5, %v5020_v32 }
 0x500   : > { %v2772_v52 = vmul.f32 %v5638_v28, %v2695_v24  ;;  %v2773_v37 = vmul.f32 %v5640_v54, %v2695_v24  ;;  %v2774_v3 = vmul.f32 %v5650_v36, %v2699_v56  ;;  %v2775_v41 = vmul.f32 %v5648_v13, %v2699_v56 }
 0x501   : > { %v5864_v58 = vpop.eup %4371  ;;  %v2703_v13 = vrot.slane %v5854_v5, %v5048_v46 }
 0x502   : > { %v2804_v47 = vpack.c.bf16 %v2773_v37, %v2772_v52  ;;  %v2727_v62 = vrot.slane %v5864_v58, %v5015_v29  ;;  %v2805_v11 = vpack.c.bf16 %v2775_v41, %v2774_v3  ;;  %v2731_v17 = vrot.slane %v5864_v58, %v5020_v32 }
 0x503   : > { %v2776_v32 = vmul.f32 %v5686_v49, %v2703_v13  ;;  %v2735_v23 = vrot.slane %v5864_v58, %v5048_v46  ;;  %v2739_v46 = vrot.slane %v5864_v58, %v5060_v51  ;;  %v2743_v35 = vrot.slane %v5864_v58, %v5070_v55 }
 0x504   : > { %v2843_v44 = vunpack.c.h.b16 %v2804_v47  ;;  %v2842_v9 = vunpack.c.l.b16 %v2804_v47  ;;  %v2788_v28 = vmul.f32 %v5666_v22, %v2727_v62  ;;  %v2789_v54 = vmul.f32 %v5668_v12, %v2727_v62 }
 0x505   : > { %v2844_v36 = vunpack.c.l.b16 %v2805_v11  ;;  %v2845_v57 = vunpack.c.h.b16 %v2805_v11  ;;  %v2790_v29 = vmul.f32 %v5676_v0, %v2731_v17  ;;  %v2791_v38 = vmul.f32 %v5678_v40, %v2731_v17  ;;  %v6428_v11 = vld [vmem:[#allocation27_spill] sm:$0xff] }
 0x506   : > { %2878 = vperm.xlu1 %4263, %v2843_v44   ;;  %2875 = vperm.xlu0 %4262, %v2842_v9   ;;  %v2812_v42 = vpack.c.bf16 %v2789_v54, %v2788_v28  ;;  %v2777_v22 = vmul.f32 %v5688_v8, %v2703_v13  ;;  %v2707_v0 = vrot.slane %v5854_v5, %v5060_v51  ;;  %v6429_v9 = vld [vmem:[#allocation32_spill] sm:$0xff]  ;;  %v6430_v28 = vld [vmem:[#allocation30_spill] sm:$0xff] }
 0x507   : > { %v2813_v63 = vpack.c.bf16 %v2791_v38, %v2790_v29  ;;  %v2792_v15 = vmul.f32 %v5696_v16, %v2735_v23  ;;  %v2793_v49 = vmul.f32 %v5698_v20, %v2735_v23  ;;  %v2794_v21 = vmul.f32 %v5716_v60, %v2739_v46 }
 0x508   : > { %v2859_v27 = vunpack.c.h.b16 %v2812_v42  ;;  %v2858_v12 = vunpack.c.l.b16 %v2812_v42  ;;  %v2806_v14 = vpack.c.bf16 %v2777_v22, %v2776_v32  ;;  %v2778_v8 = vmul.f32 %v5706_v1, %v2707_v0 }
 0x509   : > { %v2861_v48 = vunpack.c.h.b16 %v2813_v63  ;;  %v2860_v40 = vunpack.c.l.b16 %v2813_v63  ;;  %v2779_v18 = vmul.f32 %v5708_v59, %v2707_v0  ;;  %v2814_v30 = vpack.c.bf16 %v2793_v49, %v2792_v15  ;;  %v6436_v15 = vld [vmem:[#allocation38_spill] sm:$0xff] }
 0x50a   : > { %2881 = vperm.xlu1 %4263, %v2844_v36   ;;  %2884 = vperm.xlu0 %4262, %v2845_v57   ;;  %v2847_v6 = vunpack.c.h.b16 %v2806_v14  ;;  %v2846_v53 = vunpack.c.l.b16 %v2806_v14  ;;  %v2795_v16 = vmul.f32 %v5718_v39, %v2739_v46  ;;  %v2711_v1 = vrot.slane %v5854_v5, %v5070_v55  ;;  %v6431_v36 = vld [vmem:[#allocation34_spill] sm:$0xff]  ;;  %v6432_v57 = vld [vmem:[#allocation31_spill] sm:$0xff]  ;;  %v6434_v14 = vld [vmem:[#allocation36_spill] sm:$0xff] }
 0x50b   : > { %v2807_v61 = vpack.c.bf16 %v2779_v18, %v2778_v8  ;;  %v2863_v20 = vunpack.c.h.b16 %v2814_v30  ;;  %v2862_v50 = vunpack.c.l.b16 %v2814_v30  ;;  %v2715_v39 = vrot.slane %v5854_v5, %v6400_v7  ;;  %v6437_v8 = vld [vmem:[#allocation35_spill] sm:$0xff] }
 0x50c   : > { %v2815_v45 = vpack.c.bf16 %v2795_v16, %v2794_v21  ;;  %v2780_v31 = vmul.f32 %v5726_v34, %v2711_v1  ;;  %v2781_v2 = vmul.f32 %v5728_v26, %v2711_v1  ;;  %v2796_v24 = vmul.f32 %v5736_v10, %v2743_v35  ;;  %v6426_v34 = vld [vmem:[#allocation26_spill] sm:$0xff]  ;;  %v6427_v26 = vld [vmem:[#allocation29_spill] sm:$0xff]  ;;  %v6438_v16 = vld [vmem:[#allocation39_spill] sm:$0xff] }
 0x50d   : > { %v2849_v59 = vunpack.c.h.b16 %v2807_v61  ;;  %v2848_v51 = vunpack.c.l.b16 %v2807_v61  ;;  %v2797_v56 = vmul.f32 %v5738_v4, %v2743_v35  ;;  %v2782_v52 = vmul.f32 %v6426_v34, %v2715_v39 }
 0x50e   : > { %2926 = vperm.xlu0 %4262, %v2859_v27   ;;  %2923 = vperm.xlu1 %4263, %v2858_v12   ;;  %v2865_v60 = vunpack.c.h.b16 %v2815_v45  ;;  %v2864_v33 = vunpack.c.l.b16 %v2815_v45  ;;  %v2808_v43 = vpack.c.bf16 %v2781_v2, %v2780_v31  ;;  %v2783_v37 = vmul.f32 %v6427_v26, %v2715_v39  ;;  %v6433_v27 = vld [vmem:[#allocation28_spill] sm:$0xff] }
 0x50f   : > { %v2816_v41 = vpack.c.bf16 %v2797_v56, %v2796_v24  ;;  %v2747_v47 = vrot.slane %v5864_v58, %v6400_v7  ;;  %v2719_v10 = vrot.slane %v5854_v5, %v6428_v11  ;;  %v2751_v32 = vrot.slane %v5864_v58, %v6428_v11 }
 0x510   : > { %v2851_v3 = vunpack.c.h.b16 %v2808_v43  ;;  %v2850_v55 = vunpack.c.l.b16 %v2808_v43  ;;  %v2809_v62 = vpack.c.bf16 %v2783_v37, %v2782_v52  ;;  %v2723_v12 = vrot.slane %v5854_v5, %v6433_v27 }
 0x511   : > { %v2867_v44 = vunpack.c.h.b16 %v2816_v41  ;;  %v2866_v4 = vunpack.c.l.b16 %v2816_v41  ;;  %v2798_v17 = vmul.f32 %v6429_v9, %v2747_v47  ;;  %v2799_v54 = vmul.f32 %v6430_v28, %v2747_v47 }
 0x512   : > { %2932 = vperm.xlu0 %4262, %v2861_v48   ;;  %2929 = vperm.xlu1 %4263, %v2860_v40   ;;  %v2784_v13 = vmul.f32 %v6431_v36, %v2719_v10  ;;  %v2785_v42 = vmul.f32 %v6432_v57, %v2719_v10  ;;  %v2853_v29 = vunpack.c.h.b16 %v2809_v62  ;;  %v2852_v7 = vunpack.c.l.b16 %v2809_v62  ;;  %v6435_v48 = vld [vmem:[#allocation33_spill] sm:$0xff] }
 0x513   : > { %v2817_v38 = vpack.c.bf16 %v2799_v54, %v2798_v17  ;;  %v2800_v0 = vmul.f32 %v6434_v14, %v2751_v32  ;;  %v2801_v40 = vmul.f32 %v6435_v48, %v2751_v32  ;;  %v2786_v49 = vmul.f32 %v6436_v15, %v2723_v12 }
 0x514   : > { %v2810_v22 = vpack.c.bf16 %v2785_v42, %v2784_v13  ;;  %v2787_v18 = vmul.f32 %v6437_v8, %v2723_v12  ;;  %v2755_v30 = vrot.slane %v5864_v58, %v6433_v27  ;;  %v6440_v58 = vmov 0.0  }
 0x515   : > { %v2869_v63 = vunpack.c.h.b16 %v2817_v38  ;;  %v2868_v23 = vunpack.c.l.b16 %v2817_v38  ;;  %3982 = vmatprep.mubr.msk.bf16.mxu0 %vm4600_vm10, %v6440_v58 }
 0x516   : > { %2890 = vperm.xlu0 %4262, %v2847_v6   ;;  %2887 = vperm.xlu1 %4263, %v2846_v53   ;;  %v2855_v46 = vunpack.c.h.b16 %v2810_v22  ;;  %v2854_v6 = vunpack.c.l.b16 %v2810_v22  ;;  %v2818_v53 = vpack.c.bf16 %v2801_v40, %v2800_v0  ;;  %v2811_v5 = vpack.c.bf16 %v2787_v18, %v2786_v49 }
 0x518   : > { %v2871_v61 = vunpack.c.h.b16 %v2818_v53  ;;  %v2870_v21 = vunpack.c.l.b16 %v2818_v53  ;;  %v2856_v45 = vunpack.c.l.b16 %v2811_v5 }
 0x51a   : > { %2938 = vperm.xlu0 %4262, %v2863_v20   ;;  %2935 = vperm.xlu1 %4263, %v2862_v50   ;;  %v2802_v20 = vmul.f32 %v6438_v16, %v2755_v30  ;;  %v6439_v50 = vld [vmem:[#allocation37_spill] sm:$0xff] }
 0x51b   : > { %v2803_v1 = vmul.f32 %v6439_v50, %v2755_v30 }
 0x51e   : > { %2896 = vperm.xlu0 %4262, %v2849_v59   ;;  %2893 = vperm.xlu1 %4263, %v2848_v51   ;;  %v2857_v59 = vunpack.c.h.b16 %v2811_v5  ;;  %v2819_v51 = vpack.c.bf16 %v2803_v1, %v2802_v20 }
 0x520   : > { %v2873_v31 = vunpack.c.h.b16 %v2819_v51  ;;  %v2872_v2 = vunpack.c.l.b16 %v2819_v51 }
 0x522   : > { %2944 = vperm.xlu0 %4262, %v2865_v60   ;;  %2941 = vperm.xlu1 %4263, %v2864_v33  }
 0x526   : > { %2902 = vperm.xlu0 %4262, %v2851_v3   ;;  %2899 = vperm.xlu1 %4263, %v2850_v55  }
 0x52a   : > { %2950 = vperm.xlu0 %4262, %v2867_v44   ;;  %2947 = vperm.xlu1 %4263, %v2866_v4  }
 0x52e   : > { %2908 = vperm.xlu0 %4262, %v2853_v29   ;;  %2905 = vperm.xlu1 %4263, %v2852_v7  }
 0x532   : > { %2956 = vperm.xlu0 %4262, %v2869_v63   ;;  %2953 = vperm.xlu1 %4263, %v2868_v23  }
 0x536   : > { %2914 = vperm.xlu0 %4262, %v2855_v46   ;;  %2911 = vperm.xlu1 %4263, %v2854_v6  }
 0x53a   : > { %2962 = vperm.xlu0 %4262, %v2871_v61   ;;  %2959 = vperm.xlu1 %4263, %v2870_v21  }
 0x53e   : > { %2920 = vperm.xlu0 %4262, %v2857_v59   ;;  %2917 = vperm.xlu1 %4263, %v2856_v45  }
 0x542   : > { %2968 = vperm.xlu0 %4262, %v2873_v31   ;;  %2965 = vperm.xlu1 %4263, %v2872_v2  }
 0x585   : > { %v2879_v35 = vpop.permute.xlu1 %2878  ;;  %v2876_v60 = vpop.permute.xlu0 %2875 }
 0x586   : > { %v2977_v57 = vrot.slane %v2879_v35, %v5541_v25  ;;  %v2973_v42 = vrot.slane %v2876_v60, %v5544_v19 }
 0x588   : > { %v2978_v15 = vsel %vm2048_vm2, %v2977_v57, %v2973_v42 }
 0x589   : > { %v2882_v39 = vpop.permute.xlu1 %2881  ;;  %v2885_v33 = vpop.permute.xlu0 %2884 }
 0x58a   : > { %v2982_v36 = vrot.slane %v2882_v39, %v5544_v19  ;;  %v2986_v13 = vrot.slane %v2885_v33, %v5541_v25 }
 0x58c   : > { %v2987_v23 = vsel %vm2048_vm2, %v2986_v13, %v2982_v36 }
 0x58d   : > { %v2924_v43 = vpop.permute.xlu1 %2923  ;;  %v2927_v24 = vpop.permute.xlu0 %2926  ;;  %v3114_v49 = vsel %vm2185_vm3, %v2987_v23, %v2978_v15 }
 0x58e   : > { %v3045_v29 = vrot.slane %v2924_v43, %v5544_v19  ;;  %v3049_v7 = vrot.slane %v2927_v24, %v5541_v25 }
 0x590   : > { %v3050_v8 = vsel %vm2048_vm2, %v3049_v7, %v3045_v29 }
 0x591   : > { %v2930_v56 = vpop.permute.xlu1 %2929  ;;  %v2933_v34 = vpop.permute.xlu0 %2932 }
 0x592   : > { %v3054_v38 = vrot.slane %v2930_v56, %v5544_v19  ;;  %v3058_v32 = vrot.slane %v2933_v34, %v5541_v25 }
 0x594   : > { %v3059_v18 = vsel %vm2048_vm2, %v3058_v32, %v3054_v38 }
 0x595   : > { %v2888_v52 = vpop.permute.xlu1 %2887  ;;  %v2891_v26 = vpop.permute.xlu0 %2890 }
 0x596   : > { %v2991_v22 = vrot.slane %v2888_v52, %v5544_v19  ;;  %v2995_v27 = vrot.slane %v2891_v26, %v5541_v25  ;;  %v3121_v52 = vsel %vm2185_vm3, %v3059_v18, %v3050_v8 }
 0x598   : > { %v2996_v46 = vsel %vm2048_vm2, %v2995_v27, %v2991_v22 }
 0x599   : > { %v2936_v37 = vpop.permute.xlu1 %2935  ;;  %v2939_v3 = vpop.permute.xlu0 %2938  ;;  %v3115_v26 = vsel %vm2187_vm4, %v2996_v46, %v3114_v49 }
 0x59a   : > { %v3063_v14 = vrot.slane %v2936_v37, %v5544_v19  ;;  %v3067_v0 = vrot.slane %v2939_v3, %v5541_v25 }
 0x59c   : > { %v3068_v16 = vsel %vm2048_vm2, %v3067_v0, %v3063_v14 }
 0x59d   : > { %v2894_v55 = vpop.permute.xlu1 %2893  ;;  %v2897_v41 = vpop.permute.xlu0 %2896  ;;  %v3122_v3 = vsel %vm2187_vm4, %v3068_v16, %v3121_v52 }
 0x59e   : > { %v3000_v48 = vrot.slane %v2894_v55, %v5544_v19  ;;  %v3004_v40 = vrot.slane %v2897_v41, %v5541_v25 }
 0x5a0   : > { %v3005_v20 = vsel %vm2048_vm2, %v3004_v40, %v3000_v48 }
 0x5a1   : > { %v2942_v47 = vpop.permute.xlu1 %2941  ;;  %v2945_v62 = vpop.permute.xlu0 %2944  ;;  %v3116_v55 = vsel %vm2189_vm5, %v3005_v20, %v3115_v26 }
 0x5a2   : > { %v3072_v30 = vrot.slane %v2942_v47, %v5544_v19  ;;  %v3076_v5 = vrot.slane %v2945_v62, %v5541_v25 }
 0x5a4   : > { %v3077_v43 = vsel %vm2048_vm2, %v3076_v5, %v3072_v30 }
 0x5a5   : > { %v2900_v11 = vpop.permute.xlu1 %2899  ;;  %v2903_v10 = vpop.permute.xlu0 %2902  ;;  %v3123_v62 = vsel %vm2189_vm5, %v3077_v43, %v3122_v3 }
 0x5a6   : > { %v3009_v61 = vrot.slane %v2900_v11, %v5544_v19  ;;  %v3013_v21 = vrot.slane %v2903_v10, %v5541_v25 }
 0x5a8   : > { %v3014_v24 = vsel %vm2048_vm2, %v3013_v21, %v3009_v61 }
 0x5a9   : > { %v2948_v44 = vpop.permute.xlu1 %2947  ;;  %v2951_v4 = vpop.permute.xlu0 %2950  ;;  %v3117_v11 = vsel %vm2191_vm6, %v3014_v24, %v3116_v55 }
 0x5aa   : > { %v3081_v50 = vrot.slane %v2948_v44, %v5544_v19  ;;  %v3085_v1 = vrot.slane %v2951_v4, %v5541_v25 }
 0x5ac   : > { %v3086_v37 = vsel %vm2048_vm2, %v3085_v1, %v3081_v50 }
 0x5ad   : > { %v2906_v9 = vpop.permute.xlu1 %2905  ;;  %v2909_v17 = vpop.permute.xlu0 %2908 }
 0x5ae   : > { %v3018_v59 = vrot.slane %v2906_v9, %v5544_v19  ;;  %v3022_v45 = vrot.slane %v2909_v17, %v5541_v25  ;;  %v3124_v17 = vsel %vm2191_vm6, %v3086_v37, %v3123_v62 }
 0x5b0   : > { %v3023_v41 = vsel %vm2048_vm2, %v3022_v45, %v3018_v59 }
 0x5b1   : > { %v2954_v28 = vpop.permute.xlu1 %2953  ;;  %v2957_v54 = vpop.permute.xlu0 %2956  ;;  %v3118_v13 = vsel %vm2193_vm7, %v3023_v41, %v3117_v11  ;;  %v3870_v41 = vld [vmem:[%s686_s19] ss:$0 sm:$0xff] (!%p3178_p0) }
 0x5b2   : > { %v3090_v51 = vrot.slane %v2954_v28, %v5544_v19  ;;  %v3094_v31 = vrot.slane %v2957_v54, %v5541_v25 }
 0x5b4   : > { %v3095_v47 = vsel %vm2048_vm2, %v3094_v31, %v3090_v51 }
 0x5b5   : > { %v2912_v12 = vpop.permute.xlu1 %2911  ;;  %v2915_v63 = vpop.permute.xlu0 %2914  ;;  %v3125_v57 = vsel %vm2193_vm7, %v3095_v47, %v3124_v17 }
 0x5b6   : > { %v3027_v2 = vrot.slane %v2912_v12, %v5544_v19  ;;  %v3031_v58 = vrot.slane %v2915_v63, %v5541_v25 }
 0x5b8   : > { %v3032_v10 = vsel %vm2048_vm2, %v3031_v58, %v3027_v2 }
 0x5b9   : > { %v2960_v6 = vpop.permute.xlu1 %2959  ;;  %v2963_v53 = vpop.permute.xlu0 %2962  ;;  %v3119_v42 = vsel %vm2195_vm8, %v3032_v10, %v3118_v13 }
 0x5ba   : > { %v3099_v35 = vrot.slane %v2960_v6, %v5544_v19  ;;  %v3103_v60 = vrot.slane %v2963_v53, %v5541_v25 }
 0x5bc   : > { %v3104_v44 = vsel %vm2048_vm2, %v3103_v60, %v3099_v35 }
 0x5bd   : > { %v2918_v39 = vpop.permute.xlu1 %2917  ;;  %v2921_v33 = vpop.permute.xlu0 %2920  ;;  %v3126_v29 = vsel %vm2195_vm8, %v3104_v44, %v3125_v57  ;;  %v3871_v44 = vld [vmem:[%s689_s3] ss:$0 sm:$0xff] (!%p3178_p0) }
 0x5be   : > { %v3036_v56 = vrot.slane %v2918_v39, %v5544_v19  ;;  %v3040_v34 = vrot.slane %v2921_v33, %v5541_v25 }
 0x5c0   : > { %v3041_v28 = vsel %vm2048_vm2, %v3040_v34, %v3036_v56 }
 0x5c1   : > { %v2966_v4 = vpop.permute.xlu1 %2965  ;;  %v2969_v9 = vpop.permute.xlu0 %2968  ;;  %v3120_v38 = vsel %vm2197_vm9, %v3041_v28, %v3119_v42 }
 0x5c2   : > { %v3108_v54 = vrot.slane %v2966_v4, %v5544_v19  ;;  %v3112_v36 = vrot.slane %v2969_v9, %v5541_v25  ;;  %v3868_v25 = vld [vmem:[%s683_s23] ss:$0 sm:$0xff] }
 0x5c4   : > { %v3113_v7 = vsel %vm2048_vm2, %v3112_v36, %v3108_v54 }
 0x5c5   : > { %v3127_v32 = vsel %vm2197_vm9, %v3113_v7, %v3126_v29 }
 0x5c6   : > { %v3128_v22 = vpack.c.b16 %v3127_v32, %v3120_v38 }
 0x5c8   : > { %3983 = vmatmul.mubr.msk.bf16.vlgmr.msra.gmra.mrb[8].mxu0 %vm979_vm0, %v3128_v22 }
 0x69a   : > { %3181 = sbr.rel (%p3178_p0) target bundleno = 1754 (0x6da), region = 92 }
 0x69b   : > { %v3166_v19 = vpop.f32.mrb[8].mxu0 }
 0x69c   : > { %v3167_v27 = vadd.f32 %v3868_v25, %v3166_v19  ;;  %v3984_v12 = vpop.f32.mrb[9].mxu0 }
 0x69d   : > { %v3169_v63 = vpop.f32.mrb[10].mxu0 }
 0x69e   : > { %3174 = vst [vmem:[%s3173_s26] sm:$0xff] %v3167_v27  ;;  %v3170_v23 = vadd.f32 %v3868_v25, %v3169_v63  ;;  %v3985_v14 = vpop.f32.mrb[11].mxu0 }
 0x6a0   : > { %3175 = vst [vmem:[%s3173_s26 + $0x8] sm:$0xff] %v3170_v23 }
 0x6a7   : > { %v3182_v0 = vld [vmem:[#allocation3] sm:$0xff]  ;;  %v3183_v48 = vld [vmem:[#allocation3 + $0x8] sm:$0xff]  ;;  %v3184_v40 = vld [vmem:[#allocation3 + $0x10] sm:$0xff] }
 0x6a8   : > { %v3185_v15 = vld [vmem:[#allocation3 + $0x18] sm:$0xff]  ;;  %v3186_v49 = vadd.f32 %v3183_v48, %v3182_v0  ;;  %v3195_v8 = vmul.f32 %v3182_v0, %v3182_v0  ;;  %v3196_v18 = vmul.f32 %v3183_v48, %v3183_v48  ;;  %v3197_v46 = vmul.f32 %v3184_v40, %v3184_v40 }
 0x6a9   : > { %v3198_v53 = vmul.f32 %v3185_v15, %v3185_v15 }
 0x6aa   : > { %v3187_v6 = vadd.f32 %v3186_v49, %v3184_v40  ;;  %v3199_v30 = vadd.f32 %v3196_v18, %v3195_v8 }
 0x6ac   : > { %v3188_v5 = vadd.f32 %v3187_v6, %v3185_v15  ;;  %v3200_v61 = vadd.f32 %v3199_v30, %v3197_v46 }
 0x6ae   : > { %v3189_v21 = vrot.slane %v3188_v5, 4  ;;  %v3201_v16 = vadd.f32 %v3200_v61, %v3198_v53 }
 0x6b0   : > { %v3190_v20 = vadd.f32 %v3189_v21, %v3188_v5  ;;  %v3202_v50 = vrot.slane %v3201_v16, 4 }
 0x6b2   : > { %v3191_v1 = vrot.slane %v3190_v20, 2  ;;  %v3203_v59 = vadd.f32 %v3202_v50, %v3201_v16 }
 0x6b4   : > { %v3192_v45 = vadd.f32 %v3191_v1, %v3190_v20  ;;  %v3204_v51 = vrot.slane %v3203_v59, 2 }
 0x6b6   : > { %v3193_v31 = vrot.slane %v3192_v45, 1  ;;  %v3205_v2 = vadd.f32 %v3204_v51, %v3203_v59 }
 0x6b8   : > { %v3194_v58 = vadd.f32 %v3193_v31, %v3192_v45  ;;  %v3206_v35 = vrot.slane %v3205_v2, 1 }
 0x6ba   : > { %v3207_v60 = vadd.f32 %v3206_v35, %v3205_v2  ;;  %v3208_v39 = vmul.f32 0.03125, %v3194_v58 }
 0x6bc   : > { %v3209_v33 = vmul.f32 0.03125, %v3207_v60  ;;  %v3210_v43 = vmul.f32 %v3208_v39, %v3208_v39  ;;  %v3213_v52 = vsub.f32 %v3182_v0, %v3208_v39  ;;  %v3214_v26 = vsub.f32 %v3183_v48, %v3208_v39 }
 0x6bd   : > { %v3215_v37 = vsub.f32 %v3184_v40, %v3208_v39  ;;  %v3216_v3 = vsub.f32 %v3185_v15, %v3208_v39 }
 0x6be   : > { %v3211_v24 = vsub.f32 %v3209_v33, %v3210_v43 }
 0x6c0   : > { %v3212_v56 = vmax.f32 %v3211_v24, 0.0 }
 0x6c2   : > { %v3217_v34 = vadd.f32 1e-05, %v3212_v56 }
 0x6c4   : > { %4373 = vrsqrt.f32 %v3217_v34 }
 0x6ce   : > { %v4374_v55 = vpop.eup %4373 }
 0x6cf   : > { %v3219_v47 = vmul.f32 %v4374_v55, %v3213_v52  ;;  %v3220_v62 = vmul.f32 %v4374_v55, %v3214_v26  ;;  %v3221_v11 = vmul.f32 %v4374_v55, %v3215_v37  ;;  %v3222_v10 = vmul.f32 %v4374_v55, %v3216_v3 }
 0x6d1   : > { %v3230_v4 = vmul.f32 %v3870_v41, %v3219_v47  ;;  %v3231_v9 = vmul.f32 %v3870_v41, %v3220_v62  ;;  %v3232_v17 = vmul.f32 %v3870_v41, %v3221_v11  ;;  %v3233_v28 = vmul.f32 %v3870_v41, %v3222_v10 }
 0x6d3   : > { %v3241_v54 = vadd.f32 %v3871_v44, %v3230_v4  ;;  %v3242_v36 = vadd.f32 %v3871_v44, %v3231_v9  ;;  %v3243_v13 = vadd.f32 %v3871_v44, %v3232_v17  ;;  %v3244_v57 = vadd.f32 %v3871_v44, %v3233_v28 }
 0x6d5   : > { %vm3245_vm0 = vcmp.gt.f32.partialorder %v3241_v54, 0.0  ;;  %v3249_v42 = vmul.f32 0.01, %v3241_v54  ;;  %vm3246_vm11 = vcmp.gt.f32.partialorder %v3242_v36, 0.0  ;;  %v3250_v29 = vmul.f32 0.01, %v3242_v36 }
 0x6d6   : > { %vm3247_vm12 = vcmp.gt.f32.partialorder %v3243_v13, 0.0  ;;  %v3251_v7 = vmul.f32 0.01, %v3243_v13  ;;  %vm3248_vm13 = vcmp.gt.f32.partialorder %v3244_v57, 0.0  ;;  %v3252_v38 = vmul.f32 0.01, %v3244_v57 }
 0x6d7   : > { %v3253_v32 = vsel %vm3245_vm0, %v3241_v54, %v3249_v42  ;;  %v3254_v22 = vsel %vm3246_vm11, %v3242_v36, %v3250_v29 }
 0x6d8   : > { %3257 = vst [vmem:[#allocation2] sm:$0xff] %v3253_v32  ;;  %3258 = vst [vmem:[#allocation2 + $0x8] sm:$0xff] %v3254_v22  ;;  %v3255_v25 = vsel %vm3247_vm12, %v3243_v13, %v3251_v7  ;;  %v3256_v19 = vsel %vm3248_vm13, %v3244_v57, %v3252_v38 }
 0x6d9   : > { %3259 = vst [vmem:[#allocation2 + $0x10] sm:$0xff] %v3255_v25  ;;  %3260 = vst [vmem:[#allocation2 + $0x18] sm:$0xff] %v3256_v19 }
 0x6da PF: > { %p3261_p1 = scmp.eq.s32.totalorder %s4577_s25, 5 }
 0x6dc   : > { %p3262_p4 = pnand %p3261_p1, %p3176_p9 }
 0x6dd   : > { %s6444_s21 = sld [smem:[#allocation49_spill]] (!%p3262_p4)  ;;  %v4601_v23 = vmov (!%p3262_p4), 0.0|0.0   ;;  %vm4602_vm14 = vmmov (!%p3262_p4), 0   ;;  %v4603_v18 = vmov (!%p3262_p4), 0.0   ;;  %s6446_s1 = sld [smem:[#allocation51_spill]] (!%p3262_p4)  ;;  %vm3492_vm1 = vcmask (!%p3262_p4), 517120  }
 0x6de   : > { %3265 = sbr.rel (%p3262_p4) target bundleno = 2233 (0x8b9), region = 96  ;;  %4075 = vmatprep.subr.bf16.mxu0 (!%p3262_p4), %v4601_v23  ;;  %4099 = vmatprep.subr.bf16.mxu1 (!%p3262_p4), %v4601_v23  ;;  %s6447_s3 = sld [smem:[#allocation50_spill]] (!%p3262_p4)  ;;  %vm3509_vm2 = vcmask (!%p3262_p4), 523264  }
 0x6df   : > { %4018 = vmatprep.mubr.msk.f32.mxu0 (!%p3262_p4), %vm4602_vm14, %v4603_v18  ;;  %4053 = vmatprep.mubr.msk.f32.mxu1 (!%p3262_p4), %vm4602_vm14, %v4603_v18  ;;  %s6448_s15 = sld [smem:[#allocation52_spill]] (!%p3262_p4) }
 0x6e0   : > { %v3266_v51 = vld [vmem:[#allocation3] sm:$0xff] (!%p3262_p4)  ;;  %v3267_v58 = vld [vmem:[#allocation3 + $0x8] sm:$0xff] (!%p3262_p4)  ;;  %v3268_v35 = vld [vmem:[#allocation3 + $0x10] sm:$0xff] (!%p3262_p4) }
 0x6e1   : > { %v3269_v60 = vld [vmem:[#allocation3 + $0x18] sm:$0xff] (!%p3262_p4)  ;;  %v3287_v24 = vmax.f32 (!%p3262_p4), %v3266_v51, %v3267_v58  ;;  %v3270_v34 = vadd.f32 (!%p3262_p4), %v3267_v58, %v3266_v51 }
 0x6e2   : > { %v3294_v56 = vmax.f32 (!%p3262_p4), %v3268_v35, %v3269_v60  ;;  %v3277_v52 = vadd.f32 (!%p3262_p4), %v3269_v60, %v3268_v35 }
 0x6e3   : > { %s6445_s7 = smov (!%p3262_p4), %s6444_s21  ;;  %v3317_v27 = vld [vmem:[%s6444_s21 + $0x80] sm:$0xff] (!%p3262_p4)  ;;  %v3288_v26 = vrot.slane (!%p3262_p4), %v3287_v24, 4  ;;  %v3271_v3 = vrot.slane (!%p3262_p4), %v3270_v34, 4  ;;  %v3497_v58 = vld [vmem:[%s6446_s1 + $0x18] sm:$0xff] (!%p3262_p4) }
 0x6e4   : > { %v3318_v12 = vld [vmem:[%s6445_s7 + $0x88] sm:$0xff] (!%p3262_p4)  ;;  %v3301_v63 = vld [vmem:[%s6445_s7] sm:$0xff] (!%p3262_p4)  ;;  %v3319_v48 = vld [vmem:[%s6445_s7 + $0x90] sm:$0xff] (!%p3262_p4)  ;;  %v3295_v37 = vrot.slane (!%p3262_p4), %v3294_v56, 4  ;;  %v3278_v62 = vrot.slane (!%p3262_p4), %v3277_v52, 4 }
 0x6e5   : > { %v4076_v14 = vpack.c.bf16 %v3318_v12, %v3317_v27  ;;  %v3302_v0 = vld [vmem:[%s6445_s7 + $0x8] sm:$0xff]  ;;  %v3320_v40 = vld [vmem:[%s6445_s7 + $0x98] sm:$0xff]  ;;  %v3303_v49 = vld [vmem:[%s6445_s7 + $0x10] sm:$0xff]  ;;  %v3289_v4 = vmax.f32 %v3287_v24, %v3288_v26  ;;  %v3272_v17 = vadd.f32 %v3271_v3, %v3270_v34 }
 0x6e6   : > { %v4100_v15 = vpack.c.bf16 %v3302_v0, %v3301_v63  ;;  %v3304_v8 = vld [vmem:[%s6445_s7 + $0x18] sm:$0xff]  ;;  %v4079_v46 = vpack.c.bf16 %v3320_v40, %v3319_v48  ;;  %v3321_v53 = vld [vmem:[%s6445_s7 + $0xa0] sm:$0xff]  ;;  %v3322_v30 = vld [vmem:[%s6445_s7 + $0xa8] sm:$0xff]  ;;  %v3296_v9 = vmax.f32 %v3294_v56, %v3295_v37  ;;  %v3279_v28 = vadd.f32 %v3278_v62, %v3277_v52 }
 0x6e7   : > { %4077 = vmatpush3.bf16.msra.mxu0 %v4076_v14  ;;  %v4103_v6 = vpack.c.bf16 %v3304_v8, %v3303_v49  ;;  %v3305_v5 = vld [vmem:[%s6445_s7 + $0x20] sm:$0xff]  ;;  %v3306_v61 = vld [vmem:[%s6445_s7 + $0x28] sm:$0xff]  ;;  %v4082_v21 = vpack.c.bf16 %v3322_v30, %v3321_v53  ;;  %v3323_v16 = vld [vmem:[%s6445_s7 + $0xb0] sm:$0xff]  ;;  %v3290_v54 = vrot.slane %v3289_v4, 2  ;;  %v3273_v13 = vrot.slane %v3272_v17, 2 }
 0x6e8   : > { %4101 = vmatpush3.bf16.msra.mxu1 %v4100_v15  ;;  %4078 = vmatprep.subr.bf16.mxu0 %v4601_v23  ;;  %v4106_v20 = vpack.c.bf16 %v3306_v61, %v3305_v5  ;;  %v3324_v50 = vld [vmem:[%s6445_s7 + $0xb8] sm:$0xff]  ;;  %v3307_v1 = vld [vmem:[%s6445_s7 + $0x30] sm:$0xff]  ;;  %v3325_v45 = vld [vmem:[%s6445_s7 + $0xc0] sm:$0xff]  ;;  %v3297_v36 = vrot.slane %v3296_v9, 2  ;;  %v3280_v29 = vrot.slane %v3279_v28, 2 }
 0x6e9   : > { %4102 = vmatprep.subr.bf16.mxu1 %v4601_v23  ;;  %v3308_v59 = vld [vmem:[%s6445_s7 + $0x38] sm:$0xff]  ;;  %v4085_v31 = vpack.c.bf16 %v3324_v50, %v3323_v16  ;;  %v3326_v39 = vld [vmem:[%s6445_s7 + $0xc8] sm:$0xff]  ;;  %v3309_v33 = vld [vmem:[%s6445_s7 + $0x40] sm:$0xff]  ;;  %v3291_v32 = vmax.f32 %v3289_v4, %v3290_v54  ;;  %v3274_v25 = vadd.f32 %v3273_v13, %v3272_v17 }
 0x6ea   : > { %v4109_v2 = vpack.c.bf16 %v3308_v59, %v3307_v1  ;;  %v3310_v43 = vld [vmem:[%s6445_s7 + $0x48] sm:$0xff]  ;;  %v4088_v55 = vpack.c.bf16 %v3326_v39, %v3325_v45  ;;  %v3327_v47 = vld [vmem:[%s6445_s7 + $0xd0] sm:$0xff]  ;;  %v3328_v11 = vld [vmem:[%s6445_s7 + $0xd8] sm:$0xff]  ;;  %v3298_v22 = vmax.f32 %v3296_v9, %v3297_v36  ;;  %v3281_v12 = vadd.f32 %v3280_v29, %v3279_v28 }
 0x6eb   : > { %4080 = vmatpush3.bf16.msra.mxu0 %v4079_v46  ;;  %v4112_v41 = vpack.c.bf16 %v3310_v43, %v3309_v33  ;;  %v3311_v10 = vld [vmem:[%s6445_s7 + $0x50] sm:$0xff]  ;;  %v3312_v44 = vld [vmem:[%s6445_s7 + $0x58] sm:$0xff]  ;;  %v4091_v57 = vpack.c.bf16 %v3328_v11, %v3327_v47  ;;  %v3329_v7 = vld [vmem:[%s6445_s7 + $0xe0] sm:$0xff]  ;;  %v3275_v63 = vrot.slane %v3274_v25, 1  ;;  %v3292_v0 = vrot.slane %v3291_v32, 1 }
 0x6ec   : > { %4104 = vmatpush3.bf16.msra.mxu1 %v4103_v6  ;;  %4081 = vmatprep.subr.bf16.mxu0 %v4601_v23  ;;  %v4115_v42 = vpack.c.bf16 %v3312_v44, %v3311_v10  ;;  %v3330_v38 = vld [vmem:[%s6445_s7 + $0xe8] sm:$0xff]  ;;  %v3313_v19 = vld [vmem:[%s6445_s7 + $0x60] sm:$0xff]  ;;  %v3299_v48 = vrot.slane %v3298_v22, 1  ;;  %v3282_v40 = vrot.slane %v3281_v12, 1  ;;  %v3331_v49 = vld [vmem:[%s6445_s7 + $0xf0] sm:$0xff] }
 0x6ed   : > { %4105 = vmatprep.subr.bf16.mxu1 %v4601_v23  ;;  %v3314_v27 = vld [vmem:[%s6445_s7 + $0x68] sm:$0xff]  ;;  %v4094_v14 = vpack.c.bf16 %v3330_v38, %v3329_v7  ;;  %v3332_v8 = vld [vmem:[%s6445_s7 + $0xf8] sm:$0xff]  ;;  %v3276_v46 = vadd.f32 %v3275_v63, %v3274_v25  ;;  %v3315_v6 = vld [vmem:[%s6445_s7 + $0x70] sm:$0xff]  ;;  %v3293_v61 = vmax.f32 %v3291_v32, %v3292_v0 }
 0x6ee   : > { %v4118_v15 = vpack.c.bf16 %v3314_v27, %v3313_v19  ;;  %v3316_v53 = vld [vmem:[%s6445_s7 + $0x78] sm:$0xff]  ;;  %v3283_v30 = vadd.f32 %v3282_v40, %v3281_v12  ;;  %v4097_v5 = vpack.c.bf16 %v3332_v8, %v3331_v49  ;;  %v3494_v1 = vld [vmem:[%s6446_s1] sm:$0xff]  ;;  %v3495_v59 = vld [vmem:[%s6446_s1 + $0x8] sm:$0xff] }
 0x6ef   : > { %4083 = vmatpush3.bf16.msra.mxu0 %v4082_v21  ;;  %v3300_v21 = vmax.f32 %v3298_v22, %v3299_v48  ;;  %v4121_v16 = vpack.c.bf16 %v3316_v53, %v3315_v6  ;;  %v4124_v51 = vpack.c.bf16 %v3495_v59, %v3494_v1  ;;  %v3498_v60 = vld [vmem:[%s6446_s1 + $0x20] sm:$0xff]  ;;  %v3499_v39 = vld [vmem:[%s6446_s1 + $0x28] sm:$0xff]  ;;  %v3500_v43 = vld [vmem:[%s6446_s1 + $0x30] sm:$0xff] }
 0x6f0   : > { %4107 = vmatpush3.bf16.msra.mxu1 %v4106_v20  ;;  %4084 = vmatprep.subr.bf16.mxu0 %v4601_v23  ;;  %v3285_v20 = vmul.f32 0.0625, %v3276_v46  ;;  %v3286_v50 = vmul.f32 0.0625, %v3283_v30  ;;  %v4130_v33 = vpack.c.bf16 %v3499_v39, %v3498_v60  ;;  %v3872_v52 = vld [vmem:[%s6447_s3] ss:$0 sm:$0xff] }
 0x6f1   : > { %4108 = vmatprep.subr.bf16.mxu1 %v4601_v23  ;;  %v3335_v45 = vsel %vm2185_vm3, %v3300_v21, %v3293_v61  ;;  %v3873_v47 = vld [vmem:[%s6448_s15] ss:$0 sm:$0xff] }
 0x6f3   : > { %4086 = vmatpush3.bf16.msra.mxu0 %v4085_v31  ;;  %v3409_v31 = vsel %vm2185_vm3, %v3286_v50, %v3285_v20  ;;  %vm3583_vm3 = vcmask 17408  }
 0x6f4   : > { %4110 = vmatpush3.bf16.msra.mxu1 %v4109_v2  ;;  %4087 = vmatprep.subr.bf16.mxu0 %v4601_v23  ;;  %v3496_v2 = vld [vmem:[%s6446_s1 + $0x10] sm:$0xff] }
 0x6f5   : > { %4111 = vmatprep.subr.bf16.mxu1 %v4601_v23  ;;  %v4127_v35 = vpack.c.bf16 %v3497_v58, %v3496_v2 }
 0x6f7   : > { %4089 = vmatpush3.bf16.msra.mxu0 %v4088_v55 }
 0x6f8   : > { %4113 = vmatpush3.bf16.msra.mxu1 %v4112_v41  ;;  %4090 = vmatprep.subr.bf16.mxu0 %v4601_v23 }
 0x6f9   : > { %4114 = vmatprep.subr.bf16.mxu1 %v4601_v23 }
 0x6fb   : > { %4092 = vmatpush3.bf16.msra.mxu0 %v4091_v57 }
 0x6fc   : > { %4116 = vmatpush3.bf16.msra.mxu1 %v4115_v42  ;;  %4093 = vmatprep.subr.bf16.mxu0 %v4601_v23 }
 0x6fd   : > { %4117 = vmatprep.subr.bf16.mxu1 %v4601_v23 }
 0x6ff   : > { %4095 = vmatpush3.bf16.msra.mxu0 %v4094_v14 }
 0x700   : > { %4119 = vmatpush3.bf16.msra.mxu1 %v4118_v15  ;;  %4096 = vmatprep.subr.bf16.mxu0 %v4601_v23 }
 0x701   : > { %4120 = vmatprep.subr.bf16.mxu1 %v4601_v23 }
 0x703   : > { %4098 = vmatpush3.bf16.msra.mxu0 %v4097_v5 }
 0x704   : > { %4122 = vmatpush3.bf16.msra.mxu1 %v4121_v16  ;;  %4123 = vmatprep.subr.bf16.mxu0 %v4601_v23 }
 0x706   : > { %4019 = vmatmul.mubr.f32.vlgmr.msra.gmra.mrb[0].mxu0 %v3335_v45 }
 0x707   : > { %4054 = vmatmul.mubr.f32.vlgmr.msra.gmra.mrb[0].mxu1 %v3409_v31  ;;  %4125 = vmatpush3.bf16.msra.mxu0 %v4124_v51 }
 0x708   : > { %4126 = vmatprep.subr.bf16.mxu0 %v4601_v23  ;;  %4072 = vmatprep.mubr.msk.f32.mxu0 %vm4602_vm14, %v4603_v18  ;;  %v3501_v18 = vld [vmem:[%s6446_s1 + $0x38] sm:$0xff] }
 0x709   : > { %v4133_v24 = vpack.c.bf16 %v3501_v18, %v3500_v43 }
 0x70b   : > { %4128 = vmatpush3.bf16.msra.mxu0 %v4127_v35 }
 0x70c   : > { %4129 = vmatprep.subr.bf16.mxu0 %v4601_v23 }
 0x70f   : > { %4131 = vmatpush3.bf16.msra.mxu0 %v4130_v33 }
 0x710   : > { %4132 = vmatprep.subr.bf16.mxu0 %v4601_v23 }
 0x713   : > { %4134 = vmatpush3.bf16.msra.mxu0 %v4133_v24 }
 0x7d9   : > { %v3403_v56 = vpop.f32.mrb[0].mxu0 }
 0x7da   : > { %v3477_v34 = vpop.f32.mrb[0].mxu1  ;;  %v4020_v26 = vpop.f32.mrb[1].mxu0 }
 0x7db   : > { %v3478_v37 = vadd.f32 %v3477_v34, %v3403_v56  ;;  %v4055_v3 = vpop.f32.mrb[1].mxu1 }
 0x7dd   : > { %v3488_v23 = vadd.f32 %v3872_v52, %v3478_v37 }
 0x7df   : > { %vm3489_vm15 = vcmp.gt.f32.partialorder %v3488_v23, 0.0  ;;  %v3490_v55 = vmul.f32 0.01, %v3488_v23 }
 0x7e1   : > { %v3491_v41 = vsel %vm3489_vm15, %v3488_v23, %v3490_v55 }
 0x7e2   : > { %3493 = vst.msk [vmem:[#allocation10] sm:$0x3] %vm3492_vm1, %v3491_v41  ;;  %4073 = vmatmul.mubr.msk.f32.vlgmr.msra.gmra.mrb[2].mxu0 %vm3509_vm2, %v3491_v41 }
 0x8b5   : > { %v3579_v62 = vpop.f32.mrb[2].mxu0 }
 0x8b6   : > { %v3580_v11 = vadd.f32 %v3873_v47, %v3579_v62  ;;  %v4074_v10 = vpop.f32.mrb[3].mxu0 }
 0x8b8   : > { %3584 = vst.msk [vmem:[#allocation9] sm:$0x3] %vm3583_vm3, %v3580_v11 }
 0x8b9 PF: > { %s6449_s13 = sadd.s32 4294967295, %s4589_s28   ;;  %s4604_s11 = smov [#allocation9]  }
 0x8ba   : > { %p6166_p5 = scmp.eq.s32.totalorder %s6449_s13, 11  ;;  %s3592_s24 = sshll.u32 %s4604_s11, 4  ;;  %s3593_s24 = int_to_ptr.vmem [resolvable:$true] %s3592_s24 }
 0x8bb   : > { %s4605_s25 = smov [#allocation10]   ;;  %s4435_s30 = scalar_lea.vmem %s3593_s24, 32 }
 0x8bc   : > { %s3603_s17 = sshll.u32 %s4605_s25, 4  ;;  %p4436_p11 = scmp.ne.s32.totalorder %s3593_s24, %s4435_s30  ;;  %s6170_s17 = int_to_ptr.vmem [resolvable:$true] %s3603_s17 }
 0x8bd   : > { %p4442_p12 = scmp.lt.s32.totalorder %s3593_s24, %s3593_s24  ;;  %p4443_p7 = scmp.lt.s32.totalorder %s4435_s30, %s4435_s30 }
 0x8be   : > { %p4437_p13 = pnand %p4436_p11, %p6166_p5 }
 0x8bf   : > { %p4444_p3 = por %p4443_p7, %p4442_p12 }
 0x8c0   : > { %p4438_p6 = pneg %p4437_p13 }
 0x8c2   : > { %p4445_p2 = pnand %p4444_p3, %p4438_p6 }
 0x8c4   : > { %4448 = shalt.err (!%p4445_p2)
}
 0x8c5   : > { %s6451_s20 = sld [smem:[#allocation53_spill]] }
 0x8cb   : > { %s6452_s10 = smov %s6451_s20  ;;  %s4449_s22 = scalar_lea.hbm %s6451_s20, 32 }
 0x8cc   : > { %p4450_p8 = scmp.ne.s32.totalorder %s6452_s10, %s4449_s22  ;;  %p4455_p0 = scmp.lt.u32.totalorder %s4449_s22, %s6452_s10 }
 0x8ce   : > { %p4451_p10 = pnand %p4450_p8, %p6166_p5 }
 0x8d0   : > { %p4452_p9 = pneg %p4451_p10 }
 0x8d2   : > { %p4457_p1 = pnand %p4455_p0, %p4452_p9 }
 0x8d4   : > { %4460 = shalt.err (!%p4457_p1)
}
 0x8d5   : > { %4142 = dma.vmem_to_hbm [thread:$0]  (%p6166_p5), %s3593_s24, 32, %s6452_s10, [#allocation6]  }
 0x8d6   : > { %s4461_s0 = scalar_lea.vmem %s6170_s17, 32  ;;  %p4468_p6 = scmp.lt.s32.totalorder %s6170_s17, %s6170_s17 }
 0x8d7   : > { %p4462_p4 = scmp.ne.s32.totalorder %s6170_s17, %s4461_s0  ;;  %p4469_p12 = scmp.lt.s32.totalorder %s4461_s0, %s4461_s0 }
 0x8d9   : > { %p4463_p11 = pnand %p4462_p4, %p6166_p5  ;;  %p4470_p7 = por %p4469_p12, %p4468_p6 }
 0x8db   : > { %p4464_p13 = pneg %p4463_p11 }
 0x8dd   : > { %p4471_p3 = pnand %p4470_p7, %p4464_p13 }
 0x8df   : > { %4474 = shalt.err (!%p4471_p3)
}
 0x8e0   : > { %s6453_s8 = sld [smem:[#allocation54_spill]] }
 0x8e6   : > { %s4475_s6 = scalar_lea.hbm %s6453_s8, 32 }
 0x8e7   : > { %p4476_p2 = scmp.ne.s32.totalorder %s6453_s8, %s4475_s6  ;;  %p4481_p9 = scmp.lt.u32.totalorder %s4475_s6, %s6453_s8 }
 0x8e9   : > { %p4477_p8 = pnand %p4476_p2, %p6166_p5 }
 0x8eb   : > { %p4478_p10 = pneg %p4477_p8 }
 0x8ed   : > { %p4483_p0 = pnand %p4481_p9, %p4478_p10 }
 0x8ef   : > { %4486 = shalt.err (!%p4483_p0)
}
 0x8f0   : > { %4144 = dma.vmem_to_hbm [thread:$0]  (%p6166_p5), %s6170_s17, 32, %s6453_s8, [#allocation11]  }
 0x8f1   : > { %4540 = dma.done.wait (%p6166_p5), [#allocation6], 32  }
 0x8f2   : > { %4542 = vsyncadd (%p6166_p5), [#allocation6], 4294967264 }
 0x8f3   : > { %4544 = dma.done.wait (%p6166_p5), [#allocation11], 32  }
 0x8f4   : > { %4546 = vsyncadd (%p6166_p5), [#allocation11], 4294967264 }
 0x8f5 PF: > { %s34_s28 = sadd.s32 1, %s4589_s28   ;;  %s6454_s18 = sld [smem:[#allocation16_spill]] }
 0x8f6   : > { %p31_p1 = scmp.ge.s32.totalorder %s34_s28, 14   ;;  %s6455_s19 = sld [smem:[#allocation17_spill]] }
 0x8f7   : > { %s6456_s20 = sld [smem:[#allocation25_spill]]  ;;  %s6457_s21 = sld [smem:[#allocation18_spill]] }
 0x8f8   : > { %s6458_s22 = sld [smem:[#allocation19_spill]]  ;;  %s6459_s23 = sld [smem:[#allocation23_spill]] }
 0x8f9   : > { %s6460_s24 = sld [smem:[#allocation20_spill]]  ;;  %s6461_s25 = sld [smem:[#allocation21_spill]] }
 0x8fa   : > { %s6462_s26 = sld [smem:[#allocation22_spill]]  ;;  %s6463_s27 = sld [smem:[#allocation24_spill]] }
 0x8fb   :  { %33 = sbr.rel (!%p31_p1) target bundleno = 27 (0x1b), region = 173 }
 0x902   :  { %3620 = vsyncpa [#allocation5], 1 }
 0x903   :  { %3622 = vsyncpa [#allocation5 + $0x1], 1 }
 0x904   :  { %3623 = vsyncpa [#allocation8], 1 }
 0x905   :  { %3625 = vsyncpa [#allocation8 + $0x1], 1 }
 0x906   :  { %3626 = vsyncpa [#allocation6], 1 }
 0x907   :  { %3628 = vsyncpa [#allocation6 + $0x1], 1 }
 0x908   :  { %3629 = vsyncpa [#allocation11], 1 }

</bundles_post_ra>
